<compile_context>
chip_gen: v6e
topology: v6e:2x2x1
jax: 0.10.0
libtpu: 0.0.40
codegen_flags: <defaults>
</compile_context>

<pallas_src>
import math
from functools import partial

import jax
import jax.numpy as jnp
from jax.experimental import pallas as pl
from jax.experimental.pallas import tpu as pltpu

# ---- small synthetic T5-v1.1-style encoder config (tile-aligned toy dims) ----
VOCAB = 256
D_MODEL = 128        # real T5-v1.1-xxl: 4096 (also a multiple of 128)
N_HEADS = 4
D_KV = 32            # per-head dim
INNER = N_HEADS * D_KV   # 128
D_FF = 256
N_LAYERS = 2
SEQ = 8              # stands in for max_length=77
BATCH = 2
NUM_BUCKETS = 32
MAX_DISTANCE = 128
EPS = 1e-6

MXU_DTYPE = jnp.bfloat16   # matmul operand dtype (frozen weights, inference)


# ----------------------------- kernel helpers ------------------------------
def _rmsnorm(x, w):
    # T5LayerNorm: no mean subtraction, no bias.  f32 math.
    var = jnp.mean(x * x, axis=-1, keepdims=True)
    return x * jax.lax.rsqrt(var + EPS) * w


def _gelu_new(x):
    # HF "gelu_new" (tanh approximation), used by T5-v1.1 gated FFN.  f32 math.
    return 0.5 * x * (1.0 + jnp.tanh(0.7978845608028654 * (x + 0.044715 * x * x * x)))


def _split_heads(x2d):
    # (S, H*Dkv) -> (H, S, Dkv); static lane slices + outer-dim stack.
    return jnp.stack([x2d[:, h * D_KV:(h + 1) * D_KV] for h in range(N_HEADS)], axis=0)


# ------------------------------ fused Pallas kernel -------------------------
def t5_encoder_kernel(x_ref, bias_ref, ln1_ref, wqkv_ref, wo_ref,
                      ln2_ref, wffi_ref, wffo_ref, lnf_ref, out_ref, *, bblk):
    # x_ref/out_ref: (bblk*S, D) flat rows; weights stacked on leading L axis.
    bias = bias_ref[...]                        # (H, S, S) f32, shared by all layers
    x0 = x_ref[...]                             # (bblk*S, D) f32 residual stream

    def attend(q, k, v):
        # q, k, v: (S, inner) bf16 for ONE batch element.
        qh, kh, vh = _split_heads(q), _split_heads(k), _split_heads(v)      # (H,S,Dkv)
        # T5: unscaled scores + relative-position bias.
        s = jnp.einsum("hqd,hkd->hqk", qh, kh,
                       preferred_element_type=jnp.float32) + bias           # (H,S,S) f32
        s = s - jnp.max(s, axis=-1, keepdims=True)
        p = jnp.exp(s)
        p = p * pl.reciprocal(jnp.sum(p, axis=-1, keepdims=True), approx=True)
        ctx = jnp.einsum("hqk,hkd->hqd", p.astype(MXU_DTYPE), vh,
                         preferred_element_type=jnp.float32)                # (H,S,Dkv) f32
        # merge heads back to lanes: (S, inner), 32-lane-aligned concat
        return jnp.concatenate([ctx[h] for h in range(N_HEADS)], axis=-1)

    def layer(l, x):
        # ---- self-attention sub-layer ----
        h = _rmsnorm(x, ln1_ref[l]).astype(MXU_DTYPE)                       # (rows, D)
        # fused Q|K|V, all heads: ONE lane-wide 2-D matmul, f32 accumulation
        qkv = jnp.dot(h, wqkv_ref[l],
                      preferred_element_type=jnp.float32).astype(MXU_DTYPE)  # (rows, 3*inner)
        ctx_rows = []
        for b in range(bblk):                       # static, small; keeps attention per-batch
            r0, r1 = b * SEQ, (b + 1) * SEQ
            q = qkv[r0:r1, :INNER]
            k = qkv[r0:r1, INNER:2 * INNER]
            v = qkv[r0:r1, 2 * INNER:]
            ctx_rows.append(attend(q, k, v))
        ctx = jnp.concatenate(ctx_rows, axis=0).astype(MXU_DTYPE)           # (rows, inner)
        # output projection: ONE (rows, inner) @ (inner, D) matmul
        x = x + jnp.dot(ctx, wo_ref[l], preferred_element_type=jnp.float32)

        # ---- gated-GELU feed-forward sub-layer (wi_0 | wi_1 fused) ----
        h2 = _rmsnorm(x, ln2_ref[l]).astype(MXU_DTYPE)
        gu = jnp.dot(h2, wffi_ref[l], preferred_element_type=jnp.float32)   # (rows, 2*FF)
        act = _gelu_new(gu[:, :D_FF]) * gu[:, D_FF:]                        # split on 128-lane boundary
        x = x + jnp.dot(act.astype(MXU_DTYPE), wffo_ref[l],
                        preferred_element_type=jnp.float32)
        return x

    # TODO(synk): at real T5 sizes (14+ MB of bf16 weights per layer) this
    # all-layers-resident design must become a layer-streamed pipeline
    # (grid=(B, L) with l-indexed weight index_maps + VMEM residual scratch).
    x = jax.lax.fori_loop(0, N_LAYERS, layer, x0, unroll=(N_LAYERS <= 4))
    out_ref[...] = _rmsnorm(x, lnf_ref[...]).astype(out_ref.dtype)          # lane-dense store


# ------------------------------ kernel wrapper ------------------------------
def frozen_t5_embedder_forward(tokens, packed, *, batch_block=None):
    """T5 encoder forward on token ids; returns last_hidden_state (B, S, D)."""
    # TODO(synk): the HF T5Tokenizer (text -> input_ids) has no Pallas
    # equivalent; the kernel path starts from integer token ids.
    # TODO(synk): embedding gather kept as jnp.take; at real vocab sizes move it
    # in-kernel (PrefetchScalarGridSpec + pl.Element row gather) to overlap with
    # layer-0 weight DMA.
    B, S = tokens.shape
    assert S == SEQ
    if batch_block is None:
        batch_block = B       # collapse the batch grid (best on v5e/v6e);
                              # pass batch_block=B//2 on v7x to feed both TensorCores.
    assert B % batch_block == 0
    num_blocks = B // batch_block
    rows = batch_block * S

    x = jnp.take(packed["embed"], tokens.reshape(-1), axis=0)       # (B*S, D) f32, flat rows
    bias = compute_position_bias(packed["rel_bias"], S)             # (H, S, S) f32

    def inv(a):                 # whole-array block, invariant across the batch grid
        n = a.ndim
        return pl.BlockSpec(a.shape, lambda b: (0,) * n)

    kernel = partial(t5_encoder_kernel, bblk=batch_block)

    out_flat = pl.pallas_call(
        kernel,
        out_shape=jax.ShapeDtypeStruct((B * S, D_MODEL), jnp.float32),
        grid=(num_blocks,),
        in_specs=[
            pl.BlockSpec((rows, D_MODEL), lambda b: (b, 0)),
            inv(bias),
            inv(packed["ln1"]),
            inv(packed["wqkv"]),
            inv(packed["wo"]),
            inv(packed["ln2"]),
            inv(packed["wffi"]),
            inv(packed["wffo"]),
            inv(packed["final_ln"]),
        ],
        out_specs=pl.BlockSpec((rows, D_MODEL), lambda b: (b, 0)),
        compiler_params=pltpu.CompilerParams(
            dimension_semantics=("parallel",),
            vmem_limit_bytes=32 * 1024 * 1024),
    )(x, bias, packed["ln1"], packed["wqkv"], packed["wo"],
      packed["ln2"], packed["wffi"], packed["wffo"], packed["final_ln"])

    return out_flat.reshape(B, S, D_MODEL)


# --------------------------- JAX glue (setup only) ---------------------------
def relative_position_bucket(relative_position,
                             num_buckets=NUM_BUCKETS, max_distance=MAX_DISTANCE):
    # bidirectional bucketing, as in HF T5Attention._relative_position_bucket
    num_buckets //= 2
    ret = (relative_position > 0).astype(jnp.int32) * num_buckets
    n = jnp.abs(relative_position)
    max_exact = num_buckets // 2
    is_small = n < max_exact
    n_safe = jnp.maximum(n, 1)          # avoid log(0) in the discarded branch
    val_if_large = max_exact + (
        jnp.log(n_safe.astype(jnp.float32) / max_exact)
        / math.log(max_distance / max_exact)
        * (num_buckets - max_exact)
    ).astype(jnp.int32)
    val_if_large = jnp.minimum(val_if_large, num_buckets - 1)
    return ret + jnp.where(is_small, n, val_if_large)


def compute_position_bias(rel_bias_table, seq_len):
    # rel_bias_table: (NUM_BUCKETS, N_HEADS)  ->  bias: (N_HEADS, S, S)
    ctx = jnp.arange(seq_len, dtype=jnp.int32)[:, None]
    mem = jnp.arange(seq_len, dtype=jnp.int32)[None, :]
    buckets = relative_position_bucket(mem - ctx)
    bias = jnp.take(rel_bias_table, buckets, axis=0)     # (S, S, H)
    return jnp.transpose(bias, (2, 0, 1)).astype(jnp.float32)


def init_params(key):
    ks = jax.random.split(key, 2 + N_LAYERS)
    params = {
        "embed": (jax.random.normal(ks[0], (VOCAB, D_MODEL), jnp.float32) * 0.02),
        "rel_bias": (jax.random.normal(ks[1], (NUM_BUCKETS, N_HEADS), jnp.float32) * 0.02),
        "final_ln": jnp.ones((1, D_MODEL), jnp.float32),
        "layers": [],
    }
    for l in range(N_LAYERS):
        k = jax.random.split(ks[2 + l], 7)
        params["layers"].append({
            "ln1": jnp.ones((1, D_MODEL), jnp.float32),
            "wq": jax.random.normal(k[0], (D_MODEL, INNER), jnp.float32) * (D_MODEL ** -0.5),
            "wk": jax.random.normal(k[1], (D_MODEL, INNER), jnp.float32) * (D_MODEL ** -0.5),
            "wv": jax.random.normal(k[2], (D_MODEL, INNER), jnp.float32) * (D_MODEL ** -0.5),
            "wo": jax.random.normal(k[3], (INNER, D_MODEL), jnp.float32) * (INNER ** -0.5),
            "ln2": jnp.ones((1, D_MODEL), jnp.float32),
            "wi0": jax.random.normal(k[4], (D_MODEL, D_FF), jnp.float32) * (D_MODEL ** -0.5),
            "wi1": jax.random.normal(k[5], (D_MODEL, D_FF), jnp.float32) * (D_MODEL ** -0.5),
            "wff_o": jax.random.normal(k[6], (D_FF, D_MODEL), jnp.float32) * (D_FF ** -0.5),
        })
    return params


def pack_params(params):
    """Stack per-layer weights on a leading L axis; 2-D packed matmul layouts; bf16."""
    def stack(fn):
        return jnp.stack([fn(lp) for lp in params["layers"]], axis=0)

    return {
        "embed": params["embed"],                                        # (V, D)       f32
        "rel_bias": params["rel_bias"],                                  # (NB, H)      f32
        "ln1": stack(lambda lp: lp["ln1"]),                              # (L, 1, D)    f32
        "wqkv": stack(lambda lp: jnp.concatenate(
            [lp["wq"], lp["wk"], lp["wv"]], axis=1)).astype(MXU_DTYPE),  # (L, D, 3*inner)
        "wo": stack(lambda lp: lp["wo"]).astype(MXU_DTYPE),              # (L, inner, D)
        "ln2": stack(lambda lp: lp["ln2"]),                              # (L, 1, D)    f32
        "wffi": stack(lambda lp: jnp.concatenate(
            [lp["wi0"], lp["wi1"]], axis=1)).astype(MXU_DTYPE),          # (L, D, 2*FF)
        "wffo": stack(lambda lp: lp["wff_o"]).astype(MXU_DTYPE),         # (L, FF, D)
        "final_ln": params["final_ln"],                                  # (1, D)       f32
    }


if __name__ == "__main__":
    key = jax.random.PRNGKey(0)
    k_par, k_tok = jax.random.split(key)
    params = init_params(k_par)
    packed = pack_params(params)
    tokens = jax.random.randint(k_tok, (BATCH, SEQ), 0, VOCAB, dtype=jnp.int32)

    z = frozen_t5_embedder_forward(tokens, packed)
    z = jax.block_until_ready(z)

    assert z.shape == (BATCH, SEQ, D_MODEL) and z.dtype == jnp.float32
    assert bool(jnp.all(jnp.isfinite(z)))
    print("KERNEL_OK")
</pallas_src>

<mosaic_0001>
module attributes {stable_mosaic.version = 11 : i64} {
  func.func @t5_encoder_kernel(%arg0: i32, %arg1: memref<16x128xf32, #tpu.memory_space<vmem>>, %arg2: memref<4x8x8xf32, #tpu.memory_space<vmem>>, %arg3: memref<2x1x128xf32, #tpu.memory_space<vmem>>, %arg4: memref<2x128x384xbf16, #tpu.memory_space<vmem>>, %arg5: memref<2x128x128xbf16, #tpu.memory_space<vmem>>, %arg6: memref<2x1x128xf32, #tpu.memory_space<vmem>>, %arg7: memref<2x128x512xbf16, #tpu.memory_space<vmem>>, %arg8: memref<2x256x128xbf16, #tpu.memory_space<vmem>>, %arg9: memref<1x128xf32, #tpu.memory_space<vmem>>, %arg10: memref<16x128xf32, #tpu.memory_space<vmem>>) attributes {dimension_semantics = [#tpu.dimension_semantics<parallel>], iteration_bounds = array<i64: 1>, scalar_prefetch = 0 : i64, scratch_operands = 0 : i64, tpu.core_type = #tpu.core_type<tc>, window_params = [{transform_indices = @transform_0, window_bounds = array<i64: 16, 128>}, {pipeline_mode = #tpu.pipeline_mode<synchronous>, transform_indices = @transform_1, window_bounds = array<i64: 4, 8, 8>}, {pipeline_mode = #tpu.pipeline_mode<synchronous>, transform_indices = @transform_2, window_bounds = array<i64: 2, 1, 128>}, {pipeline_mode = #tpu.pipeline_mode<synchronous>, transform_indices = @transform_3, window_bounds = array<i64: 2, 128, 384>}, {pipeline_mode = #tpu.pipeline_mode<synchronous>, transform_indices = @transform_4, window_bounds = array<i64: 2, 128, 128>}, {pipeline_mode = #tpu.pipeline_mode<synchronous>, transform_indices = @transform_5, window_bounds = array<i64: 2, 1, 128>}, {pipeline_mode = #tpu.pipeline_mode<synchronous>, transform_indices = @transform_6, window_bounds = array<i64: 2, 128, 512>}, {pipeline_mode = #tpu.pipeline_mode<synchronous>, transform_indices = @transform_7, window_bounds = array<i64: 2, 256, 128>}, {pipeline_mode = #tpu.pipeline_mode<synchronous>, transform_indices = @transform_8, window_bounds = array<i64: 1, 128>}, {transform_indices = @transform_9, window_bounds = array<i64: 16, 128>}]} {
    %c0 = arith.constant 0 : index
    %c0_0 = arith.constant 0 : index
    %c0_1 = arith.constant 0 : index
    %0 = vector.load %arg2[%c0, %c0_0, %c0_1] : memref<4x8x8xf32, #tpu.memory_space<vmem>>, vector<4x8x8xf32>
    %c0_2 = arith.constant 0 : index
    %c0_3 = arith.constant 0 : index
    %1 = vector.load %arg1[%c0_2, %c0_3] : memref<16x128xf32, #tpu.memory_space<vmem>>, vector<16x128xf32>
    %c0_i32 = arith.constant 0 : i32
    %2 = arith.index_cast %c0_i32 : i32 to index
    %c0_4 = arith.constant 0 : index
    %c0_5 = arith.constant 0 : index
    %3 = vector.load %arg3[%2, %c0_4, %c0_5] : memref<2x1x128xf32, #tpu.memory_space<vmem>>, vector<1x1x128xf32>
    %4 = vector.shape_cast %3 : vector<1x1x128xf32> to vector<1x128xf32>
    %5 = arith.mulf %1, %1 : vector<16x128xf32>
    %cst = arith.constant dense<0.000000e+00> : vector<16xf32>
    %6 = vector.multi_reduction <add>, %5, %cst [1] : vector<16x128xf32> to vector<16xf32>
    %7 = vector.shape_cast %6 : vector<16xf32> to vector<16x1xf32>
    %cst_6 = arith.constant 1.280000e+02 : f32
    %8 = vector.broadcast %cst_6 : f32 to vector<16x1xf32>
    %9 = arith.divf %7, %8 : vector<16x1xf32>
    %cst_7 = arith.constant 9.99999997E-7 : f32
    %10 = vector.broadcast %cst_7 : f32 to vector<16x1xf32>
    %11 = arith.addf %9, %10 : vector<16x1xf32>
    %12 = math.rsqrt %11 : vector<16x1xf32>
    %13 = vector.broadcast %12 : vector<16x1xf32> to vector<16x128xf32>
    %14 = arith.mulf %1, %13 : vector<16x128xf32>
    %15 = vector.broadcast %4 : vector<1x128xf32> to vector<16x128xf32>
    %16 = arith.mulf %14, %15 : vector<16x128xf32>
    %17 = arith.truncf %16 : vector<16x128xf32> to vector<16x128xbf16>
    %18 = arith.index_cast %c0_i32 : i32 to index
    %c0_8 = arith.constant 0 : index
    %c0_9 = arith.constant 0 : index
    %19 = vector.load %arg4[%18, %c0_8, %c0_9] : memref<2x128x384xbf16, #tpu.memory_space<vmem>>, vector<1x128x384xbf16>
    %20 = vector.shape_cast %19 : vector<1x128x384xbf16> to vector<128x384xbf16>
    %cst_10 = arith.constant dense<0.000000e+00> : vector<16x384xf32>
    %21 = tpu.matmul %17, %20, %cst_10 {dimension_numbers = #tpu.dot_dimension_numbers<[1], [0], [0], [1], [0, 0, 1, 1], [], []>} : vector<16x128xbf16>, vector<128x384xbf16>, vector<16x384xf32> -> vector<16x384xf32>
    %22 = arith.truncf %21 : vector<16x384xf32> to vector<16x384xbf16>
    %23 = vector.extract_strided_slice %22 {offsets = [0, 0], sizes = [8, 128], strides = [1, 1]} : vector<16x384xbf16> to vector<8x128xbf16>
    %24 = vector.extract_strided_slice %22 {offsets = [0, 128], sizes = [8, 128], strides = [1, 1]} : vector<16x384xbf16> to vector<8x128xbf16>
    %25 = vector.extract_strided_slice %22 {offsets = [0, 256], sizes = [8, 128], strides = [1, 1]} : vector<16x384xbf16> to vector<8x128xbf16>
    %26 = vector.extract_strided_slice %23 {offsets = [0, 0], sizes = [8, 32], strides = [1, 1]} : vector<8x128xbf16> to vector<8x32xbf16>
    %27 = vector.extract_strided_slice %23 {offsets = [0, 32], sizes = [8, 32], strides = [1, 1]} : vector<8x128xbf16> to vector<8x32xbf16>
    %28 = vector.extract_strided_slice %23 {offsets = [0, 64], sizes = [8, 32], strides = [1, 1]} : vector<8x128xbf16> to vector<8x32xbf16>
    %29 = vector.extract_strided_slice %23 {offsets = [0, 96], sizes = [8, 32], strides = [1, 1]} : vector<8x128xbf16> to vector<8x32xbf16>
    %30 = vector.shape_cast %26 : vector<8x32xbf16> to vector<1x8x32xbf16>
    %31 = vector.shape_cast %27 : vector<8x32xbf16> to vector<1x8x32xbf16>
    %32 = vector.shape_cast %28 : vector<8x32xbf16> to vector<1x8x32xbf16>
    %33 = vector.shape_cast %29 : vector<8x32xbf16> to vector<1x8x32xbf16>
    %34 = tpu.concatenate %30, %31, %32, %33 in 0 : vector<1x8x32xbf16>, vector<1x8x32xbf16>, vector<1x8x32xbf16>, vector<1x8x32xbf16> -> vector<4x8x32xbf16>
    %35 = vector.extract_strided_slice %24 {offsets = [0, 0], sizes = [8, 32], strides = [1, 1]} : vector<8x128xbf16> to vector<8x32xbf16>
    %36 = vector.extract_strided_slice %24 {offsets = [0, 32], sizes = [8, 32], strides = [1, 1]} : vector<8x128xbf16> to vector<8x32xbf16>
    %37 = vector.extract_strided_slice %24 {offsets = [0, 64], sizes = [8, 32], strides = [1, 1]} : vector<8x128xbf16> to vector<8x32xbf16>
    %38 = vector.extract_strided_slice %24 {offsets = [0, 96], sizes = [8, 32], strides = [1, 1]} : vector<8x128xbf16> to vector<8x32xbf16>
    %39 = vector.shape_cast %35 : vector<8x32xbf16> to vector<1x8x32xbf16>
    %40 = vector.shape_cast %36 : vector<8x32xbf16> to vector<1x8x32xbf16>
    %41 = vector.shape_cast %37 : vector<8x32xbf16> to vector<1x8x32xbf16>
    %42 = vector.shape_cast %38 : vector<8x32xbf16> to vector<1x8x32xbf16>
    %43 = tpu.concatenate %39, %40, %41, %42 in 0 : vector<1x8x32xbf16>, vector<1x8x32xbf16>, vector<1x8x32xbf16>, vector<1x8x32xbf16> -> vector<4x8x32xbf16>
    %44 = vector.extract_strided_slice %25 {offsets = [0, 0], sizes = [8, 32], strides = [1, 1]} : vector<8x128xbf16> to vector<8x32xbf16>
    %45 = vector.extract_strided_slice %25 {offsets = [0, 32], sizes = [8, 32], strides = [1, 1]} : vector<8x128xbf16> to vector<8x32xbf16>
    %46 = vector.extract_strided_slice %25 {offsets = [0, 64], sizes = [8, 32], strides = [1, 1]} : vector<8x128xbf16> to vector<8x32xbf16>
    %47 = vector.extract_strided_slice %25 {offsets = [0, 96], sizes = [8, 32], strides = [1, 1]} : vector<8x128xbf16> to vector<8x32xbf16>
    %48 = vector.shape_cast %44 : vector<8x32xbf16> to vector<1x8x32xbf16>
    %49 = vector.shape_cast %45 : vector<8x32xbf16> to vector<1x8x32xbf16>
    %50 = vector.shape_cast %46 : vector<8x32xbf16> to vector<1x8x32xbf16>
    %51 = vector.shape_cast %47 : vector<8x32xbf16> to vector<1x8x32xbf16>
    %52 = tpu.concatenate %48, %49, %50, %51 in 0 : vector<1x8x32xbf16>, vector<1x8x32xbf16>, vector<1x8x32xbf16>, vector<1x8x32xbf16> -> vector<4x8x32xbf16>
    "tpu.trace_start"() <{level = 10 : i32, message = "hqd,hkd->hqk"}> : () -> ()
    %cst_11 = arith.constant dense<0.000000e+00> : vector<4x8x8xf32>
    %53 = tpu.matmul %34, %43, %cst_11 {dimension_numbers = #tpu.dot_dimension_numbers<[2], [2], [1], [1], [0, 0, 0, 1, 1, 1], [0], [0]>} : vector<4x8x32xbf16>, vector<4x8x32xbf16>, vector<4x8x8xf32> -> vector<4x8x8xf32>
    "tpu.trace_stop"() : () -> ()
    %54 = arith.addf %53, %0 : vector<4x8x8xf32>
    %cst_12 = arith.constant dense<0xFF800000> : vector<4x8xf32>
    %55 = vector.multi_reduction <maximumf>, %54, %cst_12 [2] : vector<4x8x8xf32> to vector<4x8xf32>
    %56 = vector.shape_cast %55 : vector<4x8xf32> to vector<4x8x1xf32>
    %57 = vector.broadcast %56 : vector<4x8x1xf32> to vector<4x8x8xf32>
    %58 = arith.subf %54, %57 : vector<4x8x8xf32>
    %59 = math.exp %58 : vector<4x8x8xf32>
    %cst_13 = arith.constant dense<0.000000e+00> : vector<4x8xf32>
    %60 = vector.multi_reduction <add>, %59, %cst_13 [2] : vector<4x8x8xf32> to vector<4x8xf32>
    %61 = vector.shape_cast %60 : vector<4x8xf32> to vector<4x8x1xf32>
    %62 = tpu.reciprocal %61 {approx = true} : vector<4x8x1xf32> -> vector<4x8x1xf32>
    %63 = vector.broadcast %62 : vector<4x8x1xf32> to vector<4x8x8xf32>
    %64 = arith.mulf %59, %63 : vector<4x8x8xf32>
    %65 = arith.truncf %64 : vector<4x8x8xf32> to vector<4x8x8xbf16>
    "tpu.trace_start"() <{level = 10 : i32, message = "hqk,hkd->hqd"}> : () -> ()
    %cst_14 = arith.constant dense<0.000000e+00> : vector<4x8x32xf32>
    %66 = tpu.matmul %65, %52, %cst_14 {dimension_numbers = #tpu.dot_dimension_numbers<[2], [1], [1], [2], [0, 0, 0, 1, 1, 2], [0], [0]>} : vector<4x8x8xbf16>, vector<4x8x32xbf16>, vector<4x8x32xf32> -> vector<4x8x32xf32>
    "tpu.trace_stop"() : () -> ()
    %67 = vector.extract_strided_slice %66 {offsets = [0, 0, 0], sizes = [1, 8, 32], strides = [1, 1, 1]} : vector<4x8x32xf32> to vector<1x8x32xf32>
    %68 = vector.shape_cast %67 : vector<1x8x32xf32> to vector<8x32xf32>
    %69 = vector.extract_strided_slice %66 {offsets = [1, 0, 0], sizes = [1, 8, 32], strides = [1, 1, 1]} : vector<4x8x32xf32> to vector<1x8x32xf32>
    %70 = vector.shape_cast %69 : vector<1x8x32xf32> to vector<8x32xf32>
    %71 = vector.extract_strided_slice %66 {offsets = [2, 0, 0], sizes = [1, 8, 32], strides = [1, 1, 1]} : vector<4x8x32xf32> to vector<1x8x32xf32>
    %72 = vector.shape_cast %71 : vector<1x8x32xf32> to vector<8x32xf32>
    %73 = vector.extract_strided_slice %66 {offsets = [3, 0, 0], sizes = [1, 8, 32], strides = [1, 1, 1]} : vector<4x8x32xf32> to vector<1x8x32xf32>
    %74 = vector.shape_cast %73 : vector<1x8x32xf32> to vector<8x32xf32>
    %75 = tpu.concatenate %68, %70, %72, %74 in 1 : vector<8x32xf32>, vector<8x32xf32>, vector<8x32xf32>, vector<8x32xf32> -> vector<8x128xf32>
    %76 = vector.extract_strided_slice %22 {offsets = [8, 0], sizes = [8, 128], strides = [1, 1]} : vector<16x384xbf16> to vector<8x128xbf16>
    %77 = vector.extract_strided_slice %22 {offsets = [8, 128], sizes = [8, 128], strides = [1, 1]} : vector<16x384xbf16> to vector<8x128xbf16>
    %78 = vector.extract_strided_slice %22 {offsets = [8, 256], sizes = [8, 128], strides = [1, 1]} : vector<16x384xbf16> to vector<8x128xbf16>
    %79 = vector.extract_strided_slice %76 {offsets = [0, 0], sizes = [8, 32], strides = [1, 1]} : vector<8x128xbf16> to vector<8x32xbf16>
    %80 = vector.extract_strided_slice %76 {offsets = [0, 32], sizes = [8, 32], strides = [1, 1]} : vector<8x128xbf16> to vector<8x32xbf16>
    %81 = vector.extract_strided_slice %76 {offsets = [0, 64], sizes = [8, 32], strides = [1, 1]} : vector<8x128xbf16> to vector<8x32xbf16>
    %82 = vector.extract_strided_slice %76 {offsets = [0, 96], sizes = [8, 32], strides = [1, 1]} : vector<8x128xbf16> to vector<8x32xbf16>
    %83 = vector.shape_cast %79 : vector<8x32xbf16> to vector<1x8x32xbf16>
    %84 = vector.shape_cast %80 : vector<8x32xbf16> to vector<1x8x32xbf16>
    %85 = vector.shape_cast %81 : vector<8x32xbf16> to vector<1x8x32xbf16>
    %86 = vector.shape_cast %82 : vector<8x32xbf16> to vector<1x8x32xbf16>
    %87 = tpu.concatenate %83, %84, %85, %86 in 0 : vector<1x8x32xbf16>, vector<1x8x32xbf16>, vector<1x8x32xbf16>, vector<1x8x32xbf16> -> vector<4x8x32xbf16>
    %88 = vector.extract_strided_slice %77 {offsets = [0, 0], sizes = [8, 32], strides = [1, 1]} : vector<8x128xbf16> to vector<8x32xbf16>
    %89 = vector.extract_strided_slice %77 {offsets = [0, 32], sizes = [8, 32], strides = [1, 1]} : vector<8x128xbf16> to vector<8x32xbf16>
    %90 = vector.extract_strided_slice %77 {offsets = [0, 64], sizes = [8, 32], strides = [1, 1]} : vector<8x128xbf16> to vector<8x32xbf16>
    %91 = vector.extract_strided_slice %77 {offsets = [0, 96], sizes = [8, 32], strides = [1, 1]} : vector<8x128xbf16> to vector<8x32xbf16>
    %92 = vector.shape_cast %88 : vector<8x32xbf16> to vector<1x8x32xbf16>
    %93 = vector.shape_cast %89 : vector<8x32xbf16> to vector<1x8x32xbf16>
    %94 = vector.shape_cast %90 : vector<8x32xbf16> to vector<1x8x32xbf16>
    %95 = vector.shape_cast %91 : vector<8x32xbf16> to vector<1x8x32xbf16>
    %96 = tpu.concatenate %92, %93, %94, %95 in 0 : vector<1x8x32xbf16>, vector<1x8x32xbf16>, vector<1x8x32xbf16>, vector<1x8x32xbf16> -> vector<4x8x32xbf16>
    %97 = vector.extract_strided_slice %78 {offsets = [0, 0], sizes = [8, 32], strides = [1, 1]} : vector<8x128xbf16> to vector<8x32xbf16>
    %98 = vector.extract_strided_slice %78 {offsets = [0, 32], sizes = [8, 32], strides = [1, 1]} : vector<8x128xbf16> to vector<8x32xbf16>
    %99 = vector.extract_strided_slice %78 {offsets = [0, 64], sizes = [8, 32], strides = [1, 1]} : vector<8x128xbf16> to vector<8x32xbf16>
    %100 = vector.extract_strided_slice %78 {offsets = [0, 96], sizes = [8, 32], strides = [1, 1]} : vector<8x128xbf16> to vector<8x32xbf16>
    %101 = vector.shape_cast %97 : vector<8x32xbf16> to vector<1x8x32xbf16>
    %102 = vector.shape_cast %98 : vector<8x32xbf16> to vector<1x8x32xbf16>
    %103 = vector.shape_cast %99 : vector<8x32xbf16> to vector<1x8x32xbf16>
    %104 = vector.shape_cast %100 : vector<8x32xbf16> to vector<1x8x32xbf16>
    %105 = tpu.concatenate %101, %102, %103, %104 in 0 : vector<1x8x32xbf16>, vector<1x8x32xbf16>, vector<1x8x32xbf16>, vector<1x8x32xbf16> -> vector<4x8x32xbf16>
    "tpu.trace_start"() <{level = 10 : i32, message = "hqd,hkd->hqk"}> : () -> ()
    %cst_15 = arith.constant dense<0.000000e+00> : vector<4x8x8xf32>
    %106 = tpu.matmul %87, %96, %cst_15 {dimension_numbers = #tpu.dot_dimension_numbers<[2], [2], [1], [1], [0, 0, 0, 1, 1, 1], [0], [0]>} : vector<4x8x32xbf16>, vector<4x8x32xbf16>, vector<4x8x8xf32> -> vector<4x8x8xf32>
    "tpu.trace_stop"() : () -> ()
    %107 = arith.addf %106, %0 : vector<4x8x8xf32>
    %cst_16 = arith.constant dense<0xFF800000> : vector<4x8xf32>
    %108 = vector.multi_reduction <maximumf>, %107, %cst_16 [2] : vector<4x8x8xf32> to vector<4x8xf32>
    %109 = vector.shape_cast %108 : vector<4x8xf32> to vector<4x8x1xf32>
    %110 = vector.broadcast %109 : vector<4x8x1xf32> to vector<4x8x8xf32>
    %111 = arith.subf %107, %110 : vector<4x8x8xf32>
    %112 = math.exp %111 : vector<4x8x8xf32>
    %cst_17 = arith.constant dense<0.000000e+00> : vector<4x8xf32>
    %113 = vector.multi_reduction <add>, %112, %cst_17 [2] : vector<4x8x8xf32> to vector<4x8xf32>
    %114 = vector.shape_cast %113 : vector<4x8xf32> to vector<4x8x1xf32>
    %115 = tpu.reciprocal %114 {approx = true} : vector<4x8x1xf32> -> vector<4x8x1xf32>
    %116 = vector.broadcast %115 : vector<4x8x1xf32> to vector<4x8x8xf32>
    %117 = arith.mulf %112, %116 : vector<4x8x8xf32>
    %118 = arith.truncf %117 : vector<4x8x8xf32> to vector<4x8x8xbf16>
    "tpu.trace_start"() <{level = 10 : i32, message = "hqk,hkd->hqd"}> : () -> ()
    %cst_18 = arith.constant dense<0.000000e+00> : vector<4x8x32xf32>
    %119 = tpu.matmul %118, %105, %cst_18 {dimension_numbers = #tpu.dot_dimension_numbers<[2], [1], [1], [2], [0, 0, 0, 1, 1, 2], [0], [0]>} : vector<4x8x8xbf16>, vector<4x8x32xbf16>, vector<4x8x32xf32> -> vector<4x8x32xf32>
    "tpu.trace_stop"() : () -> ()
    %120 = vector.extract_strided_slice %119 {offsets = [0, 0, 0], sizes = [1, 8, 32], strides = [1, 1, 1]} : vector<4x8x32xf32> to vector<1x8x32xf32>
    %121 = vector.shape_cast %120 : vector<1x8x32xf32> to vector<8x32xf32>
    %122 = vector.extract_strided_slice %119 {offsets = [1, 0, 0], sizes = [1, 8, 32], strides = [1, 1, 1]} : vector<4x8x32xf32> to vector<1x8x32xf32>
    %123 = vector.shape_cast %122 : vector<1x8x32xf32> to vector<8x32xf32>
    %124 = vector.extract_strided_slice %119 {offsets = [2, 0, 0], sizes = [1, 8, 32], strides = [1, 1, 1]} : vector<4x8x32xf32> to vector<1x8x32xf32>
    %125 = vector.shape_cast %124 : vector<1x8x32xf32> to vector<8x32xf32>
    %126 = vector.extract_strided_slice %119 {offsets = [3, 0, 0], sizes = [1, 8, 32], strides = [1, 1, 1]} : vector<4x8x32xf32> to vector<1x8x32xf32>
    %127 = vector.shape_cast %126 : vector<1x8x32xf32> to vector<8x32xf32>
    %128 = tpu.concatenate %121, %123, %125, %127 in 1 : vector<8x32xf32>, vector<8x32xf32>, vector<8x32xf32>, vector<8x32xf32> -> vector<8x128xf32>
    %129 = tpu.concatenate %75, %128 in 0 : vector<8x128xf32>, vector<8x128xf32> -> vector<16x128xf32>
    %130 = arith.truncf %129 : vector<16x128xf32> to vector<16x128xbf16>
    %131 = arith.index_cast %c0_i32 : i32 to index
    %c0_19 = arith.constant 0 : index
    %c0_20 = arith.constant 0 : index
    %132 = vector.load %arg5[%131, %c0_19, %c0_20] : memref<2x128x128xbf16, #tpu.memory_space<vmem>>, vector<1x128x128xbf16>
    %133 = vector.shape_cast %132 : vector<1x128x128xbf16> to vector<128x128xbf16>
    %cst_21 = arith.constant dense<0.000000e+00> : vector<16x128xf32>
    %134 = tpu.matmul %130, %133, %cst_21 {dimension_numbers = #tpu.dot_dimension_numbers<[1], [0], [0], [1], [0, 0, 1, 1], [], []>} : vector<16x128xbf16>, vector<128x128xbf16>, vector<16x128xf32> -> vector<16x128xf32>
    %135 = arith.addf %1, %134 : vector<16x128xf32>
    %136 = arith.index_cast %c0_i32 : i32 to index
    %c0_22 = arith.constant 0 : index
    %c0_23 = arith.constant 0 : index
    %137 = vector.load %arg6[%136, %c0_22, %c0_23] : memref<2x1x128xf32, #tpu.memory_space<vmem>>, vector<1x1x128xf32>
    %138 = vector.shape_cast %137 : vector<1x1x128xf32> to vector<1x128xf32>
    %139 = arith.mulf %135, %135 : vector<16x128xf32>
    %cst_24 = arith.constant dense<0.000000e+00> : vector<16xf32>
    %140 = vector.multi_reduction <add>, %139, %cst_24 [1] : vector<16x128xf32> to vector<16xf32>
    %141 = vector.shape_cast %140 : vector<16xf32> to vector<16x1xf32>
    %cst_25 = arith.constant 1.280000e+02 : f32
    %142 = vector.broadcast %cst_25 : f32 to vector<16x1xf32>
    %143 = arith.divf %141, %142 : vector<16x1xf32>
    %cst_26 = arith.constant 9.99999997E-7 : f32
    %144 = vector.broadcast %cst_26 : f32 to vector<16x1xf32>
    %145 = arith.addf %143, %144 : vector<16x1xf32>
    %146 = math.rsqrt %145 : vector<16x1xf32>
    %147 = vector.broadcast %146 : vector<16x1xf32> to vector<16x128xf32>
    %148 = arith.mulf %135, %147 : vector<16x128xf32>
    %149 = vector.broadcast %138 : vector<1x128xf32> to vector<16x128xf32>
    %150 = arith.mulf %148, %149 : vector<16x128xf32>
    %151 = arith.truncf %150 : vector<16x128xf32> to vector<16x128xbf16>
    %152 = arith.index_cast %c0_i32 : i32 to index
    %c0_27 = arith.constant 0 : index
    %c0_28 = arith.constant 0 : index
    %153 = vector.load %arg7[%152, %c0_27, %c0_28] : memref<2x128x512xbf16, #tpu.memory_space<vmem>>, vector<1x128x512xbf16>
    %154 = vector.shape_cast %153 : vector<1x128x512xbf16> to vector<128x512xbf16>
    %cst_29 = arith.constant dense<0.000000e+00> : vector<16x512xf32>
    %155 = tpu.matmul %151, %154, %cst_29 {dimension_numbers = #tpu.dot_dimension_numbers<[1], [0], [0], [1], [0, 0, 1, 1], [], []>} : vector<16x128xbf16>, vector<128x512xbf16>, vector<16x512xf32> -> vector<16x512xf32>
    %156 = vector.extract_strided_slice %155 {offsets = [0, 0], sizes = [16, 256], strides = [1, 1]} : vector<16x512xf32> to vector<16x256xf32>
    %cst_30 = arith.constant 5.000000e-01 : f32
    %157 = vector.broadcast %cst_30 : f32 to vector<16x256xf32>
    %158 = arith.mulf %157, %156 : vector<16x256xf32>
    %cst_31 = arith.constant 4.471500e-02 : f32
    %159 = vector.broadcast %cst_31 : f32 to vector<16x256xf32>
    %160 = arith.mulf %159, %156 : vector<16x256xf32>
    %161 = arith.mulf %160, %156 : vector<16x256xf32>
    %162 = arith.mulf %161, %156 : vector<16x256xf32>
    %163 = arith.addf %156, %162 : vector<16x256xf32>
    %cst_32 = arith.constant 0.797884583 : f32
    %164 = vector.broadcast %cst_32 : f32 to vector<16x256xf32>
    %165 = arith.mulf %164, %163 : vector<16x256xf32>
    %166 = math.tanh %165 : vector<16x256xf32>
    %cst_33 = arith.constant 1.000000e+00 : f32
    %167 = vector.broadcast %cst_33 : f32 to vector<16x256xf32>
    %168 = arith.addf %167, %166 : vector<16x256xf32>
    %169 = arith.mulf %158, %168 : vector<16x256xf32>
    %170 = vector.extract_strided_slice %155 {offsets = [0, 256], sizes = [16, 256], strides = [1, 1]} : vector<16x512xf32> to vector<16x256xf32>
    %171 = arith.mulf %169, %170 : vector<16x256xf32>
    %172 = arith.truncf %171 : vector<16x256xf32> to vector<16x256xbf16>
    %173 = arith.index_cast %c0_i32 : i32 to index
    %c0_34 = arith.constant 0 : index
    %c0_35 = arith.constant 0 : index
    %174 = vector.load %arg8[%173, %c0_34, %c0_35] : memref<2x256x128xbf16, #tpu.memory_space<vmem>>, vector<1x256x128xbf16>
    %175 = vector.shape_cast %174 : vector<1x256x128xbf16> to vector<256x128xbf16>
    %cst_36 = arith.constant dense<0.000000e+00> : vector<16x128xf32>
    %176 = tpu.matmul %172, %175, %cst_36 {dimension_numbers = #tpu.dot_dimension_numbers<[1], [0], [0], [1], [0, 0, 1, 1], [], []>} : vector<16x256xbf16>, vector<256x128xbf16>, vector<16x128xf32> -> vector<16x128xf32>
    %177 = arith.addf %135, %176 : vector<16x128xf32>
    %c1_i32 = arith.constant 1 : i32
    %178 = arith.index_cast %c1_i32 : i32 to index
    %c0_37 = arith.constant 0 : index
    %c0_38 = arith.constant 0 : index
    %179 = vector.load %arg3[%178, %c0_37, %c0_38] : memref<2x1x128xf32, #tpu.memory_space<vmem>>, vector<1x1x128xf32>
    %180 = vector.shape_cast %179 : vector<1x1x128xf32> to vector<1x128xf32>
    %181 = arith.mulf %177, %177 : vector<16x128xf32>
    %cst_39 = arith.constant dense<0.000000e+00> : vector<16xf32>
    %182 = vector.multi_reduction <add>, %181, %cst_39 [1] : vector<16x128xf32> to vector<16xf32>
    %183 = vector.shape_cast %182 : vector<16xf32> to vector<16x1xf32>
    %cst_40 = arith.constant 1.280000e+02 : f32
    %184 = vector.broadcast %cst_40 : f32 to vector<16x1xf32>
    %185 = arith.divf %183, %184 : vector<16x1xf32>
    %cst_41 = arith.constant 9.99999997E-7 : f32
    %186 = vector.broadcast %cst_41 : f32 to vector<16x1xf32>
    %187 = arith.addf %185, %186 : vector<16x1xf32>
    %188 = math.rsqrt %187 : vector<16x1xf32>
    %189 = vector.broadcast %188 : vector<16x1xf32> to vector<16x128xf32>
    %190 = arith.mulf %177, %189 : vector<16x128xf32>
    %191 = vector.broadcast %180 : vector<1x128xf32> to vector<16x128xf32>
    %192 = arith.mulf %190, %191 : vector<16x128xf32>
    %193 = arith.truncf %192 : vector<16x128xf32> to vector<16x128xbf16>
    %194 = arith.index_cast %c1_i32 : i32 to index
    %c0_42 = arith.constant 0 : index
    %c0_43 = arith.constant 0 : index
    %195 = vector.load %arg4[%194, %c0_42, %c0_43] : memref<2x128x384xbf16, #tpu.memory_space<vmem>>, vector<1x128x384xbf16>
    %196 = vector.shape_cast %195 : vector<1x128x384xbf16> to vector<128x384xbf16>
    %cst_44 = arith.constant dense<0.000000e+00> : vector<16x384xf32>
    %197 = tpu.matmul %193, %196, %cst_44 {dimension_numbers = #tpu.dot_dimension_numbers<[1], [0], [0], [1], [0, 0, 1, 1], [], []>} : vector<16x128xbf16>, vector<128x384xbf16>, vector<16x384xf32> -> vector<16x384xf32>
    %198 = arith.truncf %197 : vector<16x384xf32> to vector<16x384xbf16>
    %199 = vector.extract_strided_slice %198 {offsets = [0, 0], sizes = [8, 128], strides = [1, 1]} : vector<16x384xbf16> to vector<8x128xbf16>
    %200 = vector.extract_strided_slice %198 {offsets = [0, 128], sizes = [8, 128], strides = [1, 1]} : vector<16x384xbf16> to vector<8x128xbf16>
    %201 = vector.extract_strided_slice %198 {offsets = [0, 256], sizes = [8, 128], strides = [1, 1]} : vector<16x384xbf16> to vector<8x128xbf16>
    %202 = vector.extract_strided_slice %199 {offsets = [0, 0], sizes = [8, 32], strides = [1, 1]} : vector<8x128xbf16> to vector<8x32xbf16>
    %203 = vector.extract_strided_slice %199 {offsets = [0, 32], sizes = [8, 32], strides = [1, 1]} : vector<8x128xbf16> to vector<8x32xbf16>
    %204 = vector.extract_strided_slice %199 {offsets = [0, 64], sizes = [8, 32], strides = [1, 1]} : vector<8x128xbf16> to vector<8x32xbf16>
    %205 = vector.extract_strided_slice %199 {offsets = [0, 96], sizes = [8, 32], strides = [1, 1]} : vector<8x128xbf16> to vector<8x32xbf16>
    %206 = vector.shape_cast %202 : vector<8x32xbf16> to vector<1x8x32xbf16>
    %207 = vector.shape_cast %203 : vector<8x32xbf16> to vector<1x8x32xbf16>
    %208 = vector.shape_cast %204 : vector<8x32xbf16> to vector<1x8x32xbf16>
    %209 = vector.shape_cast %205 : vector<8x32xbf16> to vector<1x8x32xbf16>
    %210 = tpu.concatenate %206, %207, %208, %209 in 0 : vector<1x8x32xbf16>, vector<1x8x32xbf16>, vector<1x8x32xbf16>, vector<1x8x32xbf16> -> vector<4x8x32xbf16>
    %211 = vector.extract_strided_slice %200 {offsets = [0, 0], sizes = [8, 32], strides = [1, 1]} : vector<8x128xbf16> to vector<8x32xbf16>
    %212 = vector.extract_strided_slice %200 {offsets = [0, 32], sizes = [8, 32], strides = [1, 1]} : vector<8x128xbf16> to vector<8x32xbf16>
    %213 = vector.extract_strided_slice %200 {offsets = [0, 64], sizes = [8, 32], strides = [1, 1]} : vector<8x128xbf16> to vector<8x32xbf16>
    %214 = vector.extract_strided_slice %200 {offsets = [0, 96], sizes = [8, 32], strides = [1, 1]} : vector<8x128xbf16> to vector<8x32xbf16>
    %215 = vector.shape_cast %211 : vector<8x32xbf16> to vector<1x8x32xbf16>
    %216 = vector.shape_cast %212 : vector<8x32xbf16> to vector<1x8x32xbf16>
    %217 = vector.shape_cast %213 : vector<8x32xbf16> to vector<1x8x32xbf16>
    %218 = vector.shape_cast %214 : vector<8x32xbf16> to vector<1x8x32xbf16>
    %219 = tpu.concatenate %215, %216, %217, %218 in 0 : vector<1x8x32xbf16>, vector<1x8x32xbf16>, vector<1x8x32xbf16>, vector<1x8x32xbf16> -> vector<4x8x32xbf16>
    %220 = vector.extract_strided_slice %201 {offsets = [0, 0], sizes = [8, 32], strides = [1, 1]} : vector<8x128xbf16> to vector<8x32xbf16>
    %221 = vector.extract_strided_slice %201 {offsets = [0, 32], sizes = [8, 32], strides = [1, 1]} : vector<8x128xbf16> to vector<8x32xbf16>
    %222 = vector.extract_strided_slice %201 {offsets = [0, 64], sizes = [8, 32], strides = [1, 1]} : vector<8x128xbf16> to vector<8x32xbf16>
    %223 = vector.extract_strided_slice %201 {offsets = [0, 96], sizes = [8, 32], strides = [1, 1]} : vector<8x128xbf16> to vector<8x32xbf16>
    %224 = vector.shape_cast %220 : vector<8x32xbf16> to vector<1x8x32xbf16>
    %225 = vector.shape_cast %221 : vector<8x32xbf16> to vector<1x8x32xbf16>
    %226 = vector.shape_cast %222 : vector<8x32xbf16> to vector<1x8x32xbf16>
    %227 = vector.shape_cast %223 : vector<8x32xbf16> to vector<1x8x32xbf16>
    %228 = tpu.concatenate %224, %225, %226, %227 in 0 : vector<1x8x32xbf16>, vector<1x8x32xbf16>, vector<1x8x32xbf16>, vector<1x8x32xbf16> -> vector<4x8x32xbf16>
    "tpu.trace_start"() <{level = 10 : i32, message = "hqd,hkd->hqk"}> : () -> ()
    %cst_45 = arith.constant dense<0.000000e+00> : vector<4x8x8xf32>
    %229 = tpu.matmul %210, %219, %cst_45 {dimension_numbers = #tpu.dot_dimension_numbers<[2], [2], [1], [1], [0, 0, 0, 1, 1, 1], [0], [0]>} : vector<4x8x32xbf16>, vector<4x8x32xbf16>, vector<4x8x8xf32> -> vector<4x8x8xf32>
    "tpu.trace_stop"() : () -> ()
    %230 = arith.addf %229, %0 : vector<4x8x8xf32>
    %cst_46 = arith.constant dense<0xFF800000> : vector<4x8xf32>
    %231 = vector.multi_reduction <maximumf>, %230, %cst_46 [2] : vector<4x8x8xf32> to vector<4x8xf32>
    %232 = vector.shape_cast %231 : vector<4x8xf32> to vector<4x8x1xf32>
    %233 = vector.broadcast %232 : vector<4x8x1xf32> to vector<4x8x8xf32>
    %234 = arith.subf %230, %233 : vector<4x8x8xf32>
    %235 = math.exp %234 : vector<4x8x8xf32>
    %cst_47 = arith.constant dense<0.000000e+00> : vector<4x8xf32>
    %236 = vector.multi_reduction <add>, %235, %cst_47 [2] : vector<4x8x8xf32> to vector<4x8xf32>
    %237 = vector.shape_cast %236 : vector<4x8xf32> to vector<4x8x1xf32>
    %238 = tpu.reciprocal %237 {approx = true} : vector<4x8x1xf32> -> vector<4x8x1xf32>
    %239 = vector.broadcast %238 : vector<4x8x1xf32> to vector<4x8x8xf32>
    %240 = arith.mulf %235, %239 : vector<4x8x8xf32>
    %241 = arith.truncf %240 : vector<4x8x8xf32> to vector<4x8x8xbf16>
    "tpu.trace_start"() <{level = 10 : i32, message = "hqk,hkd->hqd"}> : () -> ()
    %cst_48 = arith.constant dense<0.000000e+00> : vector<4x8x32xf32>
    %242 = tpu.matmul %241, %228, %cst_48 {dimension_numbers = #tpu.dot_dimension_numbers<[2], [1], [1], [2], [0, 0, 0, 1, 1, 2], [0], [0]>} : vector<4x8x8xbf16>, vector<4x8x32xbf16>, vector<4x8x32xf32> -> vector<4x8x32xf32>
    "tpu.trace_stop"() : () -> ()
    %243 = vector.extract_strided_slice %242 {offsets = [0, 0, 0], sizes = [1, 8, 32], strides = [1, 1, 1]} : vector<4x8x32xf32> to vector<1x8x32xf32>
    %244 = vector.shape_cast %243 : vector<1x8x32xf32> to vector<8x32xf32>
    %245 = vector.extract_strided_slice %242 {offsets = [1, 0, 0], sizes = [1, 8, 32], strides = [1, 1, 1]} : vector<4x8x32xf32> to vector<1x8x32xf32>
    %246 = vector.shape_cast %245 : vector<1x8x32xf32> to vector<8x32xf32>
    %247 = vector.extract_strided_slice %242 {offsets = [2, 0, 0], sizes = [1, 8, 32], strides = [1, 1, 1]} : vector<4x8x32xf32> to vector<1x8x32xf32>
    %248 = vector.shape_cast %247 : vector<1x8x32xf32> to vector<8x32xf32>
    %249 = vector.extract_strided_slice %242 {offsets = [3, 0, 0], sizes = [1, 8, 32], strides = [1, 1, 1]} : vector<4x8x32xf32> to vector<1x8x32xf32>
    %250 = vector.shape_cast %249 : vector<1x8x32xf32> to vector<8x32xf32>
    %251 = tpu.concatenate %244, %246, %248, %250 in 1 : vector<8x32xf32>, vector<8x32xf32>, vector<8x32xf32>, vector<8x32xf32> -> vector<8x128xf32>
    %252 = vector.extract_strided_slice %198 {offsets = [8, 0], sizes = [8, 128], strides = [1, 1]} : vector<16x384xbf16> to vector<8x128xbf16>
    %253 = vector.extract_strided_slice %198 {offsets = [8, 128], sizes = [8, 128], strides = [1, 1]} : vector<16x384xbf16> to vector<8x128xbf16>
    %254 = vector.extract_strided_slice %198 {offsets = [8, 256], sizes = [8, 128], strides = [1, 1]} : vector<16x384xbf16> to vector<8x128xbf16>
    %255 = vector.extract_strided_slice %252 {offsets = [0, 0], sizes = [8, 32], strides = [1, 1]} : vector<8x128xbf16> to vector<8x32xbf16>
    %256 = vector.extract_strided_slice %252 {offsets = [0, 32], sizes = [8, 32], strides = [1, 1]} : vector<8x128xbf16> to vector<8x32xbf16>
    %257 = vector.extract_strided_slice %252 {offsets = [0, 64], sizes = [8, 32], strides = [1, 1]} : vector<8x128xbf16> to vector<8x32xbf16>
    %258 = vector.extract_strided_slice %252 {offsets = [0, 96], sizes = [8, 32], strides = [1, 1]} : vector<8x128xbf16> to vector<8x32xbf16>
    %259 = vector.shape_cast %255 : vector<8x32xbf16> to vector<1x8x32xbf16>
    %260 = vector.shape_cast %256 : vector<8x32xbf16> to vector<1x8x32xbf16>
    %261 = vector.shape_cast %257 : vector<8x32xbf16> to vector<1x8x32xbf16>
    %262 = vector.shape_cast %258 : vector<8x32xbf16> to vector<1x8x32xbf16>
    %263 = tpu.concatenate %259, %260, %261, %262 in 0 : vector<1x8x32xbf16>, vector<1x8x32xbf16>, vector<1x8x32xbf16>, vector<1x8x32xbf16> -> vector<4x8x32xbf16>
    %264 = vector.extract_strided_slice %253 {offsets = [0, 0], sizes = [8, 32], strides = [1, 1]} : vector<8x128xbf16> to vector<8x32xbf16>
    %265 = vector.extract_strided_slice %253 {offsets = [0, 32], sizes = [8, 32], strides = [1, 1]} : vector<8x128xbf16> to vector<8x32xbf16>
    %266 = vector.extract_strided_slice %253 {offsets = [0, 64], sizes = [8, 32], strides = [1, 1]} : vector<8x128xbf16> to vector<8x32xbf16>
    %267 = vector.extract_strided_slice %253 {offsets = [0, 96], sizes = [8, 32], strides = [1, 1]} : vector<8x128xbf16> to vector<8x32xbf16>
    %268 = vector.shape_cast %264 : vector<8x32xbf16> to vector<1x8x32xbf16>
    %269 = vector.shape_cast %265 : vector<8x32xbf16> to vector<1x8x32xbf16>
    %270 = vector.shape_cast %266 : vector<8x32xbf16> to vector<1x8x32xbf16>
    %271 = vector.shape_cast %267 : vector<8x32xbf16> to vector<1x8x32xbf16>
    %272 = tpu.concatenate %268, %269, %270, %271 in 0 : vector<1x8x32xbf16>, vector<1x8x32xbf16>, vector<1x8x32xbf16>, vector<1x8x32xbf16> -> vector<4x8x32xbf16>
    %273 = vector.extract_strided_slice %254 {offsets = [0, 0], sizes = [8, 32], strides = [1, 1]} : vector<8x128xbf16> to vector<8x32xbf16>
    %274 = vector.extract_strided_slice %254 {offsets = [0, 32], sizes = [8, 32], strides = [1, 1]} : vector<8x128xbf16> to vector<8x32xbf16>
    %275 = vector.extract_strided_slice %254 {offsets = [0, 64], sizes = [8, 32], strides = [1, 1]} : vector<8x128xbf16> to vector<8x32xbf16>
    %276 = vector.extract_strided_slice %254 {offsets = [0, 96], sizes = [8, 32], strides = [1, 1]} : vector<8x128xbf16> to vector<8x32xbf16>
    %277 = vector.shape_cast %273 : vector<8x32xbf16> to vector<1x8x32xbf16>
    %278 = vector.shape_cast %274 : vector<8x32xbf16> to vector<1x8x32xbf16>
    %279 = vector.shape_cast %275 : vector<8x32xbf16> to vector<1x8x32xbf16>
    %280 = vector.shape_cast %276 : vector<8x32xbf16> to vector<1x8x32xbf16>
    %281 = tpu.concatenate %277, %278, %279, %280 in 0 : vector<1x8x32xbf16>, vector<1x8x32xbf16>, vector<1x8x32xbf16>, vector<1x8x32xbf16> -> vector<4x8x32xbf16>
    "tpu.trace_start"() <{level = 10 : i32, message = "hqd,hkd->hqk"}> : () -> ()
    %cst_49 = arith.constant dense<0.000000e+00> : vector<4x8x8xf32>
    %282 = tpu.matmul %263, %272, %cst_49 {dimension_numbers = #tpu.dot_dimension_numbers<[2], [2], [1], [1], [0, 0, 0, 1, 1, 1], [0], [0]>} : vector<4x8x32xbf16>, vector<4x8x32xbf16>, vector<4x8x8xf32> -> vector<4x8x8xf32>
    "tpu.trace_stop"() : () -> ()
    %283 = arith.addf %282, %0 : vector<4x8x8xf32>
    %cst_50 = arith.constant dense<0xFF800000> : vector<4x8xf32>
    %284 = vector.multi_reduction <maximumf>, %283, %cst_50 [2] : vector<4x8x8xf32> to vector<4x8xf32>
    %285 = vector.shape_cast %284 : vector<4x8xf32> to vector<4x8x1xf32>
    %286 = vector.broadcast %285 : vector<4x8x1xf32> to vector<4x8x8xf32>
    %287 = arith.subf %283, %286 : vector<4x8x8xf32>
    %288 = math.exp %287 : vector<4x8x8xf32>
    %cst_51 = arith.constant dense<0.000000e+00> : vector<4x8xf32>
    %289 = vector.multi_reduction <add>, %288, %cst_51 [2] : vector<4x8x8xf32> to vector<4x8xf32>
    %290 = vector.shape_cast %289 : vector<4x8xf32> to vector<4x8x1xf32>
    %291 = tpu.reciprocal %290 {approx = true} : vector<4x8x1xf32> -> vector<4x8x1xf32>
    %292 = vector.broadcast %291 : vector<4x8x1xf32> to vector<4x8x8xf32>
    %293 = arith.mulf %288, %292 : vector<4x8x8xf32>
    %294 = arith.truncf %293 : vector<4x8x8xf32> to vector<4x8x8xbf16>
    "tpu.trace_start"() <{level = 10 : i32, message = "hqk,hkd->hqd"}> : () -> ()
    %cst_52 = arith.constant dense<0.000000e+00> : vector<4x8x32xf32>
    %295 = tpu.matmul %294, %281, %cst_52 {dimension_numbers = #tpu.dot_dimension_numbers<[2], [1], [1], [2], [0, 0, 0, 1, 1, 2], [0], [0]>} : vector<4x8x8xbf16>, vector<4x8x32xbf16>, vector<4x8x32xf32> -> vector<4x8x32xf32>
    "tpu.trace_stop"() : () -> ()
    %296 = vector.extract_strided_slice %295 {offsets = [0, 0, 0], sizes = [1, 8, 32], strides = [1, 1, 1]} : vector<4x8x32xf32> to vector<1x8x32xf32>
    %297 = vector.shape_cast %296 : vector<1x8x32xf32> to vector<8x32xf32>
    %298 = vector.extract_strided_slice %295 {offsets = [1, 0, 0], sizes = [1, 8, 32], strides = [1, 1, 1]} : vector<4x8x32xf32> to vector<1x8x32xf32>
    %299 = vector.shape_cast %298 : vector<1x8x32xf32> to vector<8x32xf32>
    %300 = vector.extract_strided_slice %295 {offsets = [2, 0, 0], sizes = [1, 8, 32], strides = [1, 1, 1]} : vector<4x8x32xf32> to vector<1x8x32xf32>
    %301 = vector.shape_cast %300 : vector<1x8x32xf32> to vector<8x32xf32>
    %302 = vector.extract_strided_slice %295 {offsets = [3, 0, 0], sizes = [1, 8, 32], strides = [1, 1, 1]} : vector<4x8x32xf32> to vector<1x8x32xf32>
    %303 = vector.shape_cast %302 : vector<1x8x32xf32> to vector<8x32xf32>
    %304 = tpu.concatenate %297, %299, %301, %303 in 1 : vector<8x32xf32>, vector<8x32xf32>, vector<8x32xf32>, vector<8x32xf32> -> vector<8x128xf32>
    %305 = tpu.concatenate %251, %304 in 0 : vector<8x128xf32>, vector<8x128xf32> -> vector<16x128xf32>
    %306 = arith.truncf %305 : vector<16x128xf32> to vector<16x128xbf16>
    %307 = arith.index_cast %c1_i32 : i32 to index
    %c0_53 = arith.constant 0 : index
    %c0_54 = arith.constant 0 : index
    %308 = vector.load %arg5[%307, %c0_53, %c0_54] : memref<2x128x128xbf16, #tpu.memory_space<vmem>>, vector<1x128x128xbf16>
    %309 = vector.shape_cast %308 : vector<1x128x128xbf16> to vector<128x128xbf16>
    %cst_55 = arith.constant dense<0.000000e+00> : vector<16x128xf32>
    %310 = tpu.matmul %306, %309, %cst_55 {dimension_numbers = #tpu.dot_dimension_numbers<[1], [0], [0], [1], [0, 0, 1, 1], [], []>} : vector<16x128xbf16>, vector<128x128xbf16>, vector<16x128xf32> -> vector<16x128xf32>
    %311 = arith.addf %177, %310 : vector<16x128xf32>
    %312 = arith.index_cast %c1_i32 : i32 to index
    %c0_56 = arith.constant 0 : index
    %c0_57 = arith.constant 0 : index
    %313 = vector.load %arg6[%312, %c0_56, %c0_57] : memref<2x1x128xf32, #tpu.memory_space<vmem>>, vector<1x1x128xf32>
    %314 = vector.shape_cast %313 : vector<1x1x128xf32> to vector<1x128xf32>
    %315 = arith.mulf %311, %311 : vector<16x128xf32>
    %cst_58 = arith.constant dense<0.000000e+00> : vector<16xf32>
    %316 = vector.multi_reduction <add>, %315, %cst_58 [1] : vector<16x128xf32> to vector<16xf32>
    %317 = vector.shape_cast %316 : vector<16xf32> to vector<16x1xf32>
    %cst_59 = arith.constant 1.280000e+02 : f32
    %318 = vector.broadcast %cst_59 : f32 to vector<16x1xf32>
    %319 = arith.divf %317, %318 : vector<16x1xf32>
    %cst_60 = arith.constant 9.99999997E-7 : f32
    %320 = vector.broadcast %cst_60 : f32 to vector<16x1xf32>
    %321 = arith.addf %319, %320 : vector<16x1xf32>
    %322 = math.rsqrt %321 : vector<16x1xf32>
    %323 = vector.broadcast %322 : vector<16x1xf32> to vector<16x128xf32>
    %324 = arith.mulf %311, %323 : vector<16x128xf32>
    %325 = vector.broadcast %314 : vector<1x128xf32> to vector<16x128xf32>
    %326 = arith.mulf %324, %325 : vector<16x128xf32>
    %327 = arith.truncf %326 : vector<16x128xf32> to vector<16x128xbf16>
    %328 = arith.index_cast %c1_i32 : i32 to index
    %c0_61 = arith.constant 0 : index
    %c0_62 = arith.constant 0 : index
    %329 = vector.load %arg7[%328, %c0_61, %c0_62] : memref<2x128x512xbf16, #tpu.memory_space<vmem>>, vector<1x128x512xbf16>
    %330 = vector.shape_cast %329 : vector<1x128x512xbf16> to vector<128x512xbf16>
    %cst_63 = arith.constant dense<0.000000e+00> : vector<16x512xf32>
    %331 = tpu.matmul %327, %330, %cst_63 {dimension_numbers = #tpu.dot_dimension_numbers<[1], [0], [0], [1], [0, 0, 1, 1], [], []>} : vector<16x128xbf16>, vector<128x512xbf16>, vector<16x512xf32> -> vector<16x512xf32>
    %332 = vector.extract_strided_slice %331 {offsets = [0, 0], sizes = [16, 256], strides = [1, 1]} : vector<16x512xf32> to vector<16x256xf32>
    %cst_64 = arith.constant 5.000000e-01 : f32
    %333 = vector.broadcast %cst_64 : f32 to vector<16x256xf32>
    %334 = arith.mulf %333, %332 : vector<16x256xf32>
    %cst_65 = arith.constant 4.471500e-02 : f32
    %335 = vector.broadcast %cst_65 : f32 to vector<16x256xf32>
    %336 = arith.mulf %335, %332 : vector<16x256xf32>
    %337 = arith.mulf %336, %332 : vector<16x256xf32>
    %338 = arith.mulf %337, %332 : vector<16x256xf32>
    %339 = arith.addf %332, %338 : vector<16x256xf32>
    %cst_66 = arith.constant 0.797884583 : f32
    %340 = vector.broadcast %cst_66 : f32 to vector<16x256xf32>
    %341 = arith.mulf %340, %339 : vector<16x256xf32>
    %342 = math.tanh %341 : vector<16x256xf32>
    %cst_67 = arith.constant 1.000000e+00 : f32
    %343 = vector.broadcast %cst_67 : f32 to vector<16x256xf32>
    %344 = arith.addf %343, %342 : vector<16x256xf32>
    %345 = arith.mulf %334, %344 : vector<16x256xf32>
    %346 = vector.extract_strided_slice %331 {offsets = [0, 256], sizes = [16, 256], strides = [1, 1]} : vector<16x512xf32> to vector<16x256xf32>
    %347 = arith.mulf %345, %346 : vector<16x256xf32>
    %348 = arith.truncf %347 : vector<16x256xf32> to vector<16x256xbf16>
    %349 = arith.index_cast %c1_i32 : i32 to index
    %c0_68 = arith.constant 0 : index
    %c0_69 = arith.constant 0 : index
    %350 = vector.load %arg8[%349, %c0_68, %c0_69] : memref<2x256x128xbf16, #tpu.memory_space<vmem>>, vector<1x256x128xbf16>
    %351 = vector.shape_cast %350 : vector<1x256x128xbf16> to vector<256x128xbf16>
    %cst_70 = arith.constant dense<0.000000e+00> : vector<16x128xf32>
    %352 = tpu.matmul %348, %351, %cst_70 {dimension_numbers = #tpu.dot_dimension_numbers<[1], [0], [0], [1], [0, 0, 1, 1], [], []>} : vector<16x256xbf16>, vector<256x128xbf16>, vector<16x128xf32> -> vector<16x128xf32>
    %353 = arith.addf %311, %352 : vector<16x128xf32>
    %c2_i32 = arith.constant 2 : i32
    %c0_71 = arith.constant 0 : index
    %c0_72 = arith.constant 0 : index
    %354 = vector.load %arg9[%c0_71, %c0_72] : memref<1x128xf32, #tpu.memory_space<vmem>>, vector<1x128xf32>
    %355 = arith.mulf %353, %353 : vector<16x128xf32>
    %cst_73 = arith.constant dense<0.000000e+00> : vector<16xf32>
    %356 = vector.multi_reduction <add>, %355, %cst_73 [1] : vector<16x128xf32> to vector<16xf32>
    %357 = vector.shape_cast %356 : vector<16xf32> to vector<16x1xf32>
    %cst_74 = arith.constant 1.280000e+02 : f32
    %358 = vector.broadcast %cst_74 : f32 to vector<16x1xf32>
    %359 = arith.divf %357, %358 : vector<16x1xf32>
    %cst_75 = arith.constant 9.99999997E-7 : f32
    %360 = vector.broadcast %cst_75 : f32 to vector<16x1xf32>
    %361 = arith.addf %359, %360 : vector<16x1xf32>
    %362 = math.rsqrt %361 : vector<16x1xf32>
    %363 = vector.broadcast %362 : vector<16x1xf32> to vector<16x128xf32>
    %364 = arith.mulf %353, %363 : vector<16x128xf32>
    %365 = vector.broadcast %354 : vector<1x128xf32> to vector<16x128xf32>
    %366 = arith.mulf %364, %365 : vector<16x128xf32>
    %c0_76 = arith.constant 0 : index
    %c0_77 = arith.constant 0 : index
    %367 = vector.load %arg10[%c0_76, %c0_77] : memref<16x128xf32, #tpu.memory_space<vmem>>, vector<16x128xf32>
    tpu.vector_store %arg10[%c0_76, %c0_77], %366 {strides = array<i32>} : memref<16x128xf32, #tpu.memory_space<vmem>>, vector<16x128xf32>,
    return
  }
  func.func @transform_0(%arg0: i32) -> (i32, i32) {
    %c0_i32 = arith.constant 0 : i32
    %c0_i32_0 = arith.constant 0 : i32
    return %arg0, %c0_i32 : i32, i32
  }
  func.func @transform_1(%arg0: i32) -> (i32, i32, i32) {
    %c0_i32 = arith.constant 0 : i32
    %c0_i32_0 = arith.constant 0 : i32
    %c0_i32_1 = arith.constant 0 : i32
    %c0_i32_2 = arith.constant 0 : i32
    return %c0_i32, %c0_i32_0, %c0_i32_1 : i32, i32, i32
  }
  func.func @transform_2(%arg0: i32) -> (i32, i32, i32) {
    %c0_i32 = arith.constant 0 : i32
    %c0_i32_0 = arith.constant 0 : i32
    %c0_i32_1 = arith.constant 0 : i32
    %c0_i32_2 = arith.constant 0 : i32
    return %c0_i32, %c0_i32_0, %c0_i32_1 : i32, i32, i32
  }
  func.func @transform_3(%arg0: i32) -> (i32, i32, i32) {
    %c0_i32 = arith.constant 0 : i32
    %c0_i32_0 = arith.constant 0 : i32
    %c0_i32_1 = arith.constant 0 : i32
    %c0_i32_2 = arith.constant 0 : i32
    return %c0_i32, %c0_i32_0, %c0_i32_1 : i32, i32, i32
  }
  func.func @transform_4(%arg0: i32) -> (i32, i32, i32) {
    %c0_i32 = arith.constant 0 : i32
    %c0_i32_0 = arith.constant 0 : i32
    %c0_i32_1 = arith.constant 0 : i32
    %c0_i32_2 = arith.constant 0 : i32
    return %c0_i32, %c0_i32_0, %c0_i32_1 : i32, i32, i32
  }
  func.func @transform_5(%arg0: i32) -> (i32, i32, i32) {
    %c0_i32 = arith.constant 0 : i32
    %c0_i32_0 = arith.constant 0 : i32
    %c0_i32_1 = arith.constant 0 : i32
    %c0_i32_2 = arith.constant 0 : i32
    return %c0_i32, %c0_i32_0, %c0_i32_1 : i32, i32, i32
  }
  func.func @transform_6(%arg0: i32) -> (i32, i32, i32) {
    %c0_i32 = arith.constant 0 : i32
    %c0_i32_0 = arith.constant 0 : i32
    %c0_i32_1 = arith.constant 0 : i32
    %c0_i32_2 = arith.constant 0 : i32
    return %c0_i32, %c0_i32_0, %c0_i32_1 : i32, i32, i32
  }
  func.func @transform_7(%arg0: i32) -> (i32, i32, i32) {
    %c0_i32 = arith.constant 0 : i32
    %c0_i32_0 = arith.constant 0 : i32
    %c0_i32_1 = arith.constant 0 : i32
    %c0_i32_2 = arith.constant 0 : i32
    return %c0_i32, %c0_i32_0, %c0_i32_1 : i32, i32, i32
  }
  func.func @transform_8(%arg0: i32) -> (i32, i32) {
    %c0_i32 = arith.constant 0 : i32
    %c0_i32_0 = arith.constant 0 : i32
    %c0_i32_1 = arith.constant 0 : i32
    return %c0_i32, %c0_i32_0 : i32, i32
  }
  func.func @transform_9(%arg0: i32) -> (i32, i32) {
    %c0_i32 = arith.constant 0 : i32
    %c0_i32_0 = arith.constant 0 : i32
    return %arg0, %c0_i32 : i32, i32
  }
}

</mosaic_0001>

<bundles_post_ra>
// kernel: tpu_custom_call.1
= control target key start
LH: loop header
LB: loop body
LE: loop exit
PB: predicated region body
PF: predicated region fallthrough
CT: control target
= control target key end

     0   :  { %14 = vsyncpa [#allocation3], 0  ;;  %s5489_s0 = inlined_call_operand.hbm [shape: f32[16,128], index: 0, kind: input, shape index: {}]   ;;  %s5490_s1 = inlined_call_operand.hbm [shape: f32[4,8,8], index: 1, kind: input, shape index: {}]   ;;  %s5491_s2 = inlined_call_operand.vmem [shape: f32[2,1,128], index: 2, kind: input, shape index: {}]   ;;  %s5492_s3 = inlined_call_operand.hbm [shape: bf16[2,128,384], index: 3, kind: input, shape index: {}]   ;;  %s5493_s4 = inlined_call_operand.hbm [shape: bf16[2,128,128], index: 4, kind: input, shape index: {}]   ;;  %s5494_s5 = inlined_call_operand.vmem [shape: f32[2,1,128], index: 5, kind: input, shape index: {}]   ;;  %s5495_s6 = inlined_call_operand.hbm [shape: bf16[2,128,512], index: 6, kind: input, shape index: {}]   ;;  %s5496_s7 = inlined_call_operand.hbm [shape: bf16[2,256,128], index: 7, kind: input, shape index: {}]   ;;  %s5497_s8 = inlined_call_operand.vmem [shape: f32[1,128], index: 8, kind: input, shape index: {}]   ;;  %s5498_s9 = inlined_call_operand.hbm [shape: f32[16,128], index: 9, kind: output, shape index: {}]  }
   0x1   :  { %15 = vsyncpa [#allocation6], 0 }
   0x2   :  { %16 = vsyncpa [#allocation9], 0 }
   0x3   :  { %17 = vsyncpa [#allocation12], 0 }
   0x4   :  { %18 = vsyncpa [#allocation4], 0  ;;  %s4886_s30 = smov [#allocation5]   ;;  %s4887_s11 = smov [#allocation8]  }
   0x5   :  { %s36_s10 = sshll.u32 %s4886_s30, 4  ;;  %s62_s12 = sshll.u32 %s4887_s11, 4  ;;  %s37_s10 = int_to_ptr.vmem [resolvable:$true] %s36_s10  ;;  %s63_s12 = int_to_ptr.vmem [resolvable:$true] %s62_s12 }
   0x6   :  { %s4744_s13 = scalar_lea.vmem %s37_s10, 512  ;;  %p4749_p1 = scmp.lt.s32.totalorder %s37_s10, %s37_s10 }
   0x7   :  { %p4745_p0 = scmp.ne.s32.totalorder %s37_s10, %s4744_s13  ;;  %p4750_p2 = scmp.lt.s32.totalorder %s4744_s13, %s4744_s13 }
   0x9   :  { %p4751_p3 = por %p4750_p2, %p4749_p1 }
   0xb   :  { %p4752_p4 = pnand %p4751_p3, %p4745_p0 }
   0xd   :  { %4755 = shalt.err (!%p4752_p4)
}
   0xe   :  { %s4888_s14 = smov 128   ;;  %s4889_s15 = smov 8  }
   0xf   :  { %42 = dma.hbm_to_vmem [thread:$0]  %s5490_s1, 512, %s37_s10, [#allocation6], %s4888_s14, %s4888_s14, %s4889_s15  }
  0x10   :  { %s4764_s18 = scalar_lea.vmem %s63_s12, 2048  ;;  %p4769_p6 = scmp.lt.s32.totalorder %s63_s12, %s63_s12 }
  0x11   :  { %p4765_p5 = scmp.ne.s32.totalorder %s63_s12, %s4764_s18  ;;  %p4770_p7 = scmp.lt.s32.totalorder %s4764_s18, %s4764_s18 }
  0x13   :  { %p4771_p8 = por %p4770_p7, %p4769_p6 }
  0x15   :  { %p4772_p9 = pnand %p4771_p8, %p4765_p5 }
  0x17   :  { %4775 = shalt.err (!%p4772_p9)
}
  0x18   :  { %s4890_s19 = smov 64   ;;  %s4891_s20 = smov 4  }
  0x19   :  { %68 = dma.hbm_to_vmem [thread:$0]  %s5493_s4, 2048, %s63_s12, [#allocation9], %s4890_s19, %s4890_s19, %s4891_s20  }
  0x1a   :  { %s4892_s23 = smov [#allocation2]   ;;  %s4893_s25 = smov [#allocation7]  }
  0x1b   :  { %s24_s24 = sshll.u32 %s4892_s23, 4  ;;  %s50_s1 = sshll.u32 %s4893_s25, 4  ;;  %s25_s24 = int_to_ptr.vmem [resolvable:$true] %s24_s24  ;;  %s51_s1 = int_to_ptr.vmem [resolvable:$true] %s50_s1 }
  0x1c   :  { %s4784_s26 = scalar_lea.vmem %s25_s24, 256  ;;  %p4789_p11 = scmp.lt.s32.totalorder %s25_s24, %s25_s24 }
  0x1d   :  { %p4785_p10 = scmp.ne.s32.totalorder %s25_s24, %s4784_s26  ;;  %p4790_p12 = scmp.lt.s32.totalorder %s4784_s26, %s4784_s26 }
  0x1f   :  { %p4791_p13 = por %p4790_p12, %p4789_p11 }
  0x21   :  { %p4792_p0 = pnand %p4791_p13, %p4785_p10 }
  0x23   :  { %4795 = shalt.err (!%p4792_p0)
}
  0x24   :  { %30 = dma.hbm_to_vmem [thread:$0]  %s5489_s0, 256, %s25_s24, [#allocation3], %s4888_s14, %s4888_s14, %s4889_s15  }
  0x25   :  { %s4804_s4 = scalar_lea.vmem %s51_s1, 6144  ;;  %p4809_p2 = scmp.lt.s32.totalorder %s51_s1, %s51_s1 }
  0x26   :  { %p4805_p1 = scmp.ne.s32.totalorder %s51_s1, %s4804_s4  ;;  %p4810_p3 = scmp.lt.s32.totalorder %s4804_s4, %s4804_s4 }
  0x28   :  { %p4811_p4 = por %p4810_p3, %p4809_p2 }
  0x2a   :  { %p4812_p5 = pnand %p4811_p4, %p4805_p1 }
  0x2c   :  { %4815 = shalt.err (!%p4812_p5)
}
  0x2d   :  { %s4894_s29 = smov 192   ;;  %s4895_s30 = smov 12  }
  0x2e   :  { %56 = dma.hbm_to_vmem [thread:$0]  %s5492_s3, 6144, %s51_s1, [#allocation6], %s4894_s29, %s4894_s29, %s4895_s30  }
  0x2f   :  { %s4896_s12 = smov [#allocation10]  }
  0x30   :  { %s76_s13 = sshll.u32 %s4896_s12, 4  ;;  %s77_s13 = int_to_ptr.vmem [resolvable:$true] %s76_s13 }
  0x31   :  { %s4824_s16 = scalar_lea.vmem %s77_s13, 8192  ;;  %p4829_p7 = scmp.lt.s32.totalorder %s77_s13, %s77_s13 }
  0x32   :  { %p4825_p6 = scmp.ne.s32.totalorder %s77_s13, %s4824_s16  ;;  %p4830_p8 = scmp.lt.s32.totalorder %s4824_s16, %s4824_s16 }
  0x34   :  { %p4831_p9 = por %p4830_p8, %p4829_p7 }
  0x36   :  { %p4832_p10 = pnand %p4831_p9, %p4825_p6 }
  0x38   :  { %4835 = shalt.err (!%p4832_p10)
}
  0x39   :  { %s4897_s0 = smov 256   ;;  %s4898_s17 = smov 16  }
  0x3a   :  { %82 = dma.hbm_to_vmem [thread:$0]  %s5495_s6, 8192, %s77_s13, [#allocation9], %s4897_s0, %s4897_s0, %s4898_s17  }
  0x3b   :  { %s4899_s22 = smov [#allocation11]  }
  0x3c   :  { %s88_s23 = sshll.u32 %s4899_s22, 4  ;;  %s89_s23 = int_to_ptr.vmem [resolvable:$true] %s88_s23 }
  0x3d   :  { %s4844_s3 = scalar_lea.vmem %s89_s23, 4096  ;;  %p4849_p12 = scmp.lt.s32.totalorder %s89_s23, %s89_s23 }
  0x3e   :  { %p4845_p11 = scmp.ne.s32.totalorder %s89_s23, %s4844_s3  ;;  %p4850_p13 = scmp.lt.s32.totalorder %s4844_s3, %s4844_s3 }
  0x40   :  { %p4851_p0 = por %p4850_p13, %p4849_p12 }
  0x42   :  { %p4852_p1 = pnand %p4851_p0, %p4845_p11 }
  0x44   :  { %4855 = shalt.err (!%p4852_p1)
}
  0x45   :  { %94 = dma.hbm_to_vmem [thread:$0]  %s5496_s7, 4096, %s89_s23, [#allocation12], %s4890_s19, %s4890_s19, %s4891_s20  }
  0x46   :  { %4876 = dma.done.wait [#allocation3], 256  }
  0x47   :  { %4877 = vsyncadd [#allocation3], 4294967040 }
  0x48   :  { %4878 = dma.done.wait [#allocation6], 6656  }
  0x49   :  { %4879 = vsyncadd [#allocation6], 4294960640 }
  0x4a   :  { %4880 = dma.done.wait [#allocation9], 10240  }
  0x4b   :  { %4881 = vsyncadd [#allocation9], 4294957056 }
  0x4c   :  { %4882 = dma.done.wait [#allocation12], 4096  }
  0x4d   :  { %4883 = vsyncadd [#allocation12], 4294963200  ;;  %v4900_v0 = vmov 0.0   ;;  %v4987_v1 = vld [vmem:[#allocation2] sm:$0xff]  ;;  %v4989_v2 = vld [vmem:[#allocation2 + $0x8] sm:$0xff]  ;;  %v4901_v26 = vmov 0  }
  0x4e   :  { %4100 = vmatprep.subr.bf16.mxu1 %v4900_v0  ;;  %v123_v3 = vmul.f32 %v4987_v1, %v4987_v1  ;;  %v4422_v4 = vld [vmem:[#allocation7 + $0xac] ss:$12 sps:$4 sm:$0xff]   ;;  %v4424_v5 = vld [vmem:[#allocation7 + $0xa8] ss:$12 sps:$4 sm:$0xff]   ;;  %v4425_v6 = vld [vmem:[#allocation7 + $0xb0] ss:$12 sps:$4 sm:$0xff]   ;;  %v124_v7 = vmul.f32 %v4989_v2, %v4989_v2  ;;  %339 = vmatprep.mubr.bf16.mxu0 %v4901_v26 }
  0x4f   :  { %307 = vmatprep.subr.bf16.mxu0 %v4422_v4  ;;  %4101 = vmatpush3.bf16.msra.mxu1 %v4425_v6  ;;  %v4426_v8 = vld [vmem:[#allocation7 + $0x94] ss:$12 sps:$4 sm:$0xff]   ;;  %v4428_v9 = vld [vmem:[#allocation7 + $0x90] ss:$12 sps:$4 sm:$0xff]   ;;  %v4429_v10 = vld [vmem:[#allocation7 + $0x98] ss:$12 sps:$4 sm:$0xff]  }
  0x50   :  { %125 = vadd.xlane.f32.xlu0 %v123_v3  ;;  %308 = vmatpush1.bf16.msra.mxu0 %v4424_v5  ;;  %v4430_v11 = vld [vmem:[#allocation7 + $0x7c] ss:$12 sps:$4 sm:$0xff]   ;;  %v4432_v12 = vld [vmem:[#allocation7 + $0x78] ss:$12 sps:$4 sm:$0xff]   ;;  %v4433_v13 = vld [vmem:[#allocation7 + $0x80] ss:$12 sps:$4 sm:$0xff]  }
  0x51   :  { %4102 = vmatprep.subr.bf16.mxu1 %v4900_v0  ;;  %309 = vmatprep.subr.bf16.mxu0 %v4426_v8  ;;  %v4434_v14 = vld [vmem:[#allocation7 + $0x64] ss:$12 sps:$4 sm:$0xff]   ;;  %v4436_v15 = vld [vmem:[#allocation7 + $0x60] ss:$12 sps:$4 sm:$0xff]   ;;  %v4437_v16 = vld [vmem:[#allocation7 + $0x68] ss:$12 sps:$4 sm:$0xff]  }
  0x52   :  { %v4438_v17 = vld [vmem:[#allocation7 + $0x4c] ss:$12 sps:$4 sm:$0xff]   ;;  %v4440_v18 = vld [vmem:[#allocation7 + $0x48] ss:$12 sps:$4 sm:$0xff]   ;;  %v4441_v19 = vld [vmem:[#allocation7 + $0x50] ss:$12 sps:$4 sm:$0xff]  }
  0x53   :  { %4103 = vmatpush3.bf16.msra.mxu1 %v4429_v10  ;;  %v4442_v20 = vld [vmem:[#allocation7 + $0x34] ss:$12 sps:$4 sm:$0xff]   ;;  %v4444_v21 = vld [vmem:[#allocation7 + $0x30] ss:$12 sps:$4 sm:$0xff]   ;;  %v4445_v22 = vld [vmem:[#allocation7 + $0x38] ss:$12 sps:$4 sm:$0xff]  }
  0x54   :  { %127 = vadd.xlane.f32.xlu0 %v124_v7  ;;  %310 = vmatpush1.bf16.msra.mxu0 %v4428_v9  ;;  %v4446_v23 = vld [vmem:[#allocation7 + $0x1c] ss:$12 sps:$4 sm:$0xff]   ;;  %v4448_v24 = vld [vmem:[#allocation7 + $0x18] ss:$12 sps:$4 sm:$0xff]   ;;  %v4449_v25 = vld [vmem:[#allocation7 + $0x20] ss:$12 sps:$4 sm:$0xff]  }
  0x55   :  { %4104 = vmatprep.subr.bf16.mxu1 %v4900_v0  ;;  %311 = vmatprep.subr.bf16.mxu0 %v4430_v11  ;;  %vm4902_vm0 = vmmov 0   ;;  %v4450_v27 = vld [vmem:[#allocation7 + $0x4] ss:$12 sps:$4 sm:$0xff]   ;;  %v4452_v28 = vld [vmem:[#allocation7] ss:$12 sps:$4 sm:$0xff]   ;;  %vm415_vm1 = vcmask 261120  }
  0x56   :  { %4116 = vmatprep.mubr.msk.bf16.mxu1 %vm4902_vm0, %v4900_v0  ;;  %v4453_v29 = vld [vmem:[#allocation7 + $0x8] ss:$12 sps:$4 sm:$0xff]   ;;  %v3757_v39 = vld [vmem:[%s5491_s2] ss:$0 sm:$0xff]  ;;  %s4903_s20 = smov 96   ;;  %s4904_s1 = smov 32  }
  0x57   :  { %4105 = vmatpush3.bf16.msra.mxu1 %v4433_v13  ;;  %vm652_vm2 = vcmask 1043456   ;;  %v5077_v3 = vld [vmem:[#allocation5] sm:$0xff]  ;;  %vm600_vm3 = vcmask 64512   ;;  %v5081_v10 = vld [vmem:[#allocation5 + $0x8] sm:$0xff]  ;;  %vm847_vm4 = vcmask 523264   ;;  %vm849_vm5 = vcmask 785408  }
  0x58   :  { %312 = vmatpush1.bf16.msra.mxu0 %v4432_v12  ;;  %4106 = vmatprep.subr.bf16.mxu1 %v4900_v0  ;;  %s4905_s30 = smov [#allocation13]  }
  0x59   :  { %313 = vmatprep.subr.bf16.mxu0 %v4434_v14  ;;  %v5084_v14 = vld [vmem:[#allocation5 + $0x10] sm:$0xff]  ;;  %s3742_s10 = sshll.u32 %s4905_s30, 4  ;;  %s3743_s10 = int_to_ptr.vmem [resolvable:$true] %s3742_s10 }
  0x5a   :  { %s4856_s11 = scalar_lea.vmem %s3743_s10, 256  ;;  %p4861_p3 = scmp.lt.s32.totalorder %s3743_s10, %s3743_s10 }
  0x5b   :  { %4107 = vmatpush3.bf16.msra.mxu1 %v4437_v16  ;;  %p4857_p2 = scmp.ne.s32.totalorder %s3743_s10, %s4856_s11  ;;  %p4862_p4 = scmp.lt.s32.totalorder %s4856_s11, %s4856_s11 }
  0x5c   :  { %314 = vmatpush1.bf16.msra.mxu0 %v4436_v15  ;;  %4108 = vmatprep.subr.bf16.mxu1 %v4900_v0 }
  0x5d   :  { %315 = vmatprep.subr.bf16.mxu0 %v4438_v17  ;;  %p4863_p5 = por %p4862_p4, %p4861_p3 }
  0x5f   :  { %4109 = vmatpush3.bf16.msra.mxu1 %v4441_v19  ;;  %p4864_p6 = pnand %p4863_p5, %p4857_p2 }
  0x60   :  { %316 = vmatpush1.bf16.msra.mxu0 %v4440_v18  ;;  %4110 = vmatprep.subr.bf16.mxu1 %v4900_v0 }
  0x61   :  { %317 = vmatprep.subr.bf16.mxu0 %v4442_v20 }
  0x63   :  { %4111 = vmatpush3.bf16.msra.mxu1 %v4445_v22 }
  0x64   :  { %318 = vmatpush1.bf16.msra.mxu0 %v4444_v21  ;;  %4112 = vmatprep.subr.bf16.mxu1 %v4900_v0  ;;  %v5088_v21 = vld [vmem:[#allocation5 + $0x18] sm:$0xff] }
  0x65   :  { %319 = vmatprep.subr.bf16.mxu0 %v4446_v23 }
  0x67   :  { %4113 = vmatpush3.bf16.msra.mxu1 %v4449_v25 }
  0x68   :  { %320 = vmatpush1.bf16.msra.mxu0 %v4448_v24  ;;  %4114 = vmatprep.subr.bf16.mxu1 %v4900_v0 }
  0x69   :  { %321 = vmatprep.subr.bf16.mxu0 %v4450_v27 }
  0x6b   :  { %4115 = vmatpush3.bf16.msra.mxu1 %v4453_v29 }
  0x6c   :  { %322 = vmatpush1.bf16.msra.mxu0 %v4452_v28  ;;  %4126 = vmatprep.subr.bf16.mxu1 %v4900_v0 }
  0x6d   :  { %4120 = vmatprep.subr.bf16.mxu0 %v4900_v0 }
  0xd9   :  { %v126_v30 = vpop.xlane.xlu0 %125 }
  0xda   :  { %v130_v31 = vmul.f32 0.0078125, %v126_v30 }
  0xdc   :  { %v132_v32 = vadd.f32 1e-06, %v130_v31 }
  0xdd   :  { %v128_v33 = vpop.xlane.xlu0 %127 }
  0xde   :  { %4630 = vrsqrt.f32 %v132_v32  ;;  %v131_v34 = vmul.f32 0.0078125, %v128_v33 }
  0xe0   :  { %v133_v35 = vadd.f32 1e-06, %v131_v34 }
  0xe2   :  { %4632 = vrsqrt.f32 %v133_v35 }
  0xeb   :  { %v4631_v36 = vpop.eup %4630 }
  0xec   :  { %v136_v37 = vmul.f32 %v4631_v36, %v4987_v1 }
  0xee   :  { %v144_v41 = vmul.f32 %v3757_v39, %v136_v37 }
  0xef   :  { %v4633_v38 = vpop.eup %4632 }
  0xf0   :  { %v137_v40 = vmul.f32 %v4633_v38, %v4989_v2 }
  0xf2   :  { %v145_v42 = vmul.f32 %v3757_v39, %v137_v40 }
  0xf4   :  { %v146_v43 = vpack.c.bf16 %v145_v42, %v144_v41 }
  0xf6   :  { %340 = vmatmul.mubr.bf16.vlgmr.msra.gmra.mxu0 %v146_v43  ;;  %4117 = vmatmul.mubr.bf16.vlgmr.msra.gmra.mxu1 %v146_v43 }
  0xf7   :  { %4122 = vmatprep.mubr.msk.bf16.mxu0 %vm4902_vm0, %v4900_v0  ;;  %4128 = vmatprep.mubr.msk.bf16.mxu1 %vm4902_vm0, %v4900_v0 }
 0x1b6   :  { %v341_v44 = vpop.f32.mrf.mxu0  ;;  %v384_v45 = vpop.f32.mrf.mxu1 }
 0x1b8   :  { %v343_v46 = vpop.f32.mrf.mxu0  ;;  %v4118_v47 = vpop.f32.mrf.mxu1 }
 0x1ba   :  { %v345_v48 = vpop.f32.mrf.mxu0  ;;  %v387_v49 = vpop.f32.mrf.mxu1 }
 0x1bb   :  { %v5016_v50 = vpack.c.bf16 %v345_v48, %v341_v44  ;;  %v5018_v51 = vpack.c.bf16 %v387_v49, %v384_v45 }
 0x1bc   :  { %v347_v52 = vpop.f32.mrf.mxu0  ;;  %v4119_v53 = vpop.f32.mrf.mxu1 }
 0x1bd   :  { %v5020_v54 = vpack.c.bf16 %v347_v52, %v343_v46  ;;  %395 = vrot.lane.b32.xlu0 %v5016_v50, %s4903_s20  ;;  %v654_v1 = vsel %vm652_vm2, %v5018_v51, 0 }
 0x1bf   :  { %402 = vrot.lane.b32.xlu1 %v5020_v54, %s4903_s20  ;;  %v420_v55 = vsel %vm415_vm1, %v5020_v54, 0 }
 0x1c0   :  { %4121 = vmatpush3.bf16.xpose.msra.mxu0 %v420_v55 }
 0x1c1   :  { %4132 = vmatprep.subr.bf16.mxu0 %v4900_v0 }
 0x1c3   :  { %404 = vrot.lane.b32.xlu1 %v5020_v54, %s4890_s19 }
 0x1c7   :  { %406 = vrot.lane.b32.xlu1 %v5020_v54, %s4904_s1  ;;  %4123 = vmatmul.mubr.msk.bf16.vlgmr.msra.gmra.mxu0 %vm415_vm1, %v5016_v50 }
 0x1c8   :  { %4134 = vmatprep.mubr.msk.bf16.mxu0 %vm4902_vm0, %v4900_v0 }
 0x1cb   :  { %397 = vrot.lane.b32.xlu1 %v5016_v50, %s4890_s19 }
 0x1cf   :  { %399 = vrot.lane.b32.xlu1 %v5016_v50, %s4904_s1 }
 0x22f   :  { %v5051_v60 = vpop.permute.xlu0 %395 }
 0x231   :  { %v5041_v56 = vpop.permute.xlu1 %402 }
 0x232   :  { %v466_v57 = vsel %vm415_vm1, %v5041_v56, 0 }
 0x233   :  { %4127 = vmatpush3.bf16.xpose.msra.mxu1 %v466_v57 }
 0x234   :  { %4138 = vmatprep.subr.bf16.mxu1 %v4900_v0 }
 0x235   :  { %v5046_v58 = vpop.permute.xlu1 %404 }
 0x236   :  { %v512_v59 = vsel %vm415_vm1, %v5046_v58, 0 }
 0x237   :  { %4133 = vmatpush3.bf16.xpose.msra.mxu0 %v512_v59 }
 0x238   :  { %4144 = vmatprep.subr.bf16.mxu0 %v4900_v0 }
 0x239   :  { %v5053_v61 = vpop.permute.xlu1 %406 }
 0x23a   :  { %v558_v62 = vsel %vm415_vm1, %v5053_v61, 0  ;;  %4129 = vmatmul.mubr.msk.bf16.vlgmr.msra.gmra.mxu1 %vm415_vm1, %v5051_v60 }
 0x23b   :  { %4139 = vmatpush3.bf16.xpose.msra.mxu1 %v558_v62  ;;  %4140 = vmatprep.mubr.msk.bf16.mxu1 %vm4902_vm0, %v4900_v0 }
 0x23c   :  { %4150 = vmatprep.subr.bf16.mxu1 %v4900_v0 }
 0x23d   :  { %v5062_v63 = vpop.permute.xlu1 %397 }
 0x23e   :  { %4135 = vmatmul.mubr.msk.bf16.vlgmr.msra.gmra.mxu0 %vm415_vm1, %v5062_v63 }
 0x23f   :  { %4145 = vmatpush3.bf16.msra.mxu0 %v654_v1  ;;  %4146 = vmatprep.mubr.msk.bf16.mxu0 %vm4902_vm0, %v4900_v0 }
 0x240   :  { %4156 = vmatprep.subr.bf16.mxu0 %v4900_v0 }
 0x241   :  { %v5071_v2 = vpop.permute.xlu1 %399 }
 0x242   :  { %4141 = vmatmul.mubr.msk.bf16.vlgmr.msra.gmra.mxu1 %vm415_vm1, %v5071_v2 }
 0x243   :  { %4152 = vmatprep.mubr.msk.bf16.mxu1 %vm4902_vm0, %v4900_v0 }
 0x287   :  { %v456_v4 = vpop.f32.mrf.mxu0 }
 0x288   :  { %v457_v5 = vadd.f32 %v456_v4, %v5077_v3 }
 0x289   :  { %v4124_v6 = vpop.f32.mrf.mxu0 }
 0x28a   :  { %v601_v7 = vsel %vm600_vm3, %v457_v5, -inf }
 0x28b   :  { %v459_v8 = vpop.f32.mrf.mxu0  ;;  %602 = vmax.xlane.f32.xlu1 %v601_v7 }
 0x28d   :  { %v4125_v9 = vpop.f32.mrf.mxu0 }
 0x2fa   :  { %v502_v11 = vpop.f32.mrf.mxu1 }
 0x2fb   :  { %v503_v12 = vadd.f32 %v502_v11, %v5081_v10 }
 0x2fc   :  { %v4130_v13 = vpop.f32.mrf.mxu1 }
 0x2fd   :  { %v604_v15 = vsel %vm600_vm3, %v503_v12, -inf }
 0x2fe   :  { %v505_v16 = vpop.f32.mrf.mxu1  ;;  %v548_v17 = vpop.f32.mrf.mxu0  ;;  %605 = vmax.xlane.f32.xlu0 %v604_v15 }
 0x2ff   :  { %v549_v18 = vadd.f32 %v548_v17, %v5084_v14  ;;  %v852_v16 = vrot.slane %v5020_v54, 4 }
 0x300   :  { %v4131_v19 = vpop.f32.mrf.mxu1  ;;  %v4136_v20 = vpop.f32.mrf.mxu0 }
 0x301   :  { %v607_v22 = vsel %vm600_vm3, %v549_v18, -inf  ;;  %v948_v19 = vrot.slane %v5046_v58, 4  ;;  %v851_v20 = vrot.slane %v5016_v50, 4 }
 0x302   :  { %v551_v23 = vpop.f32.mrf.mxu0  ;;  %v594_v24 = vpop.f32.mrf.mxu1  ;;  %608 = vmax.xlane.f32.xlu1 %v607_v22  ;;  %v1091_v22 = vrot.slane %v5018_v51, 4 }
 0x303   :  { %v595_v25 = vadd.f32 %v594_v24, %v5088_v21  ;;  %v953_v54 = vsel %vm415_vm1, %v948_v19, 0  ;;  %v947_v23 = vrot.slane %v5062_v63, 4  ;;  %v900_v63 = vrot.slane %v5041_v56, 4 }
 0x304   :  { %v4137_v27 = vpop.f32.mrf.mxu0  ;;  %v4142_v28 = vpop.f32.mrf.mxu1  ;;  %v1096_v58 = vsel %vm652_vm2, %v1091_v22, 0 }
 0x305   :  { %v610_v29 = vsel %vm600_vm3, %v595_v25, -inf }
 0x306   :  { %v597_v30 = vpop.f32.mrf.mxu1  ;;  %611 = vmax.xlane.f32.xlu1 %v610_v29  ;;  %v905_v29 = vsel %vm415_vm1, %v900_v63, 0 }
 0x307   :  { %v996_v30 = vrot.slane %v5053_v61, 4 }
 0x308   :  { %v4143_v31 = vpop.f32.mrf.mxu1 }
 0x309   :  { %v899_v31 = vrot.slane %v5051_v60, 4  ;;  %v1001_v56 = vsel %vm415_vm1, %v996_v30, 0 }
 0x314   :  { %v603_v32 = vpop.xlane.xlu1 %602 }
 0x315   :  { %v613_v33 = vsub.f32 %v457_v5, %v603_v32 }
 0x317   :  { %v617_v34 = vmul.f32 1.442695, %v613_v33  ;;  %v995_v33 = vrot.slane %v5071_v2, 4 }
 0x319   :  { %4634 = vpow2.f32 %v617_v34 }
 0x326   :  { %v4635_v35 = vpop.eup %4634 }
 0x327   :  { %v625_v36 = vsel %vm600_vm3, %v4635_v35, 0.0 }
 0x328   :  { %626 = vadd.xlane.f32.xlu0 %v625_v36 }
 0x387   :  { %v606_v37 = vpop.xlane.xlu0 %605 }
 0x388   :  { %v614_v38 = vsub.f32 %v503_v12, %v606_v37 }
 0x38a   :  { %v619_v39 = vmul.f32 1.442695, %v614_v38 }
 0x38b   :  { %v609_v40 = vpop.xlane.xlu1 %608 }
 0x38c   :  { %4636 = vpow2.f32 %v619_v39  ;;  %v615_v41 = vsub.f32 %v549_v18, %v609_v40  ;;  %v857_v18 = vsel %vm415_vm1, %v852_v16, 0 }
 0x38e   :  { %v621_v42 = vmul.f32 1.442695, %v615_v41 }
 0x38f   :  { %v612_v48 = vpop.xlane.xlu1 %611 }
 0x390   :  { %4638 = vpow2.f32 %v621_v42  ;;  %v616_v49 = vsub.f32 %v595_v25, %v612_v48 }
 0x392   :  { %v623_v52 = vmul.f32 1.442695, %v616_v49 }
 0x399   :  { %v4637_v43 = vpop.eup %4636 }
 0x39a   :  { %v628_v44 = vsel %vm600_vm3, %v4637_v43, 0.0 }
 0x39b   :  { %629 = vadd.xlane.f32.xlu1 %v628_v44 }
 0x39d   :  { %v4639_v45 = vpop.eup %4638 }
 0x39e   :  { %v631_v46 = vsel %vm600_vm3, %v4639_v45, 0.0 }
 0x39f   :  { %632 = vadd.xlane.f32.xlu0 %v631_v46 }
 0x3ac   :  { %411 = vrot.lane.b32.xlu1 %v5018_v51, %s4890_s19 }
 0x3b1   :  { %v627_v47 = vpop.xlane.xlu0 %626 }
 0x3b2   :  { %4640 = vrcp.f32 %v627_v47 }
 0x3b3   :  { %4642 = vpow2.f32 %v623_v52 }
 0x3b5   :  { %409 = vrot.lane.b32.xlu0 %v5018_v51, %s4903_s20 }
 0x3bf   :  { %v4641_v53 = vpop.eup %4640 }
 0x3c0   :  { %v641_v55 = vmul.f32 %v4641_v53, %v4635_v35  ;;  %v4643_v59 = vpop.eup %4642 }
 0x3c1   :  { %v634_v62 = vsel %vm600_vm3, %v4643_v59, 0.0 }
 0x3c2   :  { %v645_v57 = vpack.c.bf16 %v641_v55, %v641_v55 }
 0x3c4   :  { %4147 = vmatmul.mubr.msk.bf16.vlgmr.msra.gmra.mxu0 %vm600_vm3, %v645_v57 }
 0x3c5   :  { %4158 = vmatprep.mubr.msk.bf16.mxu0 %vm4902_vm0, %v4900_v0 }
 0x3d0   :  { %635 = vadd.xlane.f32.xlu1 %v634_v62 }
 0x3e1   :  { %413 = vrot.lane.b32.xlu1 %v5018_v51, %s4904_s1 }
 0x424   :  { %v630_v1 = vpop.xlane.xlu1 %629 }
 0x425   :  { %4644 = vrcp.f32 %v630_v1 }
 0x428   :  { %v633_v4 = vpop.xlane.xlu0 %632  ;;  %v5106_v5 = vpop.permute.xlu1 %411 }
 0x429   :  { %4646 = vrcp.f32 %v633_v4  ;;  %v746_v6 = vsel %vm652_vm2, %v5106_v5, 0 }
 0x42a   :  { %4157 = vmatpush3.bf16.msra.mxu0 %v746_v6 }
 0x42b   :  { %4168 = vmatprep.subr.bf16.mxu0 %v4900_v0 }
 0x42c   :  { %v410_v7 = vpop.permute.xlu0 %409 }
 0x42d   :  { %v700_v8 = vsel %vm652_vm2, %v410_v7, 0  ;;  %v1138_v32 = vrot.slane %v410_v7, 4 }
 0x42e   :  { %4151 = vmatpush3.bf16.msra.mxu1 %v700_v8 }
 0x42f   :  { %4162 = vmatprep.subr.bf16.mxu1 %v4900_v0  ;;  %v1143_v34 = vsel %vm652_vm2, %v1138_v32, 0 }
 0x432   :  { %v4645_v9 = vpop.eup %4644 }
 0x433   :  { %v642_v11 = vmul.f32 %v4645_v9, %v4637_v43 }
 0x435   :  { %v646_v12 = vpack.c.bf16 %v642_v11, %v642_v11 }
 0x436   :  { %v4647_v13 = vpop.eup %4646 }
 0x437   :  { %4153 = vmatmul.mubr.msk.bf16.vlgmr.msra.gmra.mxu1 %vm600_vm3, %v646_v12  ;;  %v643_v15 = vmul.f32 %v4647_v13, %v4639_v45 }
 0x438   :  { %4164 = vmatprep.mubr.msk.bf16.mxu1 %vm4902_vm0, %v4900_v0 }
 0x439   :  { %v647_v17 = vpack.c.bf16 %v643_v15, %v643_v15 }
 0x43b   :  { %4159 = vmatmul.mubr.msk.bf16.vlgmr.msra.gmra.mxu0 %vm600_vm3, %v647_v17 }
 0x43c   :  { %4169 = vmatpush3.bf16.xpose.msra.mxu0 %v857_v18  ;;  %4170 = vmatprep.mubr.msk.bf16.mxu0 %vm4902_vm0, %v4900_v0 }
 0x43d   :  { %4180 = vmatprep.subr.bf16.mxu0 %v4900_v0 }
 0x443   :  { %4171 = vmatmul.mubr.msk.bf16.vlgmr.msra.gmra.mxu0 %vm415_vm1, %v851_v20 }
 0x444   :  { %4181 = vmatpush3.bf16.xpose.msra.mxu0 %v953_v54  ;;  %4182 = vmatprep.mubr.msk.bf16.mxu0 %vm4902_vm0, %v4900_v0 }
 0x445   :  { %4192 = vmatprep.subr.bf16.mxu0 %v4900_v0 }
 0x44b   :  { %4183 = vmatmul.mubr.msk.bf16.vlgmr.msra.gmra.mxu0 %vm415_vm1, %v947_v23 }
 0x44c   :  { %4193 = vmatpush3.bf16.msra.mxu0 %v1096_v58  ;;  %4194 = vmatprep.mubr.msk.bf16.mxu0 %vm4902_vm0, %v4900_v0 }
 0x44d   :  { %4204 = vmatprep.subr.bf16.mxu0 %v4900_v0 }
 0x459   :  { %v636_v50 = vpop.xlane.xlu1 %635 }
 0x45a   :  { %4648 = vrcp.f32 %v636_v50 }
 0x45d   :  { %v5136_v24 = vpop.permute.xlu1 %413 }
 0x45e   :  { %v792_v25 = vsel %vm652_vm2, %v5136_v24, 0 }
 0x45f   :  { %4163 = vmatpush3.bf16.msra.mxu1 %v792_v25 }
 0x460   :  { %4174 = vmatprep.subr.bf16.mxu1 %v4900_v0 }
 0x467   :  { %v4649_v51 = vpop.eup %4648 }
 0x468   :  { %v644_v27 = vmul.f32 %v4649_v51, %v4643_v59 }
 0x46a   :  { %v648_v28 = vpack.c.bf16 %v644_v27, %v644_v27 }
 0x46c   :  { %4165 = vmatmul.mubr.msk.bf16.vlgmr.msra.gmra.mxu1 %vm600_vm3, %v648_v28 }
 0x46d   :  { %4175 = vmatpush3.bf16.xpose.msra.mxu1 %v905_v29  ;;  %4176 = vmatprep.mubr.msk.bf16.mxu1 %vm4902_vm0, %v4900_v0 }
 0x46e   :  { %4186 = vmatprep.subr.bf16.mxu1 %v4900_v0 }
 0x474   :  { %4177 = vmatmul.mubr.msk.bf16.vlgmr.msra.gmra.mxu1 %vm415_vm1, %v899_v31 }
 0x475   :  { %4187 = vmatpush3.bf16.xpose.msra.mxu1 %v1001_v56  ;;  %4188 = vmatprep.mubr.msk.bf16.mxu1 %vm4902_vm0, %v4900_v0 }
 0x476   :  { %4198 = vmatprep.subr.bf16.mxu1 %v4900_v0 }
 0x47c   :  { %4189 = vmatmul.mubr.msk.bf16.vlgmr.msra.gmra.mxu1 %vm415_vm1, %v995_v33 }
 0x47d   :  { %4199 = vmatpush3.bf16.msra.mxu1 %v1143_v34  ;;  %4200 = vmatprep.mubr.msk.bf16.mxu1 %vm4902_vm0, %v4900_v0 }
 0x47e   :  { %4210 = vmatprep.subr.bf16.mxu1 %v4900_v0 }
 0x484   :  { %v5160_v60 = vpop.f32.mrf.mxu0 }
 0x486   :  { %v4148_v61 = vpop.f32.mrf.mxu0 }
 0x488   :  { %v693_v35 = vpop.f32.mrf.mxu0 }
 0x48a   :  { %v4149_v36 = vpop.f32.mrf.mxu0 }
 0x4f7   :  { %v5162_v37 = vpop.f32.mrf.mxu1 }
 0x4f9   :  { %v4154_v38 = vpop.f32.mrf.mxu1 }
 0x4fa   :  { %v1185_v38 = vrot.slane %v5106_v5, 4 }
 0x4fb   :  { %v739_v39 = vpop.f32.mrf.mxu1  ;;  %v5164_v2 = vpop.f32.mrf.mxu0 }
 0x4fd   :  { %v4155_v40 = vpop.f32.mrf.mxu1  ;;  %v4160_v41 = vpop.f32.mrf.mxu0 }
 0x4fe   :  { %v1190_v41 = vsel %vm652_vm2, %v1185_v38, 0  ;;  %v4465_v38 = vld [vmem:[#allocation10 + $0xe8] ss:$16 sps:$4 sm:$0xff]  }
 0x4ff   :  { %v785_v42 = vpop.f32.mrf.mxu0 }
 0x501   :  { %v4161_v43 = vpop.f32.mrf.mxu0 }
 0x503   :  { %v893_v44 = vpop.f32.mrf.mxu0 }
 0x504   :  { %v894_v45 = vadd.f32 %v893_v44, %v5077_v3 }
 0x505   :  { %v4172_v46 = vpop.f32.mrf.mxu0 }
 0x506   :  { %v1043_v47 = vsel %vm600_vm3, %v894_v45, -inf }
 0x507   :  { %1044 = vmax.xlane.f32.xlu0 %v1043_v47  ;;  %v896_v48 = vpop.f32.mrf.mxu0  ;;  %v1232_v47 = vrot.slane %v5136_v24, 4  ;;  %v4455_v24 = vld [vmem:[#allocation8 + $0x30] sm:$0xff]  }
 0x509   :  { %v4173_v49 = vpop.f32.mrf.mxu0 }
 0x50b   :  { %v989_v52 = vpop.f32.mrf.mxu0 }
 0x50c   :  { %v990_v53 = vadd.f32 %v989_v52, %v5084_v14  ;;  %v1237_v52 = vsel %vm652_vm2, %v1232_v47, 0 }
 0x50d   :  { %v4184_v55 = vpop.f32.mrf.mxu0 }
 0x50e   :  { %v1049_v57 = vsel %vm600_vm3, %v990_v53, -inf }
 0x50f   :  { %1050 = vmax.xlane.f32.xlu0 %v1049_v57  ;;  %v992_v59 = vpop.f32.mrf.mxu0 }
 0x510   :  { %v4454_v59 = vld [vmem:[#allocation8 + $0x38] sm:$0xff]  }
 0x511   :  { %v4185_v62 = vpop.f32.mrf.mxu0 }
 0x52c   :  { %v5170_v1 = vpop.f32.mrf.mxu1 }
 0x52e   :  { %v4166_v4 = vpop.f32.mrf.mxu1 }
 0x530   :  { %v831_v6 = vpop.f32.mrf.mxu1 }
 0x532   :  { %v4167_v3 = vpop.f32.mrf.mxu1 }
 0x533   :  { %v4456_v3 = vld [vmem:[#allocation8 + $0x28] sm:$0xff]  }
 0x534   :  { %v941_v7 = vpop.f32.mrf.mxu1 }
 0x535   :  { %v942_v8 = vadd.f32 %v941_v7, %v5081_v10 }
 0x536   :  { %v4178_v9 = vpop.f32.mrf.mxu1 }
 0x537   :  { %v1046_v11 = vsel %vm600_vm3, %v942_v8, -inf  ;;  %v4457_v9 = vld [vmem:[#allocation8 + $0x20] sm:$0xff]  }
 0x538   :  { %1047 = vmax.xlane.f32.xlu1 %v1046_v11  ;;  %v944_v12 = vpop.f32.mrf.mxu1 }
 0x53a   :  { %v4179_v14 = vpop.f32.mrf.mxu1 }
 0x53c   :  { %v1037_v13 = vpop.f32.mrf.mxu1 }
 0x53d   :  { %v1038_v15 = vadd.f32 %v1037_v13, %v5088_v21  ;;  %v4458_v13 = vld [vmem:[#allocation8 + $0x18] sm:$0xff]  }
 0x53e   :  { %v4190_v16 = vpop.f32.mrf.mxu1 }
 0x53f   :  { %v1052_v17 = vsel %vm600_vm3, %v1038_v15, -inf  ;;  %v4459_v16 = vld [vmem:[#allocation8 + $0x10] sm:$0xff]  }
 0x540   :  { %1053 = vmax.xlane.f32.xlu0 %v1052_v17  ;;  %v1040_v18 = vpop.f32.mrf.mxu1  ;;  %v4460_v17 = vld [vmem:[#allocation8 + $0x8] sm:$0xff]  }
 0x542   :  { %v4191_v19 = vpop.f32.mrf.mxu1 }
 0x590   :  { %v1045_v20 = vpop.xlane.xlu0 %1044 }
 0x591   :  { %v1055_v54 = vsub.f32 %v894_v45, %v1045_v20 }
 0x593   :  { %v1059_v22 = vmul.f32 1.442695, %v1055_v54 }
 0x595   :  { %4650 = vpow2.f32 %v1059_v22 }
 0x598   :  { %v1051_v10 = vpop.xlane.xlu0 %1050 }
 0x599   :  { %v1057_v23 = vsub.f32 %v990_v53, %v1051_v10 }
 0x59b   :  { %v1063_v58 = vmul.f32 1.442695, %v1057_v23 }
 0x59d   :  { %4652 = vpow2.f32 %v1063_v58 }
 0x5a2   :  { %v4651_v50 = vpop.eup %4650 }
 0x5a3   :  { %v1067_v25 = vsel %vm600_vm3, %v4651_v50, 0.0 }
 0x5a4   :  { %1068 = vadd.xlane.f32.xlu1 %v1067_v25 }
 0x5aa   :  { %v4653_v51 = vpop.eup %4652 }
 0x5ab   :  { %v1073_v21 = vsel %vm600_vm3, %v4653_v51, 0.0 }
 0x5ac   :  { %1074 = vadd.xlane.f32.xlu1 %v1073_v21 }
 0x5c1   :  { %v1048_v63 = vpop.xlane.xlu1 %1047 }
 0x5c2   :  { %v1056_v27 = vsub.f32 %v942_v8, %v1048_v63 }
 0x5c4   :  { %v1061_v28 = vmul.f32 1.442695, %v1056_v27 }
 0x5c6   :  { %4654 = vpow2.f32 %v1061_v28 }
 0x5c9   :  { %v1054_v29 = vpop.xlane.xlu0 %1053 }
 0x5ca   :  { %v1058_v30 = vsub.f32 %v1038_v15, %v1054_v29 }
 0x5cc   :  { %v1065_v31 = vmul.f32 1.442695, %v1058_v30 }
 0x5ce   :  { %4656 = vpow2.f32 %v1065_v31 }
 0x5d3   :  { %v4655_v56 = vpop.eup %4654 }
 0x5d4   :  { %v1070_v32 = vsel %vm600_vm3, %v4655_v56, 0.0 }
 0x5d5   :  { %1071 = vadd.xlane.f32.xlu0 %v1070_v32 }
 0x5db   :  { %v4657_v33 = vpop.eup %4656 }
 0x5dc   :  { %v1076_v34 = vsel %vm600_vm3, %v4657_v33, 0.0 }
 0x5dd   :  { %1077 = vadd.xlane.f32.xlu0 %v1076_v34 }
 0x62d   :  { %v1069_v61 = vpop.xlane.xlu1 %1068 }
 0x62e   :  { %4658 = vrcp.f32 %v1069_v61 }
 0x635   :  { %v1075_v35 = vpop.xlane.xlu1 %1074 }
 0x636   :  { %4660 = vrcp.f32 %v1075_v35 }
 0x63b   :  { %v4659_v36 = vpop.eup %4658 }
 0x63c   :  { %v1083_v39 = vmul.f32 %v4659_v36, %v4651_v50  ;;  %v4464_v36 = vld [vmem:[#allocation10 + $0xe4] ss:$16 sps:$4 sm:$0xff]  }
 0x63e   :  { %v1087_v40 = vpack.c.bf16 %v1083_v39, %v1083_v39  ;;  %v4467_v39 = vld [vmem:[#allocation10 + $0xec] ss:$16 sps:$4 sm:$0xff]  }
 0x640   :  { %4195 = vmatmul.mubr.msk.bf16.vlgmr.msra.gmra.mxu0 %vm600_vm3, %v1087_v40 }
 0x641   :  { %4205 = vmatpush3.bf16.msra.mxu0 %v1190_v41  ;;  %4206 = vmatprep.mubr.msk.bf16.mxu0 %vm4902_vm0, %v4900_v0  ;;  %v4730_v41 = vld [vmem:[#allocation2] sm:$0xff] }
 0x642   :  { %4216 = vmatprep.subr.bf16.mxu0 %v4900_v0 }
 0x643   :  { %v4661_v42 = vpop.eup %4660 }
 0x644   :  { %v1085_v43 = vmul.f32 %v4661_v42, %v4653_v51 }
 0x646   :  { %v1089_v44 = vpack.c.bf16 %v1085_v43, %v1085_v43 }
 0x648   :  { %4207 = vmatmul.mubr.msk.bf16.vlgmr.msra.gmra.mxu0 %vm600_vm3, %v1089_v44 }
 0x649   :  { %4232 = vmatprep.mubr.msk.bf16.mxu0 %vm4902_vm0, %v4900_v0  ;;  %4217 = vmatpush3.bf16.msra.mxu0 %v4454_v59  ;;  %v4479_v59 = vld [vmem:[#allocation10 + $0xac] ss:$16 sps:$4 sm:$0xff]  }
 0x64a   :  { %4218 = vmatprep.subr.bf16.mxu0 %v4900_v0 }
 0x64d   :  { %4219 = vmatpush3.bf16.msra.mxu0 %v4455_v24  ;;  %v4477_v24 = vld [vmem:[#allocation10 + $0xa8] ss:$16 sps:$4 sm:$0xff]  }
 0x64e   :  { %4220 = vmatprep.subr.bf16.mxu0 %v4900_v0 }
 0x651   :  { %4221 = vmatpush3.bf16.msra.mxu0 %v4456_v3  ;;  %v4480_v3 = vld [vmem:[#allocation10 + $0x80] ss:$16 sps:$4 sm:$0xff]  }
 0x652   :  { %4222 = vmatprep.subr.bf16.mxu0 %v4900_v0 }
 0x655   :  { %4223 = vmatpush3.bf16.msra.mxu0 %v4457_v9  ;;  %v4491_v9 = vld [vmem:[#allocation10 + $0x6c] ss:$16 sps:$4 sm:$0xff]  }
 0x656   :  { %4224 = vmatprep.subr.bf16.mxu0 %v4900_v0 }
 0x659   :  { %4225 = vmatpush3.bf16.msra.mxu0 %v4458_v13  ;;  %v4497_v13 = vld [vmem:[#allocation10 + $0x4c] ss:$16 sps:$4 sm:$0xff]  }
 0x65a   :  { %4226 = vmatprep.subr.bf16.mxu0 %v4900_v0 }
 0x65d   :  { %4227 = vmatpush3.bf16.msra.mxu0 %v4459_v16  ;;  %v4495_v16 = vld [vmem:[#allocation10 + $0x48] ss:$16 sps:$4 sm:$0xff]  }
 0x65e   :  { %v1072_v5 = vpop.xlane.xlu0 %1071  ;;  %4228 = vmatprep.subr.bf16.mxu0 %v4900_v0 }
 0x65f   :  { %4662 = vrcp.f32 %v1072_v5 }
 0x661   :  { %4229 = vmatpush3.bf16.msra.mxu0 %v4460_v17  ;;  %v4500_v17 = vld [vmem:[#allocation10 + $0x24] ss:$16 sps:$4 sm:$0xff]  }
 0x662   :  { %4230 = vmatprep.subr.bf16.mxu0 %v4900_v0 }
 0x666   :  { %v1078_v45 = vpop.xlane.xlu0 %1077 }
 0x667   :  { %4664 = vrcp.f32 %v1078_v45  ;;  %v4731_v45 = vld [vmem:[#allocation2 + $0x8] sm:$0xff] }
 0x66c   :  { %v4663_v46 = vpop.eup %4662 }
 0x66d   :  { %v1084_v48 = vmul.f32 %v4663_v46, %v4655_v56 }
 0x66f   :  { %v1088_v49 = vpack.c.bf16 %v1084_v48, %v1084_v48 }
 0x671   :  { %4201 = vmatmul.mubr.msk.bf16.vlgmr.msra.gmra.mxu1 %vm600_vm3, %v1088_v49  ;;  %v4470_v49 = vld [vmem:[#allocation10 + $0xc4] ss:$16 sps:$4 sm:$0xff]  }
 0x672   :  { %4211 = vmatpush3.bf16.msra.mxu1 %v1237_v52  ;;  %4212 = vmatprep.mubr.msk.bf16.mxu1 %vm4902_vm0, %v4900_v0  ;;  %v4473_v52 = vld [vmem:[#allocation10 + $0xcc] ss:$16 sps:$4 sm:$0xff]  }
 0x673   :  { %1618 = vmatprep.subr.bf16.mxu1 %v4464_v36  ;;  %v4517_v36 = vld [vmem:[#allocation11 + $0x20] sm:$0xff]  }
 0x674   :  { %v4665_v53 = vpop.eup %4664 }
 0x675   :  { %v1086_v55 = vmul.f32 %v4665_v53, %v4657_v33  ;;  %v4468_v53 = vld [vmem:[#allocation10 + $0xc0] ss:$16 sps:$4 sm:$0xff]  }
 0x677   :  { %v1090_v57 = vpack.c.bf16 %v1086_v55, %v1086_v55  ;;  %v4471_v55 = vld [vmem:[#allocation10 + $0xc8] ss:$16 sps:$4 sm:$0xff]  }
 0x679   :  { %4213 = vmatmul.mubr.msk.bf16.vlgmr.msra.gmra.mxu1 %vm600_vm3, %v1090_v57  ;;  %v4476_v57 = vld [vmem:[#allocation10 + $0xa4] ss:$16 sps:$4 sm:$0xff]  }
 0x67a   :  { %1650 = vmatprep.mubr.bf16.mxu1 %v4901_v26 }
 0x700   :  { %v1132_v62 = vpop.f32.mrf.mxu0 }
 0x702   :  { %v4196_v4 = vpop.f32.mrf.mxu0 }
 0x703   :  { %v4482_v4 = vld [vmem:[#allocation10 + $0x84] ss:$16 sps:$4 sm:$0xff]  }
 0x704   :  { %v1135_v6 = vpop.f32.mrf.mxu0 }
 0x705   :  { %v4485_v6 = vld [vmem:[#allocation10 + $0x8c] ss:$16 sps:$4 sm:$0xff]  }
 0x706   :  { %v4197_v7 = vpop.f32.mrf.mxu0 }
 0x707   :  { %v4483_v7 = vld [vmem:[#allocation10 + $0x88] ss:$16 sps:$4 sm:$0xff]  }
 0x708   :  { %v1226_v8 = vpop.f32.mrf.mxu0 }
 0x709   :  { %v4397_v11 = vpack.i.bf16 %v1226_v8, %v5164_v2  ;;  %v4461_v2 = vld [vmem:[#allocation8] sm:$0xff]  }
 0x70a   :  { %v4208_v12 = vpop.f32.mrf.mxu0  ;;  %4231 = vmatpush3.bf16.msra.mxu0 %v4461_v2  ;;  %v4488_v8 = vld [vmem:[#allocation10 + $0x64] ss:$16 sps:$4 sm:$0xff]   ;;  %v4503_v2 = vld [vmem:[#allocation10 + $0x2c] ss:$16 sps:$4 sm:$0xff]  }
 0x70b   :  { %4398 = vrot.lane.b32.xlu0 %v4397_v11, %s4890_s19  ;;  %1661 = vmatprep.subr.bf16.mxu0 %v4467_v39  ;;  %v4486_v11 = vld [vmem:[#allocation10 + $0x60] ss:$16 sps:$4 sm:$0xff]   ;;  %v4489_v12 = vld [vmem:[#allocation10 + $0x68] ss:$16 sps:$4 sm:$0xff]  }
 0x70c   :  { %v1229_v14 = vpop.f32.mrf.mxu0  ;;  %v4519_v39 = vld [vmem:[#allocation11 + $0x18] sm:$0xff]  }
 0x70d   :  { %v4494_v14 = vld [vmem:[#allocation10 + $0x44] ss:$16 sps:$4 sm:$0xff]  }
 0x70e   :  { %v4209_v15 = vpop.f32.mrf.mxu0 }
 0x70f   :  { %v4492_v15 = vld [vmem:[#allocation10 + $0x40] ss:$16 sps:$4 sm:$0xff]  }
 0x731   :  { %v1179_v18 = vpop.f32.mrf.mxu1 }
 0x732   :  { %v4392_v19 = vpack.i.bf16 %v1179_v18, %v5162_v37  ;;  %v4498_v18 = vld [vmem:[#allocation10 + $0x20] ss:$16 sps:$4 sm:$0xff]  }
 0x733   :  { %v4202_v20 = vpop.f32.mrf.mxu1 }
 0x734   :  { %4393 = vrot.lane.b32.xlu1 %v4392_v19, %s4904_s1  ;;  %v4501_v19 = vld [vmem:[#allocation10 + $0x28] ss:$16 sps:$4 sm:$0xff]   ;;  %v4506_v20 = vld [vmem:[#allocation10 + $0x4] ss:$16 sps:$4 sm:$0xff]  }
 0x735   :  { %v1182_v54 = vpop.f32.mrf.mxu1 }
 0x736   :  { %v4509_v54 = vld [vmem:[#allocation10 + $0xc] ss:$16 sps:$4 sm:$0xff]  }
 0x737   :  { %v4203_v22 = vpop.f32.mrf.mxu1 }
 0x738   :  { %v4504_v22 = vld [vmem:[#allocation10] ss:$16 sps:$4 sm:$0xff]  }
 0x739   :  { %v1273_v10 = vpop.f32.mrf.mxu1 }
 0x73a   :  { %v4402_v23 = vpack.i.bf16 %v1273_v10, %v5170_v1  ;;  %v4507_v10 = vld [vmem:[#allocation10 + $0x8] ss:$16 sps:$4 sm:$0xff]  }
 0x73b   :  { %v4214_v58 = vpop.f32.mrf.mxu1 }
 0x73c   :  { %4403 = vrot.lane.b32.xlu1 %v4402_v23, %s4903_s20 }
 0x73d   :  { %v1276_v50 = vpop.f32.mrf.mxu1 }
 0x73f   :  { %v4215_v25 = vpop.f32.mrf.mxu1 }
 0x77d   :  { %v4399_v27 = vpop.permute.xlu0 %4398 }
 0x77e   :  { %v4401_v29 = vunpack.i.h.bf16 %v4399_v27  ;;  %v4400_v30 = vunpack.i.l.bf16 %v4399_v27 }
 0x7a6   :  { %v4394_v51 = vpop.permute.xlu1 %4393 }
 0x7a7   :  { %v4396_v21 = vunpack.i.h.bf16 %v4394_v51  ;;  %v4395_v63 = vunpack.i.l.bf16 %v4394_v51 }
 0x7a9   :  { %v1291_v37 = vsel %vm415_vm1, %v1132_v62, %v4396_v21  ;;  %v846_v28 = vsel %vm415_vm1, %v5160_v60, %v4395_v63  ;;  %v4462_v60 = vld [vmem:[#allocation10 + $0xe0] ss:$16 sps:$4 sm:$0xff]  }
 0x7aa   :  { %v848_v32 = vsel %vm847_vm4, %v846_v28, %v4400_v30  ;;  %v1292_v33 = vsel %vm847_vm4, %v1291_v37, %v4401_v29  ;;  %1619 = vmatpush1.bf16.msra.mxu1 %v4462_v60  ;;  %v4474_v62 = vld [vmem:[#allocation10 + $0xa0] ss:$16 sps:$4 sm:$0xff]  }
 0x7ab   :  { %1620 = vmatprep.subr.bf16.mxu1 %v4470_v49  ;;  %v3806_v28 = vld [vmem:[%s5494_s5] ss:$0 sm:$0xff]  ;;  %v4516_v60 = vld [vmem:[#allocation11 + $0x60] sm:$0xff]  }
 0x7ae   :  { %v4404_v31 = vpop.permute.xlu1 %4403  ;;  %1621 = vmatpush1.bf16.msra.mxu1 %v4468_v53 }
 0x7af   :  { %v4406_v1 = vunpack.i.h.bf16 %v4404_v31  ;;  %v4405_v56 = vunpack.i.l.bf16 %v4404_v31  ;;  %1622 = vmatprep.subr.bf16.mxu1 %v4476_v57 }
 0x7b1   :  { %v1293_v34 = vsel %vm849_vm5, %v1292_v33, %v4406_v1  ;;  %v850_v61 = vsel %vm849_vm5, %v848_v32, %v4405_v56  ;;  %v4510_v56 = vld [vmem:[#allocation11 + $0x78] sm:$0xff]   ;;  %v4512_v33 = vld [vmem:[#allocation11 + $0x70] sm:$0xff]  }
 0x7b2   :  { %v1294_v35 = vpack.c.bf16 %v1293_v34, %v850_v61  ;;  %1623 = vmatpush1.bf16.msra.mxu1 %v4474_v62  ;;  %v4511_v32 = vld [vmem:[#allocation11 + $0x38] sm:$0xff]   ;;  %v4513_v34 = vld [vmem:[#allocation11 + $0x30] sm:$0xff]   ;;  %v4514_v61 = vld [vmem:[#allocation11 + $0x68] sm:$0xff]  }
 0x7b3   :  { %1624 = vmatprep.subr.bf16.mxu1 %v4482_v4 }
 0x7b4   :  { %4233 = vmatmul.mubr.bf16.vlgmr.msra.gmra.mxu0 %v1294_v35  ;;  %v4515_v35 = vld [vmem:[#allocation11 + $0x28] sm:$0xff]  }
 0x7b5   :  { %1693 = vmatprep.mubr.bf16.mxu0 %v4901_v26  ;;  %1662 = vmatpush1.bf16.msra.mxu0 %v4465_v38  ;;  %v4518_v38 = vld [vmem:[#allocation11 + $0x58] sm:$0xff]  }
 0x7b6   :  { %1663 = vmatprep.subr.bf16.mxu0 %v4473_v52  ;;  %1625 = vmatpush1.bf16.msra.mxu1 %v4480_v3 }
 0x7b7   :  { %1626 = vmatprep.subr.bf16.mxu1 %v4488_v8 }
 0x7b9   :  { %1664 = vmatpush1.bf16.msra.mxu0 %v4471_v55 }
 0x7ba   :  { %1665 = vmatprep.subr.bf16.mxu0 %v4479_v59  ;;  %1627 = vmatpush1.bf16.msra.mxu1 %v4486_v11 }
 0x7bb   :  { %1628 = vmatprep.subr.bf16.mxu1 %v4494_v14 }
 0x7bd   :  { %1666 = vmatpush1.bf16.msra.mxu0 %v4477_v24 }
 0x7be   :  { %1667 = vmatprep.subr.bf16.mxu0 %v4485_v6  ;;  %1629 = vmatpush1.bf16.msra.mxu1 %v4492_v15 }
 0x7bf   :  { %1630 = vmatprep.subr.bf16.mxu1 %v4500_v17 }
 0x7c1   :  { %1668 = vmatpush1.bf16.msra.mxu0 %v4483_v7 }
 0x7c2   :  { %1669 = vmatprep.subr.bf16.mxu0 %v4491_v9  ;;  %1631 = vmatpush1.bf16.msra.mxu1 %v4498_v18 }
 0x7c3   :  { %1632 = vmatprep.subr.bf16.mxu1 %v4506_v20 }
 0x7c5   :  { %1670 = vmatpush1.bf16.msra.mxu0 %v4489_v12 }
 0x7c6   :  { %1671 = vmatprep.subr.bf16.mxu0 %v4497_v13  ;;  %1633 = vmatpush1.bf16.msra.mxu1 %v4504_v22 }
 0x7c7   :  { %4006 = vmatprep.subr.bf16.mxu1 %v4510_v56 }
 0x7c9   :  { %1672 = vmatpush1.bf16.msra.mxu0 %v4495_v16 }
 0x7ca   :  { %1673 = vmatprep.subr.bf16.mxu0 %v4503_v2 }
 0x7cd   :  { %1674 = vmatpush1.bf16.msra.mxu0 %v4501_v19 }
 0x7ce   :  { %1675 = vmatprep.subr.bf16.mxu0 %v4509_v54 }
 0x7d1   :  { %1676 = vmatpush1.bf16.msra.mxu0 %v4507_v10 }
 0x874   :  { %v1393_v40 = vpop.f32.mrf.mxu0 }
 0x875   :  { %v5217_v42 = vadd.f32 %v4730_v41, %v1393_v40  ;;  %v4520_v40 = vld [vmem:[#allocation11 + $0x50] sm:$0xff]  }
 0x876   :  { %v4234_v43 = vpop.f32.mrf.mxu0  ;;  %v4521_v41 = vld [vmem:[#allocation11 + $0x10] sm:$0xff]  }
 0x877   :  { %v1403_v44 = vmul.f32 %v5217_v42, %v5217_v42  ;;  %v4522_v43 = vld [vmem:[#allocation11 + $0x48] sm:$0xff]  }
 0x878   :  { %v1396_v5 = vpop.f32.mrf.mxu0 }
 0x879   :  { %v5221_v46 = vadd.f32 %v4731_v45, %v1396_v5  ;;  %1405 = vadd.xlane.f32.xlu1 %v1403_v44  ;;  %v4523_v44 = vld [vmem:[#allocation11 + $0x8] sm:$0xff]   ;;  %v4524_v5 = vld [vmem:[#allocation11 + $0x40] sm:$0xff]  }
 0x87a   :  { %v4235_v47 = vpop.f32.mrf.mxu0  ;;  %v4525_v45 = vld [vmem:[#allocation11] sm:$0xff]  }
 0x87b   :  { %v1404_v48 = vmul.f32 %v5221_v46, %v5221_v46 }
 0x87d   :  { %1407 = vadd.xlane.f32.xlu0 %v1404_v48 }
 0x902   :  { %v1406_v23 = vpop.xlane.xlu1 %1405 }
 0x903   :  { %v1409_v58 = vmul.f32 0.0078125, %v1406_v23 }
 0x905   :  { %v1411_v50 = vadd.f32 1e-06, %v1409_v58 }
 0x906   :  { %v1408_v25 = vpop.xlane.xlu0 %1407 }
 0x907   :  { %4666 = vrsqrt.f32 %v1411_v50  ;;  %v1410_v51 = vmul.f32 0.0078125, %v1408_v25 }
 0x909   :  { %v1412_v21 = vadd.f32 1e-06, %v1410_v51 }
 0x90b   :  { %4668 = vrsqrt.f32 %v1412_v21 }
 0x914   :  { %v4667_v63 = vpop.eup %4666 }
 0x915   :  { %v1415_v27 = vmul.f32 %v4667_v63, %v5217_v42 }
 0x917   :  { %v1423_v30 = vmul.f32 %v3806_v28, %v1415_v27 }
 0x918   :  { %v4669_v37 = vpop.eup %4668 }
 0x919   :  { %v1416_v29 = vmul.f32 %v4669_v37, %v5221_v46 }
 0x91b   :  { %v1424_v31 = vmul.f32 %v3806_v28, %v1416_v29 }
 0x91d   :  { %v1425_v1 = vpack.c.bf16 %v1424_v31, %v1423_v30 }
 0x91f   :  { %1651 = vmatmul.mubr.bf16.vlgmr.msra.gmra.mxu1 %v1425_v1  ;;  %1694 = vmatmul.mubr.bf16.vlgmr.msra.gmra.mxu0 %v1425_v1 }
 0x920   :  { %2135 = vmatprep.mubr.bf16.mxu0 %v4901_v26  ;;  %4007 = vmatpush3.bf16.msra.mxu1 %v4511_v32 }
 0x921   :  { %4008 = vmatprep.subr.bf16.mxu1 %v4512_v33 }
 0x924   :  { %4009 = vmatpush3.bf16.msra.mxu1 %v4513_v34 }
 0x925   :  { %4010 = vmatprep.subr.bf16.mxu1 %v4514_v61 }
 0x928   :  { %4011 = vmatpush3.bf16.msra.mxu1 %v4515_v35 }
 0x929   :  { %4012 = vmatprep.subr.bf16.mxu1 %v4516_v60  ;;  %v4526_v60 = vld [vmem:[#allocation7 + $0x168] ss:$12 sps:$4 sm:$0xff]  }
 0x92c   :  { %4013 = vmatpush3.bf16.msra.mxu1 %v4517_v36  ;;  %v4528_v36 = vld [vmem:[#allocation7 + $0x16c] ss:$12 sps:$4 sm:$0xff]  }
 0x92d   :  { %4014 = vmatprep.subr.bf16.mxu1 %v4518_v38  ;;  %v4529_v38 = vld [vmem:[#allocation7 + $0x170] ss:$12 sps:$4 sm:$0xff]   ;;  %2103 = vmatprep.subr.bf16.mxu0 %v4528_v36 }
 0x92e   :  { %2104 = vmatpush1.bf16.msra.mxu0 %v4526_v60 }
 0x930   :  { %4015 = vmatpush3.bf16.msra.mxu1 %v4519_v39 }
 0x931   :  { %4016 = vmatprep.subr.bf16.mxu1 %v4520_v40 }
 0x934   :  { %4017 = vmatpush3.bf16.msra.mxu1 %v4521_v41 }
 0x935   :  { %4018 = vmatprep.subr.bf16.mxu1 %v4522_v43 }
 0x938   :  { %4019 = vmatpush3.bf16.msra.mxu1 %v4523_v44 }
 0x939   :  { %4020 = vmatprep.subr.bf16.mxu1 %v4524_v5 }
 0x93c   :  { %4021 = vmatpush3.bf16.msra.mxu1 %v4525_v45 }
 0x93d   :  { %4236 = vmatprep.subr.bf16.mxu1 %v4900_v0 }
 0x9df   :  { %v1652_v47 = vpop.f32.mrf.mxu1  ;;  %v1695_v18 = vpop.f32.mrf.mxu0 }
 0x9e0   :  { %v1708_v48 = vmul.f32 0.044715, %v1652_v47  ;;  %v1704_v21 = vmul.f32 0.5, %v1652_v47 }
 0x9e1   :  { %v1654_v49 = vpop.f32.mrf.mxu1  ;;  %v1697_v54 = vpop.f32.mrf.mxu0 }
 0x9e2   :  { %v1712_v52 = vmul.f32 %v1708_v48, %v1652_v47  ;;  %v1709_v53 = vmul.f32 0.044715, %v1654_v49  ;;  %v1705_v58 = vmul.f32 0.5, %v1654_v49 }
 0x9e3   :  { %v1656_v55 = vpop.f32.mrf.mxu1  ;;  %v1699_v63 = vpop.f32.mrf.mxu0 }
 0x9e4   :  { %v1716_v57 = vmul.f32 %v1712_v52, %v1652_v47  ;;  %v1713_v59 = vmul.f32 %v1709_v53, %v1654_v49  ;;  %v1710_v62 = vmul.f32 0.044715, %v1656_v55  ;;  %v1706_v50 = vmul.f32 0.5, %v1656_v55  ;;  %v4532_v52 = vld [vmem:[#allocation7 + $0x154] ss:$12 sps:$4 sm:$0xff]  }
 0x9e5   :  { %v1658_v24 = vpop.f32.mrf.mxu1  ;;  %v1701_v56 = vpop.f32.mrf.mxu0  ;;  %v4530_v53 = vld [vmem:[#allocation7 + $0x150] ss:$12 sps:$4 sm:$0xff]   ;;  %2105 = vmatprep.subr.bf16.mxu0 %v4532_v52 }
 0x9e6   :  { %v1720_v4 = vadd.f32 %v1716_v57, %v1652_v47  ;;  %v1717_v6 = vmul.f32 %v1713_v59, %v1654_v49  ;;  %v1714_v3 = vmul.f32 %v1710_v62, %v1656_v55  ;;  %v1711_v7 = vmul.f32 0.044715, %v1658_v24  ;;  %2106 = vmatpush1.bf16.msra.mxu0 %v4530_v53  ;;  %v4534_v57 = vld [vmem:[#allocation7 + $0x138] ss:$12 sps:$4 sm:$0xff]   ;;  %v4537_v59 = vld [vmem:[#allocation7 + $0x140] ss:$12 sps:$4 sm:$0xff]  }
 0x9e7   :  { %v1707_v28 = vmul.f32 0.5, %v1658_v24  ;;  %v4538_v62 = vld [vmem:[#allocation7 + $0x120] ss:$12 sps:$4 sm:$0xff]  }
 0x9e8   :  { %v1724_v8 = vmul.f32 0.7978846, %v1720_v4  ;;  %v1721_v9 = vadd.f32 %v1717_v6, %v1654_v49  ;;  %v1718_v11 = vmul.f32 %v1714_v3, %v1656_v55  ;;  %v1715_v12 = vmul.f32 %v1711_v7, %v1658_v24  ;;  %v4544_v4 = vld [vmem:[#allocation7 + $0x10c] ss:$12 sps:$4 sm:$0xff]   ;;  %v4542_v6 = vld [vmem:[#allocation7 + $0x108] ss:$12 sps:$4 sm:$0xff]  }
 0x9e9   :  { %v4545_v3 = vld [vmem:[#allocation7 + $0x110] ss:$12 sps:$4 sm:$0xff]   ;;  %v4548_v7 = vld [vmem:[#allocation7 + $0xf4] ss:$12 sps:$4 sm:$0xff]  }
 0x9ea   :  { %v1725_v14 = vmul.f32 0.7978846, %v1721_v9  ;;  %v1722_v13 = vadd.f32 %v1718_v11, %v1656_v55  ;;  %v1719_v15 = vmul.f32 %v1715_v12, %v1658_v24  ;;  %4670 = vtanh.f32 %v1724_v8  ;;  %v4533_v55 = vld [vmem:[#allocation7 + $0x158] ss:$12 sps:$4 sm:$0xff]   ;;  %v4546_v8 = vld [vmem:[#allocation7 + $0xf0] ss:$12 sps:$4 sm:$0xff]  }
 0x9eb   :  { %v4549_v9 = vld [vmem:[#allocation7 + $0xf8] ss:$12 sps:$4 sm:$0xff]   ;;  %v4552_v11 = vld [vmem:[#allocation7 + $0xdc] ss:$12 sps:$4 sm:$0xff]  }
 0x9ec   :  { %4672 = vtanh.f32 %v1725_v14  ;;  %v1726_v16 = vmul.f32 0.7978846, %v1722_v13  ;;  %v1723_v17 = vadd.f32 %v1719_v15, %v1658_v24  ;;  %v4541_v24 = vld [vmem:[#allocation7 + $0x128] ss:$12 sps:$4 sm:$0xff]   ;;  %v4550_v12 = vld [vmem:[#allocation7 + $0xd8] ss:$12 sps:$4 sm:$0xff]  }
 0x9ed   :  { %v4553_v14 = vld [vmem:[#allocation7 + $0xe0] ss:$12 sps:$4 sm:$0xff]   ;;  %v4556_v13 = vld [vmem:[#allocation7 + $0xc4] ss:$12 sps:$4 sm:$0xff]  }
 0x9ee   :  { %4674 = vtanh.f32 %v1726_v16  ;;  %v1727_v2 = vmul.f32 0.7978846, %v1723_v17  ;;  %v4554_v15 = vld [vmem:[#allocation7 + $0xc0] ss:$12 sps:$4 sm:$0xff]   ;;  %v4557_v16 = vld [vmem:[#allocation7 + $0xc8] ss:$12 sps:$4 sm:$0xff]  }
 0x9f0   :  { %4676 = vtanh.f32 %v1727_v2 }
 0x9f7   :  { %v4671_v19 = vpop.eup %4670 }
 0x9f8   :  { %v1732_v23 = vadd.f32 1.0, %v4671_v19 }
 0x9f9   :  { %v4673_v20 = vpop.eup %4672 }
 0x9fa   :  { %v1733_v22 = vadd.f32 1.0, %v4673_v20  ;;  %v1736_v30 = vmul.f32 %v1732_v23, %v1704_v21 }
 0x9fb   :  { %v4675_v10 = vpop.eup %4674 }
 0x9fc   :  { %v1734_v25 = vadd.f32 1.0, %v4675_v10  ;;  %v1737_v27 = vmul.f32 %v1733_v22, %v1705_v58  ;;  %v1740_v34 = vmul.f32 %v1736_v30, %v1695_v18  ;;  %v3856_v58 = vld [vmem:[%s5491_s2 + $0x1] ss:$0 sm:$0xff] }
 0x9fd   :  { %v4677_v51 = vpop.eup %4676 }
 0x9fe   :  { %v1738_v37 = vmul.f32 %v1734_v25, %v1706_v50  ;;  %v1735_v29 = vadd.f32 1.0, %v4677_v51  ;;  %v1741_v32 = vmul.f32 %v1737_v27, %v1697_v54 }
 0xa00   :  { %v1739_v31 = vmul.f32 %v1735_v29, %v1707_v28  ;;  %v1742_v1 = vmul.f32 %v1738_v37, %v1699_v63 }
 0xa02   :  { %v1743_v33 = vmul.f32 %v1739_v31, %v1701_v56  ;;  %v1744_v35 = vpack.c.bf16 %v1742_v1, %v1740_v34 }
 0xa04   :  { %v1745_v61 = vpack.c.bf16 %v1743_v33, %v1741_v32 }
 0xa06   :  { %1906 = vmatprep.mubr.bf16.mxu1 %v1745_v61 }
 0xa07   :  { %1907 = vmatmul.mubr.bf16.vlgmr.msra.gmra.mxu1 %v1744_v35 }
 0xa08   :  { %4252 = vmatprep.mubr.msk.bf16.mxu1 %vm4902_vm0, %v4900_v0  ;;  %4237 = vmatpush3.bf16.msra.mxu1 %v4529_v38 }
 0xa09   :  { %4238 = vmatprep.subr.bf16.mxu1 %v4900_v0 }
 0xa0c   :  { %4239 = vmatpush3.bf16.msra.mxu1 %v4533_v55 }
 0xa0d   :  { %4240 = vmatprep.subr.bf16.mxu1 %v4900_v0 }
 0xa10   :  { %4241 = vmatpush3.bf16.msra.mxu1 %v4537_v59 }
 0xa11   :  { %4242 = vmatprep.subr.bf16.mxu1 %v4900_v0 }
 0xa14   :  { %4243 = vmatpush3.bf16.msra.mxu1 %v4541_v24 }
 0xa15   :  { %4244 = vmatprep.subr.bf16.mxu1 %v4900_v0 }
 0xa18   :  { %4245 = vmatpush3.bf16.msra.mxu1 %v4545_v3 }
 0xa19   :  { %4246 = vmatprep.subr.bf16.mxu1 %v4900_v0 }
 0xa1c   :  { %4247 = vmatpush3.bf16.msra.mxu1 %v4549_v9 }
 0xa1d   :  { %4248 = vmatprep.subr.bf16.mxu1 %v4900_v0 }
 0xa20   :  { %4249 = vmatpush3.bf16.msra.mxu1 %v4553_v14 }
 0xa21   :  { %4250 = vmatprep.subr.bf16.mxu1 %v4900_v0 }
 0xa24   :  { %4251 = vmatpush3.bf16.msra.mxu1 %v4557_v16 }
 0xa25   :  { %4262 = vmatprep.subr.bf16.mxu1 %v4900_v0 }
 0xac7   :  { %v4022_v39 = vpop.f32.mrf.mxu1 }
 0xac9   :  { %v4023_v40 = vpop.f32.mrf.mxu1 }
 0xaca   :  { %v4024_v41 = vadd.f32 %v4023_v40, %v4022_v39 }
 0xacb   :  { %v4025_v43 = vpop.f32.mrf.mxu1 }
 0xacc   :  { %v5236_v44 = vadd.f32 %v4024_v41, %v5217_v42  ;;  %v4536_v42 = vld [vmem:[#allocation7 + $0x13c] ss:$12 sps:$4 sm:$0xff]  }
 0xacd   :  { %v4026_v5 = vpop.f32.mrf.mxu1  ;;  %2107 = vmatprep.subr.bf16.mxu0 %v4536_v42 }
 0xace   :  { %v4027_v45 = vadd.f32 %v4026_v5, %v4025_v43  ;;  %v1919_v47 = vmul.f32 %v5236_v44, %v5236_v44  ;;  %2108 = vmatpush1.bf16.msra.mxu0 %v4534_v57 }
 0xad0   :  { %v5241_v48 = vadd.f32 %v4027_v45, %v5221_v46  ;;  %1921 = vadd.xlane.f32.xlu0 %v1919_v47  ;;  %v4540_v46 = vld [vmem:[#allocation7 + $0x124] ss:$12 sps:$4 sm:$0xff]  }
 0xad1   :  { %2109 = vmatprep.subr.bf16.mxu0 %v4540_v46  ;;  %v5323_v47 = vld [vmem:[#allocation5] sm:$0xff]  ;;  %v5327_v46 = vld [vmem:[#allocation5 + $0x8] sm:$0xff] }
 0xad2   :  { %v1920_v49 = vmul.f32 %v5241_v48, %v5241_v48  ;;  %2110 = vmatpush1.bf16.msra.mxu0 %v4538_v62 }
 0xad3   :  { %2111 = vmatprep.subr.bf16.mxu0 %v4544_v4 }
 0xad4   :  { %1923 = vadd.xlane.f32.xlu1 %v1920_v49 }
 0xad6   :  { %2112 = vmatpush1.bf16.msra.mxu0 %v4542_v6  ;;  %v5330_v6 = vld [vmem:[#allocation5 + $0x10] sm:$0xff] }
 0xad7   :  { %2113 = vmatprep.subr.bf16.mxu0 %v4548_v7 }
 0xada   :  { %2114 = vmatpush1.bf16.msra.mxu0 %v4546_v8 }
 0xadb   :  { %2115 = vmatprep.subr.bf16.mxu0 %v4552_v11 }
 0xade   :  { %2116 = vmatpush1.bf16.msra.mxu0 %v4550_v12 }
 0xadf   :  { %2117 = vmatprep.subr.bf16.mxu0 %v4556_v13 }
 0xae2   :  { %2118 = vmatpush1.bf16.msra.mxu0 %v4554_v15  ;;  %v5335_v15 = vld [vmem:[#allocation5 + $0x18] sm:$0xff] }
 0xae3   :  { %4256 = vmatprep.subr.bf16.mxu0 %v4900_v0 }
 0xb59   :  { %v1922_v17 = vpop.xlane.xlu0 %1921 }
 0xb5a   :  { %v1925_v2 = vmul.f32 0.0078125, %v1922_v17 }
 0xb5c   :  { %v1927_v18 = vadd.f32 1e-06, %v1925_v2 }
 0xb5d   :  { %v1924_v19 = vpop.xlane.xlu1 %1923 }
 0xb5e   :  { %4678 = vrsqrt.f32 %v1927_v18  ;;  %v1926_v20 = vmul.f32 0.0078125, %v1924_v19 }
 0xb60   :  { %v1928_v54 = vadd.f32 1e-06, %v1926_v20 }
 0xb62   :  { %4680 = vrsqrt.f32 %v1928_v54 }
 0xb6b   :  { %v4679_v22 = vpop.eup %4678 }
 0xb6c   :  { %v1931_v10 = vmul.f32 %v4679_v22, %v5236_v44 }
 0xb6e   :  { %v1939_v25 = vmul.f32 %v3856_v58, %v1931_v10 }
 0xb6f   :  { %v4681_v23 = vpop.eup %4680 }
 0xb70   :  { %v1932_v50 = vmul.f32 %v4681_v23, %v5241_v48 }
 0xb72   :  { %v1940_v51 = vmul.f32 %v3856_v58, %v1932_v50 }
 0xb74   :  { %v1941_v21 = vpack.c.bf16 %v1940_v51, %v1939_v25 }
 0xb76   :  { %2136 = vmatmul.mubr.bf16.vlgmr.msra.gmra.mxu0 %v1941_v21  ;;  %4253 = vmatmul.mubr.bf16.vlgmr.msra.gmra.mxu1 %v1941_v21 }
 0xb77   :  { %4258 = vmatprep.mubr.msk.bf16.mxu0 %vm4902_vm0, %v4900_v0  ;;  %4264 = vmatprep.mubr.msk.bf16.mxu1 %vm4902_vm0, %v4900_v0 }
 0xc36   :  { %v2137_v63 = vpop.f32.mrf.mxu0  ;;  %v2180_v27 = vpop.f32.mrf.mxu1 }
 0xc38   :  { %v2139_v37 = vpop.f32.mrf.mxu0  ;;  %v4254_v28 = vpop.f32.mrf.mxu1 }
 0xc3a   :  { %v2141_v29 = vpop.f32.mrf.mxu0  ;;  %v2183_v30 = vpop.f32.mrf.mxu1 }
 0xc3b   :  { %v5262_v31 = vpack.c.bf16 %v2183_v30, %v2180_v27  ;;  %v5272_v34 = vpack.c.bf16 %v2141_v29, %v2137_v63 }
 0xc3c   :  { %v2143_v1 = vpop.f32.mrf.mxu0  ;;  %v4255_v56 = vpop.f32.mrf.mxu1 }
 0xc3d   :  { %v5264_v32 = vpack.c.bf16 %v2143_v1, %v2139_v37  ;;  %v2447_v43 = vsel %vm652_vm2, %v5262_v31, 0 }
 0xc3f   :  { %2200 = vrot.lane.b32.xlu1 %v5264_v32, %s4890_s19  ;;  %2198 = vrot.lane.b32.xlu0 %v5264_v32, %s4903_s20  ;;  %v2215_v33 = vsel %vm415_vm1, %v5264_v32, 0 }
 0xc40   :  { %4257 = vmatpush3.bf16.xpose.msra.mxu0 %v2215_v33 }
 0xc41   :  { %4268 = vmatprep.subr.bf16.mxu0 %v4900_v0 }
 0xc43   :  { %2191 = vrot.lane.b32.xlu1 %v5272_v34, %s4903_s20  ;;  %2202 = vrot.lane.b32.xlu0 %v5264_v32, %s4904_s1 }
 0xc47   :  { %2193 = vrot.lane.b32.xlu1 %v5272_v34, %s4890_s19  ;;  %2195 = vrot.lane.b32.xlu0 %v5272_v34, %s4904_s1 }
 0xc48   :  { %4259 = vmatmul.mubr.msk.bf16.vlgmr.msra.gmra.mxu0 %vm415_vm1, %v5272_v34 }
 0xc49   :  { %4270 = vmatprep.mubr.msk.bf16.mxu0 %vm4902_vm0, %v4900_v0 }
 0xcb1   :  { %v5287_v61 = vpop.permute.xlu1 %2200  ;;  %v5289_v35 = vpop.permute.xlu0 %2198 }
 0xcb2   :  { %v2307_v60 = vsel %vm415_vm1, %v5287_v61, 0  ;;  %v2261_v36 = vsel %vm415_vm1, %v5289_v35, 0 }
 0xcb3   :  { %4263 = vmatpush3.bf16.xpose.msra.mxu1 %v2261_v36  ;;  %4269 = vmatpush3.bf16.xpose.msra.mxu0 %v2307_v60 }
 0xcb4   :  { %4274 = vmatprep.subr.bf16.mxu1 %v4900_v0  ;;  %4280 = vmatprep.subr.bf16.mxu0 %v4900_v0 }
 0xcb5   :  { %v5297_v38 = vpop.permute.xlu1 %2191  ;;  %v5299_v39 = vpop.permute.xlu0 %2202 }
 0xcb6   :  { %v2353_v41 = vsel %vm415_vm1, %v5299_v39, 0 }
 0xcb9   :  { %v5301_v40 = vpop.permute.xlu1 %2193  ;;  %v5317_v5 = vpop.permute.xlu0 %2195 }
 0xcba   :  { %4265 = vmatmul.mubr.msk.bf16.vlgmr.msra.gmra.mxu1 %vm415_vm1, %v5297_v38  ;;  %4271 = vmatmul.mubr.msk.bf16.vlgmr.msra.gmra.mxu0 %vm415_vm1, %v5301_v40 }
 0xcbb   :  { %4275 = vmatpush3.bf16.xpose.msra.mxu1 %v2353_v41  ;;  %4281 = vmatpush3.bf16.msra.mxu0 %v2447_v43 }
 0xcbc   :  { %4276 = vmatprep.mubr.msk.bf16.mxu1 %vm4902_vm0, %v4900_v0  ;;  %4282 = vmatprep.mubr.msk.bf16.mxu0 %vm4902_vm0, %v4900_v0 }
 0xcbd   :  { %4292 = vmatprep.subr.bf16.mxu0 %v4900_v0  ;;  %4286 = vmatprep.subr.bf16.mxu1 %v4900_v0 }
 0xcc2   :  { %4277 = vmatmul.mubr.msk.bf16.vlgmr.msra.gmra.mxu1 %vm415_vm1, %v5317_v5 }
 0xcc3   :  { %4288 = vmatprep.mubr.msk.bf16.mxu1 %vm4902_vm0, %v4900_v0 }
 0xd08   :  { %v2251_v45 = vpop.f32.mrf.mxu0 }
 0xd09   :  { %v2252_v49 = vadd.f32 %v5323_v47, %v2251_v45 }
 0xd0a   :  { %v4260_v52 = vpop.f32.mrf.mxu0 }
 0xd0b   :  { %v2395_v53 = vsel %vm600_vm3, %v2252_v49, -inf }
 0xd0c   :  { %2396 = vmax.xlane.f32.xlu1 %v2395_v53  ;;  %v2254_v55 = vpop.f32.mrf.mxu0 }
 0xd0e   :  { %v4261_v42 = vpop.f32.mrf.mxu0 }
 0xd7a   :  { %v2297_v57 = vpop.f32.mrf.mxu1  ;;  %v2343_v59 = vpop.f32.mrf.mxu0 }
 0xd7b   :  { %v2298_v62 = vadd.f32 %v5327_v46, %v2297_v57  ;;  %v2344_v3 = vadd.f32 %v5330_v6, %v2343_v59 }
 0xd7c   :  { %v4266_v24 = vpop.f32.mrf.mxu1  ;;  %v4272_v4 = vpop.f32.mrf.mxu0 }
 0xd7d   :  { %v2398_v7 = vsel %vm600_vm3, %v2298_v62, -inf  ;;  %v2401_v14 = vsel %vm600_vm3, %v2344_v3, -inf }
 0xd7e   :  { %2399 = vmax.xlane.f32.xlu0 %v2398_v7  ;;  %v2300_v8 = vpop.f32.mrf.mxu1  ;;  %v2346_v9 = vpop.f32.mrf.mxu0  ;;  %v2643_v7 = vrot.slane %v5264_v32, 4 }
 0xd80   :  { %v4267_v11 = vpop.f32.mrf.mxu1  ;;  %v4273_v12 = vpop.f32.mrf.mxu0  ;;  %v2648_v9 = vsel %vm415_vm1, %v2643_v7, 0 }
 0xd81   :  { %v2739_v11 = vrot.slane %v5287_v61, 4  ;;  %v2642_v12 = vrot.slane %v5272_v34, 4 }
 0xd82   :  { %v2389_v13 = vpop.f32.mrf.mxu1  ;;  %2402 = vmax.xlane.f32.xlu0 %v2401_v14  ;;  %v2882_v14 = vrot.slane %v5262_v31, 4 }
 0xd83   :  { %v2390_v16 = vadd.f32 %v5335_v15, %v2389_v13  ;;  %v2744_v32 = vsel %vm415_vm1, %v2739_v11, 0  ;;  %v2738_v13 = vrot.slane %v5301_v40, 4  ;;  %v2691_v40 = vrot.slane %v5289_v35, 4 }
 0xd84   :  { %v4278_v17 = vpop.f32.mrf.mxu1  ;;  %v2887_v61 = vsel %vm652_vm2, %v2882_v14, 0 }
 0xd85   :  { %v2404_v2 = vsel %vm600_vm3, %v2390_v16, -inf }
 0xd86   :  { %v2392_v18 = vpop.f32.mrf.mxu1  ;;  %2405 = vmax.xlane.f32.xlu1 %v2404_v2 }
 0xd88   :  { %v4279_v19 = vpop.f32.mrf.mxu1 }
 0xd89   :  { %v2696_v19 = vsel %vm415_vm1, %v2691_v40, 0 }
 0xd95   :  { %v2397_v20 = vpop.xlane.xlu1 %2396 }
 0xd96   :  { %v2407_v54 = vsub.f32 %v2252_v49, %v2397_v20  ;;  %v2787_v20 = vrot.slane %v5299_v39, 4 }
 0xd98   :  { %v2411_v22 = vmul.f32 1.442695, %v2407_v54  ;;  %v2690_v54 = vrot.slane %v5297_v38, 4  ;;  %v2792_v35 = vsel %vm415_vm1, %v2787_v20, 0 }
 0xd9a   :  { %4682 = vpow2.f32 %v2411_v22 }
 0xda7   :  { %v4683_v10 = vpop.eup %4682 }
 0xda8   :  { %v2419_v23 = vsel %vm600_vm3, %v4683_v10, 0.0 }
 0xda9   :  { %2420 = vadd.xlane.f32.xlu0 %v2419_v23 }
 0xe07   :  { %v2400_v58 = vpop.xlane.xlu0 %2399 }
 0xe08   :  { %v2408_v50 = vsub.f32 %v2298_v62, %v2400_v58 }
 0xe0a   :  { %v2413_v25 = vmul.f32 1.442695, %v2408_v50 }
 0xe0b   :  { %v2403_v51 = vpop.xlane.xlu0 %2402 }
 0xe0c   :  { %4684 = vpow2.f32 %v2413_v25  ;;  %v2409_v21 = vsub.f32 %v2344_v3, %v2403_v51 }
 0xe0e   :  { %v2415_v63 = vmul.f32 1.442695, %v2409_v21 }
 0xe0f   :  { %v2406_v1 = vpop.xlane.xlu1 %2405 }
 0xe10   :  { %4686 = vpow2.f32 %v2415_v63  ;;  %v2410_v56 = vsub.f32 %v2390_v16, %v2406_v1 }
 0xe12   :  { %v2417_v33 = vmul.f32 1.442695, %v2410_v56 }
 0xe19   :  { %v4685_v27 = vpop.eup %4684 }
 0xe1a   :  { %v2422_v37 = vsel %vm600_vm3, %v4685_v27, 0.0 }
 0xe1b   :  { %2423 = vadd.xlane.f32.xlu1 %v2422_v37 }
 0xe1d   :  { %v4687_v28 = vpop.eup %4686 }
 0xe1e   :  { %v2425_v29 = vsel %vm600_vm3, %v4687_v28, 0.0 }
 0xe1f   :  { %2426 = vadd.xlane.f32.xlu0 %v2425_v29 }
 0xe2c   :  { %2207 = vrot.lane.b32.xlu1 %v5262_v31, %s4890_s19 }
 0xe32   :  { %v2421_v30 = vpop.xlane.xlu0 %2420 }
 0xe33   :  { %4688 = vrcp.f32 %v2421_v30 }
 0xe34   :  { %4690 = vpow2.f32 %v2417_v33 }
 0xe35   :  { %2205 = vrot.lane.b32.xlu0 %v5262_v31, %s4903_s20 }
 0xe40   :  { %v4689_v60 = vpop.eup %4688 }
 0xe41   :  { %v2435_v36 = vmul.f32 %v4689_v60, %v4683_v10  ;;  %v4691_v43 = vpop.eup %4690  ;;  %v2786_v10 = vrot.slane %v5317_v5, 4 }
 0xe42   :  { %v2428_v45 = vsel %vm600_vm3, %v4691_v43, 0.0 }
 0xe43   :  { %v2439_v41 = vpack.c.bf16 %v2435_v36, %v2435_v36 }
 0xe45   :  { %4283 = vmatmul.mubr.msk.bf16.vlgmr.msra.gmra.mxu0 %vm600_vm3, %v2439_v41 }
 0xe46   :  { %4294 = vmatprep.mubr.msk.bf16.mxu0 %vm4902_vm0, %v4900_v0 }
 0xe50   :  { %2429 = vadd.xlane.f32.xlu1 %v2428_v45 }
 0xe61   :  { %2209 = vrot.lane.b32.xlu1 %v5262_v31, %s4904_s1 }
 0xea4   :  { %v2424_v49 = vpop.xlane.xlu1 %2423 }
 0xea5   :  { %4692 = vrcp.f32 %v2424_v49 }
 0xea8   :  { %v5352_v52 = vpop.permute.xlu1 %2207  ;;  %v2427_v53 = vpop.xlane.xlu0 %2426 }
 0xea9   :  { %v2539_v55 = vsel %vm652_vm2, %v5352_v52, 0  ;;  %4694 = vrcp.f32 %v2427_v53 }
 0xeaa   :  { %4293 = vmatpush3.bf16.msra.mxu0 %v2539_v55 }
 0xeab   :  { %4304 = vmatprep.subr.bf16.mxu0 %v4900_v0 }
 0xeac   :  { %v2206_v42 = vpop.permute.xlu0 %2205 }
 0xead   :  { %v2493_v57 = vsel %vm652_vm2, %v2206_v42, 0  ;;  %v2929_v22 = vrot.slane %v2206_v42, 4 }
 0xeae   :  { %4287 = vmatpush3.bf16.msra.mxu1 %v2493_v57 }
 0xeaf   :  { %4298 = vmatprep.subr.bf16.mxu1 %v4900_v0  ;;  %v2934_v23 = vsel %vm652_vm2, %v2929_v22, 0 }
 0xeb2   :  { %v4693_v59 = vpop.eup %4692 }
 0xeb3   :  { %v2436_v62 = vmul.f32 %v4693_v59, %v4685_v27 }
 0xeb5   :  { %v2440_v24 = vpack.c.bf16 %v2436_v62, %v2436_v62 }
 0xeb6   :  { %v4695_v4 = vpop.eup %4694 }
 0xeb7   :  { %4289 = vmatmul.mubr.msk.bf16.vlgmr.msra.gmra.mxu1 %vm600_vm3, %v2440_v24  ;;  %v2437_v3 = vmul.f32 %v4695_v4, %v4687_v28 }
 0xeb8   :  { %4300 = vmatprep.mubr.msk.bf16.mxu1 %vm4902_vm0, %v4900_v0 }
 0xeb9   :  { %v2441_v8 = vpack.c.bf16 %v2437_v3, %v2437_v3 }
 0xebb   :  { %4295 = vmatmul.mubr.msk.bf16.vlgmr.msra.gmra.mxu0 %vm600_vm3, %v2441_v8 }
 0xebc   :  { %4305 = vmatpush3.bf16.xpose.msra.mxu0 %v2648_v9  ;;  %4306 = vmatprep.mubr.msk.bf16.mxu0 %vm4902_vm0, %v4900_v0 }
 0xebd   :  { %4316 = vmatprep.subr.bf16.mxu0 %v4900_v0 }
 0xec3   :  { %4307 = vmatmul.mubr.msk.bf16.vlgmr.msra.gmra.mxu0 %vm415_vm1, %v2642_v12 }
 0xec4   :  { %4317 = vmatpush3.bf16.xpose.msra.mxu0 %v2744_v32  ;;  %4318 = vmatprep.mubr.msk.bf16.mxu0 %vm4902_vm0, %v4900_v0 }
 0xec5   :  { %4328 = vmatprep.subr.bf16.mxu0 %v4900_v0 }
 0xecb   :  { %4319 = vmatmul.mubr.msk.bf16.vlgmr.msra.gmra.mxu0 %vm415_vm1, %v2738_v13 }
 0xecc   :  { %4329 = vmatpush3.bf16.msra.mxu0 %v2887_v61  ;;  %4330 = vmatprep.mubr.msk.bf16.mxu0 %vm4902_vm0, %v4900_v0 }
 0xecd   :  { %4340 = vmatprep.subr.bf16.mxu0 %v4900_v0 }
 0xed9   :  { %v2430_v34 = vpop.xlane.xlu1 %2429 }
 0xeda   :  { %4696 = vrcp.f32 %v2430_v34 }
 0xedd   :  { %v5382_v16 = vpop.permute.xlu1 %2209 }
 0xede   :  { %v2585_v17 = vsel %vm652_vm2, %v5382_v16, 0 }
 0xedf   :  { %4299 = vmatpush3.bf16.msra.mxu1 %v2585_v17 }
 0xee0   :  { %4310 = vmatprep.subr.bf16.mxu1 %v4900_v0 }
 0xee7   :  { %v4697_v31 = vpop.eup %4696 }
 0xee8   :  { %v2438_v2 = vmul.f32 %v4697_v31, %v4691_v43 }
 0xeea   :  { %v2442_v18 = vpack.c.bf16 %v2438_v2, %v2438_v2 }
 0xeec   :  { %4301 = vmatmul.mubr.msk.bf16.vlgmr.msra.gmra.mxu1 %vm600_vm3, %v2442_v18 }
 0xeed   :  { %4311 = vmatpush3.bf16.xpose.msra.mxu1 %v2696_v19  ;;  %4312 = vmatprep.mubr.msk.bf16.mxu1 %vm4902_vm0, %v4900_v0 }
 0xeee   :  { %4322 = vmatprep.subr.bf16.mxu1 %v4900_v0 }
 0xef4   :  { %4313 = vmatmul.mubr.msk.bf16.vlgmr.msra.gmra.mxu1 %vm415_vm1, %v2690_v54 }
 0xef5   :  { %4323 = vmatpush3.bf16.xpose.msra.mxu1 %v2792_v35  ;;  %4324 = vmatprep.mubr.msk.bf16.mxu1 %vm4902_vm0, %v4900_v0 }
 0xef6   :  { %4334 = vmatprep.subr.bf16.mxu1 %v4900_v0 }
 0xefc   :  { %4325 = vmatmul.mubr.msk.bf16.vlgmr.msra.gmra.mxu1 %vm415_vm1, %v2786_v10 }
 0xefd   :  { %4335 = vmatpush3.bf16.msra.mxu1 %v2934_v23  ;;  %4336 = vmatprep.mubr.msk.bf16.mxu1 %vm4902_vm0, %v4900_v0 }
 0xefe   :  { %4346 = vmatprep.subr.bf16.mxu1 %v4900_v0 }
 0xf05   :  { %v5406_v38 = vpop.f32.mrf.mxu0 }
 0xf07   :  { %v4284_v39 = vpop.f32.mrf.mxu0 }
 0xf09   :  { %v2486_v58 = vpop.f32.mrf.mxu0 }
 0xf0b   :  { %v4285_v50 = vpop.f32.mrf.mxu0 }
 0xf77   :  { %v5408_v25 = vpop.f32.mrf.mxu1 }
 0xf79   :  { %v4290_v51 = vpop.f32.mrf.mxu1 }
 0xf7b   :  { %v2532_v21 = vpop.f32.mrf.mxu1  ;;  %v5410_v5 = vpop.f32.mrf.mxu0 }
 0xf7d   :  { %v4291_v63 = vpop.f32.mrf.mxu1  ;;  %v4296_v27 = vpop.f32.mrf.mxu0 }
 0xf7e   :  { %v2976_v63 = vrot.slane %v5352_v52, 4 }
 0xf7f   :  { %v2578_v37 = vpop.f32.mrf.mxu0 }
 0xf81   :  { %v4297_v28 = vpop.f32.mrf.mxu0 }
 0xf82   :  { %v2981_v28 = vsel %vm652_vm2, %v2976_v63, 0  ;;  %v4568_v63 = vld [vmem:[#allocation10 + $0x1e4] ss:$16 sps:$4 sm:$0xff]  }
 0xf83   :  { %v2684_v29 = vpop.f32.mrf.mxu0 }
 0xf84   :  { %v2685_v30 = vadd.f32 %v5323_v47, %v2684_v29 }
 0xf85   :  { %v4308_v1 = vpop.f32.mrf.mxu0 }
 0xf86   :  { %v2834_v56 = vsel %vm600_vm3, %v2685_v30, -inf }
 0xf87   :  { %2835 = vmax.xlane.f32.xlu0 %v2834_v56  ;;  %v2687_v33 = vpop.f32.mrf.mxu0 }
 0xf89   :  { %v4309_v60 = vpop.f32.mrf.mxu0 }
 0xf8a   :  { %v3023_v60 = vrot.slane %v5382_v16, 4  ;;  %v4559_v16 = vld [vmem:[#allocation8 + $0x70] sm:$0xff]  }
 0xf8b   :  { %v2780_v36 = vpop.f32.mrf.mxu0 }
 0xf8c   :  { %v2781_v41 = vadd.f32 %v5330_v6, %v2780_v36 }
 0xf8d   :  { %v4320_v43 = vpop.f32.mrf.mxu0 }
 0xf8e   :  { %v2840_v45 = vsel %vm600_vm3, %v2781_v41, -inf  ;;  %v3028_v43 = vsel %vm652_vm2, %v3023_v60, 0  ;;  %v4574_v60 = vld [vmem:[#allocation10 + $0x1c4] ss:$16 sps:$4 sm:$0xff]  }
 0xf8f   :  { %2841 = vmax.xlane.f32.xlu0 %v2840_v45  ;;  %v2783_v49 = vpop.f32.mrf.mxu0 }
 0xf91   :  { %v4321_v53 = vpop.f32.mrf.mxu0 }
 0xfac   :  { %v5416_v55 = vpop.f32.mrf.mxu1 }
 0xfae   :  { %v4302_v42 = vpop.f32.mrf.mxu1 }
 0xfaf   :  { %v4558_v42 = vld [vmem:[#allocation8 + $0x78] sm:$0xff]  }
 0xfb0   :  { %v2624_v57 = vpop.f32.mrf.mxu1 }
 0xfb2   :  { %v4303_v47 = vpop.f32.mrf.mxu1 }
 0xfb4   :  { %v2732_v59 = vpop.f32.mrf.mxu1 }
 0xfb5   :  { %v2733_v62 = vadd.f32 %v5327_v46, %v2732_v59 }
 0xfb6   :  { %v4314_v24 = vpop.f32.mrf.mxu1 }
 0xfb7   :  { %v2837_v4 = vsel %vm600_vm3, %v2733_v62, -inf }
 0xfb8   :  { %2838 = vmax.xlane.f32.xlu1 %v2837_v4  ;;  %v2735_v3 = vpop.f32.mrf.mxu1 }
 0xfb9   :  { %v4561_v3 = vld [vmem:[#allocation8 + $0x60] sm:$0xff]  }
 0xfba   :  { %v4315_v6 = vpop.f32.mrf.mxu1 }
 0xfbc   :  { %v2828_v7 = vpop.f32.mrf.mxu1 }
 0xfbd   :  { %v2829_v8 = vadd.f32 %v5335_v15, %v2828_v7 }
 0xfbe   :  { %v4326_v9 = vpop.f32.mrf.mxu1 }
 0xfbf   :  { %v2843_v11 = vsel %vm600_vm3, %v2829_v8, -inf  ;;  %v4562_v9 = vld [vmem:[#allocation8 + $0x58] sm:$0xff]  }
 0xfc0   :  { %v2831_v12 = vpop.f32.mrf.mxu1  ;;  %2844 = vmax.xlane.f32.xlu0 %v2843_v11 }
 0xfc1   :  { %v4563_v12 = vld [vmem:[#allocation8 + $0x50] sm:$0xff]  }
 0xfc2   :  { %v4327_v32 = vpop.f32.mrf.mxu1 }
 0xfc3   :  { %v4564_v32 = vld [vmem:[#allocation8 + $0x48] sm:$0xff]  }
0x1010   :  { %v2836_v14 = vpop.xlane.xlu0 %2835 }
0x1011   :  { %v2846_v13 = vsub.f32 %v2685_v30, %v2836_v14 }
0x1013   :  { %v2850_v61 = vmul.f32 1.442695, %v2846_v13 }
0x1015   :  { %4698 = vpow2.f32 %v2850_v61 }
0x1018   :  { %v2842_v46 = vpop.xlane.xlu0 %2841 }
0x1019   :  { %v2848_v34 = vsub.f32 %v2781_v41, %v2842_v46 }
0x101b   :  { %v2854_v17 = vmul.f32 1.442695, %v2848_v34 }
0x101d   :  { %4700 = vpow2.f32 %v2854_v17 }
0x1022   :  { %v4699_v31 = vpop.eup %4698 }
0x1023   :  { %v2858_v40 = vsel %vm600_vm3, %v4699_v31, 0.0 }
0x1024   :  { %2859 = vadd.xlane.f32.xlu1 %v2858_v40 }
0x102a   :  { %v4701_v2 = vpop.eup %4700 }
0x102b   :  { %v2864_v15 = vsel %vm600_vm3, %v4701_v2, 0.0 }
0x102c   :  { %2865 = vadd.xlane.f32.xlu1 %v2864_v15 }
0x1041   :  { %v2839_v18 = vpop.xlane.xlu1 %2838 }
0x1042   :  { %v2847_v19 = vsub.f32 %v2733_v62, %v2839_v18  ;;  %v4560_v62 = vld [vmem:[#allocation8 + $0x68] sm:$0xff]  }
0x1044   :  { %v2852_v20 = vmul.f32 1.442695, %v2847_v19 }
0x1046   :  { %4702 = vpow2.f32 %v2852_v20 }
0x1049   :  { %v2845_v54 = vpop.xlane.xlu0 %2844 }
0x104a   :  { %v2849_v35 = vsub.f32 %v2829_v8, %v2845_v54 }
0x104c   :  { %v2856_v22 = vmul.f32 1.442695, %v2849_v35 }
0x104e   :  { %4704 = vpow2.f32 %v2856_v22 }
0x1053   :  { %v4703_v10 = vpop.eup %4702 }
0x1054   :  { %v2861_v23 = vsel %vm600_vm3, %v4703_v10, 0.0 }
0x1055   :  { %2862 = vadd.xlane.f32.xlu0 %v2861_v23 }
0x105b   :  { %v4705_v39 = vpop.eup %4704 }
0x105c   :  { %v2867_v58 = vsel %vm600_vm3, %v4705_v39, 0.0 }
0x105d   :  { %2868 = vadd.xlane.f32.xlu0 %v2867_v58 }
0x10ad   :  { %v2860_v50 = vpop.xlane.xlu1 %2859 }
0x10ae   :  { %4706 = vrcp.f32 %v2860_v50 }
0x10b5   :  { %v2866_v51 = vpop.xlane.xlu1 %2865 }
0x10b6   :  { %4708 = vrcp.f32 %v2866_v51 }
0x10bb   :  { %v4707_v21 = vpop.eup %4706 }
0x10bc   :  { %v2874_v27 = vmul.f32 %v4707_v21, %v4699_v31 }
0x10be   :  { %v2878_v37 = vpack.c.bf16 %v2874_v27, %v2874_v27  ;;  %v4569_v27 = vld [vmem:[#allocation10 + $0x1e8] ss:$16 sps:$4 sm:$0xff]  }
0x10c0   :  { %4331 = vmatmul.mubr.msk.bf16.vlgmr.msra.gmra.mxu0 %vm600_vm3, %v2878_v37  ;;  %v4571_v37 = vld [vmem:[#allocation10 + $0x1ec] ss:$16 sps:$4 sm:$0xff]  }
0x10c1   :  { %4341 = vmatpush3.bf16.msra.mxu0 %v2981_v28  ;;  %4342 = vmatprep.mubr.msk.bf16.mxu0 %vm4902_vm0, %v4900_v0 }
0x10c2   :  { %4352 = vmatprep.subr.bf16.mxu0 %v4900_v0 }
0x10c3   :  { %v4709_v29 = vpop.eup %4708 }
0x10c4   :  { %v2876_v30 = vmul.f32 %v4709_v29, %v4701_v2 }
0x10c6   :  { %v2880_v1 = vpack.c.bf16 %v2876_v30, %v2876_v30 }
0x10c8   :  { %4343 = vmatmul.mubr.msk.bf16.vlgmr.msra.gmra.mxu0 %vm600_vm3, %v2880_v1 }
0x10c9   :  { %4368 = vmatprep.mubr.msk.bf16.mxu0 %vm4902_vm0, %v4900_v0  ;;  %4353 = vmatpush3.bf16.msra.mxu0 %v4558_v42  ;;  %v4589_v42 = vld [vmem:[#allocation10 + $0x18c] ss:$16 sps:$4 sm:$0xff]  }
0x10ca   :  { %4354 = vmatprep.subr.bf16.mxu0 %v4900_v0 }
0x10cd   :  { %4355 = vmatpush3.bf16.msra.mxu0 %v4559_v16  ;;  %v4587_v16 = vld [vmem:[#allocation10 + $0x188] ss:$16 sps:$4 sm:$0xff]  }
0x10ce   :  { %4356 = vmatprep.subr.bf16.mxu0 %v4900_v0 }
0x10d1   :  { %4357 = vmatpush3.bf16.msra.mxu0 %v4560_v62  ;;  %v4590_v62 = vld [vmem:[#allocation10 + $0x160] ss:$16 sps:$4 sm:$0xff]  }
0x10d2   :  { %4358 = vmatprep.subr.bf16.mxu0 %v4900_v0 }
0x10d5   :  { %4359 = vmatpush3.bf16.msra.mxu0 %v4561_v3  ;;  %v4601_v3 = vld [vmem:[#allocation10 + $0x14c] ss:$16 sps:$4 sm:$0xff]  }
0x10d6   :  { %4360 = vmatprep.subr.bf16.mxu0 %v4900_v0 }
0x10d9   :  { %4361 = vmatpush3.bf16.msra.mxu0 %v4562_v9  ;;  %v4607_v9 = vld [vmem:[#allocation10 + $0x12c] ss:$16 sps:$4 sm:$0xff]  }
0x10da   :  { %4362 = vmatprep.subr.bf16.mxu0 %v4900_v0 }
0x10dd   :  { %4363 = vmatpush3.bf16.msra.mxu0 %v4563_v12  ;;  %v4605_v12 = vld [vmem:[#allocation10 + $0x128] ss:$16 sps:$4 sm:$0xff]  }
0x10de   :  { %v2863_v52 = vpop.xlane.xlu0 %2862  ;;  %4364 = vmatprep.subr.bf16.mxu0 %v4900_v0 }
0x10df   :  { %4710 = vrcp.f32 %v2863_v52 }
0x10e1   :  { %4365 = vmatpush3.bf16.msra.mxu0 %v4564_v32  ;;  %v4610_v32 = vld [vmem:[#allocation10 + $0x104] ss:$16 sps:$4 sm:$0xff]  }
0x10e2   :  { %4366 = vmatprep.subr.bf16.mxu0 %v4900_v0 }
0x10e6   :  { %v2869_v56 = vpop.xlane.xlu0 %2868 }
0x10e7   :  { %4712 = vrcp.f32 %v2869_v56 }
0x10ec   :  { %v4711_v33 = vpop.eup %4710 }
0x10ed   :  { %v2875_v36 = vmul.f32 %v4711_v33, %v4703_v10 }
0x10ef   :  { %v2879_v41 = vpack.c.bf16 %v2875_v36, %v2875_v36  ;;  %v4577_v36 = vld [vmem:[#allocation10 + $0x1cc] ss:$16 sps:$4 sm:$0xff]  }
0x10f1   :  { %4337 = vmatmul.mubr.msk.bf16.vlgmr.msra.gmra.mxu1 %vm600_vm3, %v2879_v41  ;;  %v4572_v41 = vld [vmem:[#allocation10 + $0x1c0] ss:$16 sps:$4 sm:$0xff]  }
0x10f2   :  { %4347 = vmatpush3.bf16.msra.mxu1 %v3028_v43  ;;  %4348 = vmatprep.mubr.msk.bf16.mxu1 %vm4902_vm0, %v4900_v0  ;;  %v4575_v43 = vld [vmem:[#allocation10 + $0x1c8] ss:$16 sps:$4 sm:$0xff]  }
0x10f3   :  { %3412 = vmatprep.subr.bf16.mxu1 %v4568_v63  ;;  %v4625_v63 = vld [vmem:[#allocation11 + $0x90] sm:$0xff]  }
0x10f4   :  { %v4713_v45 = vpop.eup %4712 }
0x10f5   :  { %v2877_v49 = vmul.f32 %v4713_v45, %v4705_v39  ;;  %v4583_v45 = vld [vmem:[#allocation10 + $0x1ac] ss:$16 sps:$4 sm:$0xff]  }
0x10f7   :  { %v2881_v53 = vpack.c.bf16 %v2877_v49, %v2877_v49  ;;  %v4578_v49 = vld [vmem:[#allocation10 + $0x1a0] ss:$16 sps:$4 sm:$0xff]  }
0x10f9   :  { %4349 = vmatmul.mubr.msk.bf16.vlgmr.msra.gmra.mxu1 %vm600_vm3, %v2881_v53  ;;  %v4581_v53 = vld [vmem:[#allocation10 + $0x1a8] ss:$16 sps:$4 sm:$0xff]  }
0x10fa   :  { %3444 = vmatprep.mubr.bf16.mxu1 %v4901_v26 }
0x1180   :  { %v2923_v57 = vpop.f32.mrf.mxu0 }
0x1182   :  { %v4332_v47 = vpop.f32.mrf.mxu0 }
0x1183   :  { %v4592_v47 = vld [vmem:[#allocation10 + $0x164] ss:$16 sps:$4 sm:$0xff]  }
0x1184   :  { %v2926_v59 = vpop.f32.mrf.mxu0 }
0x1185   :  { %v4595_v59 = vld [vmem:[#allocation10 + $0x16c] ss:$16 sps:$4 sm:$0xff]  }
0x1186   :  { %v4333_v24 = vpop.f32.mrf.mxu0 }
0x1187   :  { %v4593_v24 = vld [vmem:[#allocation10 + $0x168] ss:$16 sps:$4 sm:$0xff]  }
0x1188   :  { %v3017_v4 = vpop.f32.mrf.mxu0 }
0x1189   :  { %v4412_v6 = vpack.i.bf16 %v3017_v4, %v5410_v5  ;;  %v4565_v5 = vld [vmem:[#allocation8 + $0x40] sm:$0xff]  }
0x118a   :  { %v4344_v7 = vpop.f32.mrf.mxu0  ;;  %4367 = vmatpush3.bf16.msra.mxu0 %v4565_v5  ;;  %v4598_v4 = vld [vmem:[#allocation10 + $0x144] ss:$16 sps:$4 sm:$0xff]   ;;  %v4613_v5 = vld [vmem:[#allocation10 + $0x10c] ss:$16 sps:$4 sm:$0xff]  }
0x118b   :  { %4413 = vrot.lane.b32.xlu0 %v4412_v6, %s4890_s19  ;;  %3455 = vmatprep.subr.bf16.mxu0 %v4571_v37  ;;  %v4596_v6 = vld [vmem:[#allocation10 + $0x140] ss:$16 sps:$4 sm:$0xff]   ;;  %v4599_v7 = vld [vmem:[#allocation10 + $0x148] ss:$16 sps:$4 sm:$0xff]  }
0x118c   :  { %v3020_v8 = vpop.f32.mrf.mxu0  ;;  %v4627_v37 = vld [vmem:[#allocation11 + $0x88] sm:$0xff]  }
0x118d   :  { %v4604_v8 = vld [vmem:[#allocation10 + $0x124] ss:$16 sps:$4 sm:$0xff]  }
0x118e   :  { %v4345_v11 = vpop.f32.mrf.mxu0 }
0x118f   :  { %v4602_v11 = vld [vmem:[#allocation10 + $0x120] ss:$16 sps:$4 sm:$0xff]  }
0x11b1   :  { %v2970_v14 = vpop.f32.mrf.mxu1 }
0x11b2   :  { %v4407_v13 = vpack.i.bf16 %v2970_v14, %v5408_v25  ;;  %v4608_v14 = vld [vmem:[#allocation10 + $0x100] ss:$16 sps:$4 sm:$0xff]  }
0x11b3   :  { %v4338_v61 = vpop.f32.mrf.mxu1 }
0x11b4   :  { %4408 = vrot.lane.b32.xlu1 %v4407_v13, %s4904_s1  ;;  %v4611_v13 = vld [vmem:[#allocation10 + $0x108] ss:$16 sps:$4 sm:$0xff]  }
0x11b5   :  { %v2973_v46 = vpop.f32.mrf.mxu1 }
0x11b7   :  { %v4339_v34 = vpop.f32.mrf.mxu1 }
0x11b9   :  { %v3064_v17 = vpop.f32.mrf.mxu1 }
0x11ba   :  { %v4417_v31 = vpack.i.bf16 %v3064_v17, %v5416_v55 }
0x11bb   :  { %v4350_v40 = vpop.f32.mrf.mxu1 }
0x11bc   :  { %4418 = vrot.lane.b32.xlu1 %v4417_v31, %s4903_s20 }
0x11bd   :  { %v3067_v2 = vpop.f32.mrf.mxu1 }
0x11bf   :  { %v4351_v15 = vpop.f32.mrf.mxu1 }
0x11fd   :  { %v4414_v20 = vpop.permute.xlu0 %4413 }
0x11fe   :  { %v4416_v35 = vunpack.i.h.bf16 %v4414_v20  ;;  %v4415_v22 = vunpack.i.l.bf16 %v4414_v20 }
0x1226   :  { %v4409_v18 = vpop.permute.xlu1 %4408 }
0x1227   :  { %v4411_v0 = vunpack.i.h.bf16 %v4409_v18  ;;  %v4410_v19 = vunpack.i.l.bf16 %v4409_v18 }
0x1229   :  { %v2639_v25 = vsel %vm415_vm1, %v5406_v38, %v4410_v19  ;;  %v3082_v54 = vsel %vm415_vm1, %v2923_v57, %v4411_v0  ;;  %v4566_v38 = vld [vmem:[#allocation10 + $0x1e0] ss:$16 sps:$4 sm:$0xff]  }
0x122a   :  { %v2640_v55 = vsel %vm847_vm4, %v2639_v25, %v4415_v22  ;;  %v3083_v58 = vsel %vm847_vm4, %v3082_v54, %v4416_v35  ;;  %3413 = vmatpush1.bf16.msra.mxu1 %v4566_v38  ;;  %v4584_v57 = vld [vmem:[#allocation10 + $0x180] ss:$16 sps:$4 sm:$0xff]   ;;  %v4614_v35 = vld [vmem:[#allocation11 + $0xf8] sm:$0xff]  }
0x122b   :  { %3414 = vmatprep.subr.bf16.mxu1 %v4574_v60  ;;  %v3906_v0 = vld [vmem:[%s5494_s5 + $0x1] ss:$0 sm:$0xff]  ;;  %v4615_v22 = vld [vmem:[#allocation11 + $0xb8] sm:$0xff]  }
0x122c   :  { %v4624_v38 = vld [vmem:[#allocation11 + $0xd0] sm:$0xff]  }
0x122e   :  { %v4419_v10 = vpop.permute.xlu1 %4418  ;;  %3415 = vmatpush1.bf16.msra.mxu1 %v4572_v41 }
0x122f   :  { %v4421_v23 = vunpack.i.h.bf16 %v4419_v10  ;;  %v4420_v39 = vunpack.i.l.bf16 %v4419_v10  ;;  %v4616_v10 = vld [vmem:[#allocation11 + $0xf0] sm:$0xff]  }
0x1231   :  { %v2641_v50 = vsel %vm849_vm5, %v2640_v55, %v4420_v39  ;;  %v3084_v51 = vsel %vm849_vm5, %v3083_v58, %v4421_v23  ;;  %v4617_v23 = vld [vmem:[#allocation11 + $0xb0] sm:$0xff]   ;;  %v4618_v39 = vld [vmem:[#allocation11 + $0xe8] sm:$0xff]   ;;  %v4620_v58 = vld [vmem:[#allocation11 + $0xe0] sm:$0xff]  }
0x1232   :  { %v3085_v21 = vpack.c.bf16 %v3084_v51, %v2641_v50  ;;  %v4619_v55 = vld [vmem:[#allocation11 + $0xa8] sm:$0xff]   ;;  %v4621_v50 = vld [vmem:[#allocation11 + $0xa0] sm:$0xff]   ;;  %v4622_v51 = vld [vmem:[#allocation11 + $0xd8] sm:$0xff]  }
0x1234   :  { %4369 = vmatmul.mubr.bf16.vlgmr.msra.gmra.mxu0 %v3085_v21  ;;  %v4623_v21 = vld [vmem:[#allocation11 + $0x98] sm:$0xff]  }
0x1235   :  { %3487 = vmatprep.mubr.bf16.mxu0 %v4901_v26  ;;  %3456 = vmatpush1.bf16.msra.mxu0 %v4569_v27  ;;  %v4626_v27 = vld [vmem:[#allocation11 + $0xc8] sm:$0xff]  }
0x1236   :  { %3457 = vmatprep.subr.bf16.mxu0 %v4577_v36 }
0x1239   :  { %3458 = vmatpush1.bf16.msra.mxu0 %v4575_v43 }
0x123a   :  { %3459 = vmatprep.subr.bf16.mxu0 %v4583_v45 }
0x123d   :  { %3460 = vmatpush1.bf16.msra.mxu0 %v4581_v53 }
0x123e   :  { %3461 = vmatprep.subr.bf16.mxu0 %v4589_v42 }
0x1241   :  { %3462 = vmatpush1.bf16.msra.mxu0 %v4587_v16 }
0x1242   :  { %3463 = vmatprep.subr.bf16.mxu0 %v4595_v59 }
0x1245   :  { %3464 = vmatpush1.bf16.msra.mxu0 %v4593_v24 }
0x1246   :  { %3465 = vmatprep.subr.bf16.mxu0 %v4601_v3 }
0x1249   :  { %3466 = vmatpush1.bf16.msra.mxu0 %v4599_v7 }
0x124a   :  { %3467 = vmatprep.subr.bf16.mxu0 %v4607_v9 }
0x124d   :  { %3468 = vmatpush1.bf16.msra.mxu0 %v4605_v12 }
0x124e   :  { %3469 = vmatprep.subr.bf16.mxu0 %v4613_v5 }
0x1251   :  { %3470 = vmatpush1.bf16.msra.mxu0 %v4611_v13 }
0x12f4   :  { %v3185_v28 = vpop.f32.mrf.mxu0 }
0x12f5   :  { %v5464_v29 = vadd.f32 %v3185_v28, %v5236_v44  ;;  %v4580_v44 = vld [vmem:[#allocation10 + $0x1a4] ss:$16 sps:$4 sm:$0xff]  }
0x12f6   :  { %v4370_v30 = vpop.f32.mrf.mxu0  ;;  %3416 = vmatprep.subr.bf16.mxu1 %v4580_v44  ;;  %v4628_v28 = vld [vmem:[#allocation11 + $0xc0] sm:$0xff]  }
0x12f7   :  { %v3196_v1 = vmul.f32 %v5464_v29, %v5464_v29  ;;  %3417 = vmatpush1.bf16.msra.mxu1 %v4578_v49  ;;  %v4629_v30 = vld [vmem:[#allocation11 + $0x80] sm:$0xff]  }
0x12f8   :  { %v3188_v52 = vpop.f32.mrf.mxu0 }
0x12f9   :  { %v5469_v56 = vadd.f32 %v3188_v52, %v5241_v48  ;;  %3198 = vadd.xlane.f32.xlu1 %v3196_v1  ;;  %v4586_v48 = vld [vmem:[#allocation10 + $0x184] ss:$16 sps:$4 sm:$0xff]  }
0x12fa   :  { %v4371_v26 = vpop.f32.mrf.mxu0  ;;  %3418 = vmatprep.subr.bf16.mxu1 %v4586_v48 }
0x12fb   :  { %v3197_v33 = vmul.f32 %v5469_v56, %v5469_v56  ;;  %3419 = vmatpush1.bf16.msra.mxu1 %v4584_v57 }
0x12fc   :  { %3420 = vmatprep.subr.bf16.mxu1 %v4592_v47 }
0x12fd   :  { %3200 = vadd.xlane.f32.xlu0 %v3197_v33 }
0x12ff   :  { %3421 = vmatpush1.bf16.msra.mxu1 %v4590_v62 }
0x1300   :  { %3422 = vmatprep.subr.bf16.mxu1 %v4598_v4 }
0x1303   :  { %3423 = vmatpush1.bf16.msra.mxu1 %v4596_v6 }
0x1304   :  { %3424 = vmatprep.subr.bf16.mxu1 %v4604_v8 }
0x1307   :  { %3425 = vmatpush1.bf16.msra.mxu1 %v4602_v11 }
0x1308   :  { %3426 = vmatprep.subr.bf16.mxu1 %v4610_v32 }
0x130b   :  { %3427 = vmatpush1.bf16.msra.mxu1 %v4608_v14 }
0x130c   :  { %4078 = vmatprep.subr.bf16.mxu1 %v4614_v35 }
0x1382   :  { %v3199_v61 = vpop.xlane.xlu1 %3198 }
0x1383   :  { %v3202_v46 = vmul.f32 0.0078125, %v3199_v61 }
0x1385   :  { %v3204_v34 = vadd.f32 1e-06, %v3202_v46 }
0x1386   :  { %v3201_v17 = vpop.xlane.xlu0 %3200 }
0x1387   :  { %4714 = vrsqrt.f32 %v3204_v34  ;;  %v3203_v31 = vmul.f32 0.0078125, %v3201_v17 }
0x1389   :  { %v3205_v40 = vadd.f32 1e-06, %v3203_v31 }
0x138b   :  { %4716 = vrsqrt.f32 %v3205_v40 }
0x1394   :  { %v4715_v2 = vpop.eup %4714 }
0x1395   :  { %v3208_v15 = vmul.f32 %v4715_v2, %v5464_v29 }
0x1397   :  { %v3216_v20 = vmul.f32 %v3906_v0, %v3208_v15 }
0x1398   :  { %v4717_v18 = vpop.eup %4716 }
0x1399   :  { %v3209_v19 = vmul.f32 %v4717_v18, %v5469_v56 }
0x139b   :  { %v3217_v25 = vmul.f32 %v3906_v0, %v3209_v19 }
0x139d   :  { %v3218_v54 = vpack.c.bf16 %v3217_v25, %v3216_v20 }
0x139f   :  { %3445 = vmatmul.mubr.bf16.vlgmr.msra.gmra.mxu1 %v3218_v54  ;;  %3488 = vmatmul.mubr.bf16.vlgmr.msra.gmra.mxu0 %v3218_v54 }
0x13a0   :  { %4079 = vmatpush3.bf16.msra.mxu1 %v4615_v22 }
0x13a1   :  { %4080 = vmatprep.subr.bf16.mxu1 %v4616_v10 }
0x13a4   :  { %4081 = vmatpush3.bf16.msra.mxu1 %v4617_v23 }
0x13a5   :  { %4082 = vmatprep.subr.bf16.mxu1 %v4618_v39 }
0x13a8   :  { %4083 = vmatpush3.bf16.msra.mxu1 %v4619_v55 }
0x13a9   :  { %4084 = vmatprep.subr.bf16.mxu1 %v4620_v58 }
0x13ac   :  { %4085 = vmatpush3.bf16.msra.mxu1 %v4621_v50 }
0x13ad   :  { %4086 = vmatprep.subr.bf16.mxu1 %v4622_v51 }
0x13b0   :  { %4087 = vmatpush3.bf16.msra.mxu1 %v4623_v21 }
0x13b1   :  { %4088 = vmatprep.subr.bf16.mxu1 %v4624_v38 }
0x13b4   :  { %4089 = vmatpush3.bf16.msra.mxu1 %v4625_v63 }
0x13b5   :  { %4090 = vmatprep.subr.bf16.mxu1 %v4626_v27 }
0x13b8   :  { %4091 = vmatpush3.bf16.msra.mxu1 %v4627_v37 }
0x13b9   :  { %4092 = vmatprep.subr.bf16.mxu1 %v4628_v28 }
0x13bc   :  { %4093 = vmatpush3.bf16.msra.mxu1 %v4629_v30 }
0x145f   :  { %v3446_v1 = vpop.f32.mrf.mxu1  ;;  %v3489_v8 = vpop.f32.mrf.mxu0 }
0x1460   :  { %v3502_v52 = vmul.f32 0.044715, %v3446_v1  ;;  %v3498_v17 = vmul.f32 0.5, %v3446_v1 }
0x1461   :  { %v3448_v26 = vpop.f32.mrf.mxu1  ;;  %v3491_v12 = vpop.f32.mrf.mxu0 }
0x1462   :  { %v3506_v33 = vmul.f32 %v3502_v52, %v3446_v1  ;;  %v3503_v60 = vmul.f32 0.044715, %v3448_v26  ;;  %v3499_v13 = vmul.f32 0.5, %v3448_v26 }
0x1463   :  { %v3450_v36 = vpop.f32.mrf.mxu1  ;;  %v3493_v31 = vpop.f32.mrf.mxu0 }
0x1464   :  { %v3510_v41 = vmul.f32 %v3506_v33, %v3446_v1  ;;  %v3507_v43 = vmul.f32 %v3503_v60, %v3448_v26  ;;  %v3504_v44 = vmul.f32 0.044715, %v3450_v36  ;;  %v3500_v61 = vmul.f32 0.5, %v3450_v36 }
0x1465   :  { %v3452_v45 = vpop.f32.mrf.mxu1  ;;  %v3495_v25 = vpop.f32.mrf.mxu0 }
0x1466   :  { %v3514_v49 = vadd.f32 %v3510_v41, %v3446_v1  ;;  %v3511_v53 = vmul.f32 %v3507_v43, %v3448_v26  ;;  %v3508_v48 = vmul.f32 %v3504_v44, %v3450_v36  ;;  %v3505_v42 = vmul.f32 0.044715, %v3452_v45 }
0x1467   :  { %v3501_v15 = vmul.f32 0.5, %v3452_v45 }
0x1468   :  { %v3518_v57 = vmul.f32 0.7978846, %v3514_v49  ;;  %v3515_v16 = vadd.f32 %v3511_v53, %v3448_v26  ;;  %v3512_v47 = vmul.f32 %v3508_v48, %v3450_v36  ;;  %v3509_v59 = vmul.f32 %v3505_v42, %v3452_v45 }
0x146a   :  { %v3519_v62 = vmul.f32 0.7978846, %v3515_v16  ;;  %v3516_v24 = vadd.f32 %v3512_v47, %v3450_v36  ;;  %v3513_v4 = vmul.f32 %v3509_v59, %v3452_v45  ;;  %4718 = vtanh.f32 %v3518_v57 }
0x146c   :  { %4720 = vtanh.f32 %v3519_v62  ;;  %v3520_v3 = vmul.f32 0.7978846, %v3516_v24  ;;  %v3517_v6 = vadd.f32 %v3513_v4, %v3452_v45 }
0x146e   :  { %4722 = vtanh.f32 %v3520_v3  ;;  %v3521_v7 = vmul.f32 0.7978846, %v3517_v6 }
0x1470   :  { %4724 = vtanh.f32 %v3521_v7 }
0x1477   :  { %v4719_v9 = vpop.eup %4718 }
0x1478   :  { %v3526_v14 = vadd.f32 1.0, %v4719_v9 }
0x1479   :  { %v4721_v11 = vpop.eup %4720 }
0x147a   :  { %v3527_v32 = vadd.f32 1.0, %v4721_v11  ;;  %v3530_v0 = vmul.f32 %v3526_v14, %v3498_v17 }
0x147b   :  { %v4723_v5 = vpop.eup %4722 }
0x147c   :  { %v3528_v46 = vadd.f32 1.0, %v4723_v5  ;;  %v3531_v40 = vmul.f32 %v3527_v32, %v3499_v13  ;;  %v3534_v22 = vmul.f32 %v3530_v0, %v3489_v8 }
0x147d   :  { %v4725_v34 = vpop.eup %4724 }
0x147e   :  { %v3532_v2 = vmul.f32 %v3528_v46, %v3500_v61  ;;  %v3529_v18 = vadd.f32 1.0, %v4725_v34  ;;  %v3535_v54 = vmul.f32 %v3531_v40, %v3491_v12 }
0x1480   :  { %v3533_v19 = vmul.f32 %v3529_v18, %v3501_v15  ;;  %v3536_v20 = vmul.f32 %v3532_v2, %v3493_v31 }
0x1482   :  { %v3537_v35 = vmul.f32 %v3533_v19, %v3495_v25  ;;  %v3538_v23 = vpack.c.bf16 %v3536_v20, %v3534_v22 }
0x1484   :  { %v3539_v10 = vpack.c.bf16 %v3537_v35, %v3535_v54 }
0x1486   :  { %3701 = vmatprep.mubr.bf16.mxu1 %v3539_v10 }
0x1487   :  { %3702 = vmatmul.mubr.bf16.vlgmr.msra.gmra.mxu1 %v3538_v23 }
0x1547   :  { %v4094_v39 = vpop.f32.mrf.mxu1 }
0x1549   :  { %v4095_v55 = vpop.f32.mrf.mxu1 }
0x154a   :  { %v4096_v58 = vadd.f32 %v4095_v55, %v4094_v39 }
0x154b   :  { %v4097_v50 = vpop.f32.mrf.mxu1 }
0x154c   :  { %v3710_v51 = vadd.f32 %v4096_v58, %v5464_v29  ;;  %v3955_v29 = vld [vmem:[%s5497_s8] ss:$0 sm:$0xff] }
0x154d   :  { %v4098_v21 = vpop.f32.mrf.mxu1 }
0x154e   :  { %v4099_v38 = vadd.f32 %v4098_v21, %v4097_v50  ;;  %v3713_v63 = vmul.f32 %v3710_v51, %v3710_v51 }
0x1550   :  { %v3711_v27 = vadd.f32 %v4099_v38, %v5469_v56  ;;  %3715 = vadd.xlane.f32.xlu0 %v3713_v63 }
0x1552   :  { %v3714_v37 = vmul.f32 %v3711_v27, %v3711_v27 }
0x1554   :  { %3717 = vadd.xlane.f32.xlu1 %v3714_v37 }
0x15d9   :  { %v3716_v28 = vpop.xlane.xlu0 %3715 }
0x15da   :  { %v3719_v30 = vmul.f32 0.0078125, %v3716_v28 }
0x15dc   :  { %v3721_v1 = vadd.f32 1e-06, %v3719_v30 }
0x15dd   :  { %v3718_v52 = vpop.xlane.xlu1 %3717 }
0x15de   :  { %4726 = vrsqrt.f32 %v3721_v1  ;;  %v3720_v26 = vmul.f32 0.0078125, %v3718_v52 }
0x15e0   :  { %v3722_v33 = vadd.f32 1e-06, %v3720_v26 }
0x15e2   :  { %4728 = vrsqrt.f32 %v3722_v33 }
0x15eb   :  { %v4727_v60 = vpop.eup %4726 }
0x15ec   :  { %v3725_v36 = vmul.f32 %v4727_v60, %v3710_v51 }
0x15ee   :  { %v3733_v41 = vmul.f32 %v3955_v29, %v3725_v36 }
0x15ef   :  { %v4729_v43 = vpop.eup %4728 }
0x15f0   :  { %v3726_v56 = vmul.f32 %v4729_v43, %v3711_v27  ;;  %3735 = vst [vmem:[#allocation13] sm:$0xff] %v3733_v41 }
0x15f2   :  { %v3734_v44 = vmul.f32 %v3955_v29, %v3726_v56 }
0x15f4   :  { %3736 = vst [vmem:[#allocation13 + $0x8] sm:$0xff] %v3734_v44 }
0x15f5   :  { %4867 = shalt.err (!%p4864_p6)
}
0x15f6   :  { %3748 = dma.vmem_to_hbm [thread:$0]  %s3743_s10, 256, %s5498_s9, [#allocation4], %s4888_s14, %s4888_s14, %s4889_s15  }
0x15f7   :  { %4884 = dma.done.wait [#allocation4], 256  }
0x15f8   :  { %4885 = vsyncadd [#allocation4], 4294967040 }
0x15f9   :  { %3752 = vsyncpa [#allocation3], 1 }
0x15fa   :  { %3753 = vsyncpa [#allocation6], 1 }
0x15fb   :  { %3754 = vsyncpa [#allocation9], 1 }
0x15fc   :  { %3755 = vsyncpa [#allocation12], 1 }
0x15fd   :  { %3756 = vsyncpa [#allocation4], 1 }

</bundles_post_ra>
